<compile_context>
chip_gen: v7x
topology: tpu7x:2x2x1
jax: 0.10.0
libtpu: 0.0.40
codegen_flags: <defaults>
</compile_context>

<pallas_src>
import functools

import jax
import jax.numpy as jnp
import numpy as np
from jax.experimental import pallas as pl
from jax.experimental.pallas import tpu as pltpu


# ---------------------------------------------------------------------------
# Pallas kernel: full forward for one (TB, 64) batch tile, everything in vregs.
# ---------------------------------------------------------------------------
def radar_cnn2_kernel(
    x_ref,                           # (TB, 64)    bf16
    w1t_ref, b1t_ref,                # (64, 768)   bf16 / (1, 768)  f32
    fw1b_ref, fb1b_ref,              # (256, 512)  bf16 / (1, 512)  f32
    w2t_ref, b2t_ref,                # (512, 1024) bf16 / (1, 1024) f32
    fw2b_ref, fb2b_ref,              # (512, 1024) bf16 / (1, 1024) f32
    w3t_ref, b3t_ref,                # (1024, 256) bf16 / (1, 256)  f32
    fw3p_ref, fb3p_ref,              # (128, 128)  bf16 / (1, 128)  f32 (pads = -1e30)
    out_ref,                         # (TB, 128)   f32
):
    f32, bf16 = jnp.float32, jnp.bfloat16

    def mm(a, w_ref, b_ref):
        # bf16 MXU matmul with f32 accumulation + f32 bias add.
        return jnp.dot(a.astype(bf16), w_ref[...],
                       preferred_element_type=f32) + b_ref[...]

    # stage 1: conv1(1->8,k5,p1)+pool(3) fused into one Toeplitz matmul, then fc1(20->64)
    c1 = mm(x_ref[...], w1t_ref, b1t_ref)                    # (TB, 3*256) window-major
    p1 = jnp.maximum(jnp.maximum(c1[:, 0:256], c1[:, 256:512]), c1[:, 512:768])
    h1 = mm(p1, fw1b_ref, fb1b_ref)                          # (TB, 8*64)

    # stage 2: conv2(8->16,k6,p1)+pool(2), then fc2(30->64)
    c2 = mm(h1, w2t_ref, b2t_ref)                            # (TB, 2*512)
    p2 = jnp.maximum(c2[:, 0:512], c2[:, 512:1024])
    h2 = mm(p2, fw2b_ref, fb2b_ref)                          # (TB, 16*64)

    # stage 3: conv3(16->1,k5,p1)+pool(2) -> 31 features (padded to 128 lanes)
    c3 = mm(h2, w3t_ref, b3t_ref)                            # (TB, 2*128)
    p3 = jnp.maximum(c3[:, 0:128], c3[:, 128:256])           # (TB, 128)

    # head: Linear(31,64) widened to 128 lanes (cols 64..127 have bias -1e30 so they
    # vanish from the softmax), softmax over the feature dim, full-width store.
    logits = mm(p3, fw3p_ref, fb3p_ref)                      # (TB, 128)
    m = jnp.max(logits, axis=1, keepdims=True)
    e = jnp.exp(logits - m)
    denom = jnp.sum(e, axis=1, keepdims=True)
    out_ref[...] = e * pl.reciprocal(denom, approx=True)     # unmasked 128-lane store


# ---------------------------------------------------------------------------
# Host-side weight re-packing (run ONCE, outside the jitted forward):
# conv(+pad)+pool -> Toeplitz, per-channel FC -> block-diagonal.
# ---------------------------------------------------------------------------
def conv_pool_toeplitz(w, b, l_in, pool_k, group_pad):
    """Fold Conv1d(padding=1, stride=1) + MaxPool1d(pool_k) column selection.

    Input rows :  c * l_in + m                      (channel-major flattened input)
    Output cols:  j * group_pad + o * S + s,   conv position t = pool_k*s + j,
                  S = floor(l_out / pool_k).
    Max over j becomes a k-way maximum of lane-aligned slices of the matmul result.
    """
    w = np.asarray(w, np.float32)
    b = np.asarray(b, np.float32)
    c_out, c_in, k_size = w.shape
    l_out = l_in + 2 - k_size + 1
    s_out = l_out // pool_k
    assert c_out * s_out <= group_pad
    wt = np.zeros((c_in * l_in, pool_k * group_pad), np.float32)
    bt = np.zeros((1, pool_k * group_pad), np.float32)
    for o in range(c_out):
        for s in range(s_out):
            for j in range(pool_k):
                col = j * group_pad + o * s_out + s
                t = pool_k * s + j
                bt[0, col] = b[o]
                for c in range(c_in):
                    for k in range(k_size):
                        m = t + k - 1                       # padding = 1
                        if 0 <= m < l_in:
                            wt[c * l_in + m, col] += w[o, c, k]
    return wt, bt


def block_diag_fc(fw, fb, n_blocks, in_rows_pad, out_cols_pad=None, pad_bias=0.0):
    """Per-channel Linear on the last dim -> block-diagonal matmul.

    fw: (out_f, in_f) torch layout, fb: (out_f,).
    Rows: blk*in_f + i (rest zero).  Cols: blk*out_f + d (padding cols get `pad_bias`).
    """
    fw = np.asarray(fw, np.float32)
    fb = np.asarray(fb, np.float32)
    out_f, in_f = fw.shape
    cols = n_blocks * out_f
    if out_cols_pad is None:
        out_cols_pad = cols
    assert n_blocks * in_f <= in_rows_pad and cols <= out_cols_pad
    W = np.zeros((in_rows_pad, out_cols_pad), np.float32)
    B = np.full((1, out_cols_pad), pad_bias, np.float32)
    for blk in range(n_blocks):
        W[blk * in_f:(blk + 1) * in_f, blk * out_f:(blk + 1) * out_f] = fw.T
        B[0, blk * out_f:(blk + 1) * out_f] = fb
    return W, B


def build_kernel_params(p):
    """Pack torch-layout params into kernel weight matrices.  Call ONCE and reuse."""
    w1t, b1t = conv_pool_toeplitz(p["w1"], p["b1"], 64, 3, 256)      # (64, 768)
    fw1b, fb1b = block_diag_fc(p["fw1"], p["fb1"], 8, 256)           # (256, 512)
    w2t, b2t = conv_pool_toeplitz(p["w2"], p["b2"], 64, 2, 512)      # (512, 1024)
    fw2b, fb2b = block_diag_fc(p["fw2"], p["fb2"], 16, 512)          # (512, 1024)
    w3t, b3t = conv_pool_toeplitz(p["w3"], p["b3"], 64, 2, 128)      # (1024, 256)
    # head widened to 128 output lanes; pad columns get a huge negative bias so the
    # in-kernel softmax ignores them (lane-dense unmasked output store).
    fw3p, fb3p = block_diag_fc(p["fw3"], p["fb3"], 1, 128,
                               out_cols_pad=128, pad_bias=-1e30)     # (128, 128)
    bf = lambda a: jnp.asarray(a, jnp.bfloat16)
    f32 = lambda a: jnp.asarray(a, jnp.float32)
    return dict(
        w1t=bf(w1t), b1t=f32(b1t), fw1b=bf(fw1b), fb1b=f32(fb1b),
        w2t=bf(w2t), b2t=f32(b2t), fw2b=bf(fw2b), fb2b=f32(fb2b),
        w3t=bf(w3t), b3t=f32(b3t), fw3p=bf(fw3p), fb3p=f32(fb3p),
    )


# ---------------------------------------------------------------------------
# Wrapper: jitted, batch-tiled grid (parallel axis), weights resident via
# constant index maps.  Packed weights are passed in (built once by the caller).
# ---------------------------------------------------------------------------
def _round_up(n, m):
    return ((n + m - 1) // m) * m


def _pick_batch_tile(n):
    # Split the batch into >=2 tiles when possible (feeds both v7x TensorCores),
    # 16-sublane aligned for the bf16 operands, capped at 512 so intermediates
    # (~20 KiB f32 per row) + weights stay well inside v7x's 64 MiB VMEM.
    half = -(-n // 2)
    return min(512, _round_up(max(half, 1), 16))


@functools.partial(jax.jit, static_argnames=("batch_tile",))
def radar_cnn2_forward(x, packed, batch_tile=None):
    n = x.shape[0]
    tb = _pick_batch_tile(n) if batch_tile is None else batch_tile
    n_pad = _round_up(n, tb)

    # bf16 input: halves the x DMA; the first matmul consumes bf16 anyway.
    x2 = jnp.reshape(x, (n, 64)).astype(jnp.bfloat16)
    if n_pad != n:
        x2 = jnp.pad(x2, ((0, n_pad - n), (0, 0)))

    weights = (
        packed["w1t"], packed["b1t"], packed["fw1b"], packed["fb1b"],
        packed["w2t"], packed["b2t"], packed["fw2b"], packed["fb2b"],
        packed["w3t"], packed["b3t"], packed["fw3p"], packed["fb3p"],
    )
    weight_specs = [pl.BlockSpec(w.shape, lambda i: (0, 0)) for w in weights]

    out = pl.pallas_call(
        radar_cnn2_kernel,
        out_shape=jax.ShapeDtypeStruct((n_pad, 128), jnp.float32),
        grid=(n_pad // tb,),
        in_specs=[pl.BlockSpec((tb, 64), lambda i: (i, 0))] + weight_specs,
        out_specs=pl.BlockSpec((tb, 128), lambda i: (i, 0)),
        compiler_params=pltpu.CompilerParams(
            dimension_semantics=("parallel",),
            vmem_limit_bytes=48 * 1024 * 1024),
    )(x2, *weights)
    return out[:n, :64]


# ---------------------------------------------------------------------------
# Deterministic PyTorch-style init (native torch layouts).
# ---------------------------------------------------------------------------
def init_params(key):
    ks = jax.random.split(key, 12)

    def u(k, shape, fan_in):
        bound = 1.0 / np.sqrt(fan_in)
        return jax.random.uniform(k, shape, jnp.float32, -bound, bound)

    return dict(
        w1=u(ks[0], (8, 1, 5), 5),     b1=u(ks[1], (8,), 5),
        fw1=u(ks[2], (64, 20), 20),    fb1=u(ks[3], (64,), 20),
        w2=u(ks[4], (16, 8, 6), 48),   b2=u(ks[5], (16,), 48),
        fw2=u(ks[6], (64, 30), 30),    fb2=u(ks[7], (64,), 30),
        w3=u(ks[8], (1, 16, 5), 80),   b3=u(ks[9], (1,), 80),
        fw3=u(ks[10], (64, 31), 31),   fb3=u(ks[11], (64,), 31),
    )


# ---------------------------------------------------------------------------
# Pure-JAX reference (straight conv/pool/fc math, f32) for a sanity check.
# ---------------------------------------------------------------------------
def reference_forward(x, p):
    def conv1d(xc, w, b):            # xc (Cin, L), w (Cout, Cin, K), b (Cout,)
        c_out, c_in, k_size = w.shape
        l_in = xc.shape[1]
        l_out = l_in + 2 - k_size + 1
        xp = jnp.pad(xc, ((0, 0), (1, 1)))
        out = jnp.zeros((c_out, l_out), jnp.float32)
        for k in range(k_size):
            out = out + w[:, :, k] @ xp[:, k:k + l_out]
        return out + b[:, None]

    def maxpool(xc, k):
        c, l = xc.shape
        lo = l // k
        return xc[:, :lo * k].reshape(c, lo, k).max(axis=2)

    outs = []
    for i in range(x.shape[0]):
        h = x[i]                                            # (1, 64)
        h = maxpool(conv1d(h, p["w1"], p["b1"]), 3)         # (8, 20)
        h = h @ p["fw1"].T + p["fb1"][None, :]              # (8, 64)
        h = maxpool(conv1d(h, p["w2"], p["b2"]), 2)         # (16, 30)
        h = h @ p["fw2"].T + p["fb2"][None, :]              # (16, 64)
        h = maxpool(conv1d(h, p["w3"], p["b3"]), 2)         # (1, 31)
        logits = h @ p["fw3"].T + p["fb3"][None, :]         # (1, 64)
        outs.append(jax.nn.softmax(logits, axis=1))
    return jnp.concatenate(outs, axis=0)


if __name__ == "__main__":
    key = jax.random.PRNGKey(0)
    kx, kp = jax.random.split(key)
    # batch=2, channels=1, length=64 (length forced by Linear(20,64) after pool-3)
    x = jax.random.normal(kx, (2, 1, 64), dtype=jnp.float32)
    params = init_params(kp)

    # Pack / upload the kernel weight matrices ONCE; the jitted forward reuses them.
    packed = build_kernel_params(params)

    out = radar_cnn2_forward(x, packed)
    out = jax.block_until_ready(out)

    ref = reference_forward(x, params)
    np.testing.assert_allclose(np.asarray(out), np.asarray(ref), atol=2e-3, rtol=1e-2)
    assert out.shape == (2, 64)
    print("KERNEL_OK")
</pallas_src>

<mosaic_0001>
module attributes {stable_mosaic.version = 11 : i64} {
  func.func @radar_cnn2_kernel(%arg0: i32, %arg1: memref<16x64xbf16, #tpu.memory_space<vmem>>, %arg2: memref<64x768xbf16, #tpu.memory_space<vmem>>, %arg3: memref<1x768xf32, #tpu.memory_space<vmem>>, %arg4: memref<256x512xbf16, #tpu.memory_space<vmem>>, %arg5: memref<1x512xf32, #tpu.memory_space<vmem>>, %arg6: memref<512x1024xbf16, #tpu.memory_space<vmem>>, %arg7: memref<1x1024xf32, #tpu.memory_space<vmem>>, %arg8: memref<512x1024xbf16, #tpu.memory_space<vmem>>, %arg9: memref<1x1024xf32, #tpu.memory_space<vmem>>, %arg10: memref<1024x256xbf16, #tpu.memory_space<vmem>>, %arg11: memref<1x256xf32, #tpu.memory_space<vmem>>, %arg12: memref<128x128xbf16, #tpu.memory_space<vmem>>, %arg13: memref<1x128xf32, #tpu.memory_space<vmem>>, %arg14: memref<16x128xf32, #tpu.memory_space<vmem>>) attributes {dimension_semantics = [#tpu.dimension_semantics<parallel>], iteration_bounds = array<i64: 1>, scalar_prefetch = 0 : i64, scratch_operands = 0 : i64, tpu.core_type = #tpu.core_type<tc>, window_params = [{transform_indices = @transform_0, window_bounds = array<i64: 16, 64>}, {pipeline_mode = #tpu.pipeline_mode<synchronous>, transform_indices = @transform_1, window_bounds = array<i64: 64, 768>}, {pipeline_mode = #tpu.pipeline_mode<synchronous>, transform_indices = @transform_2, window_bounds = array<i64: 1, 768>}, {pipeline_mode = #tpu.pipeline_mode<synchronous>, transform_indices = @transform_3, window_bounds = array<i64: 256, 512>}, {pipeline_mode = #tpu.pipeline_mode<synchronous>, transform_indices = @transform_4, window_bounds = array<i64: 1, 512>}, {pipeline_mode = #tpu.pipeline_mode<synchronous>, transform_indices = @transform_5, window_bounds = array<i64: 512, 1024>}, {pipeline_mode = #tpu.pipeline_mode<synchronous>, transform_indices = @transform_6, window_bounds = array<i64: 1, 1024>}, {pipeline_mode = #tpu.pipeline_mode<synchronous>, transform_indices = @transform_7, window_bounds = array<i64: 512, 1024>}, {pipeline_mode = #tpu.pipeline_mode<synchronous>, transform_indices = @transform_8, window_bounds = array<i64: 1, 1024>}, {pipeline_mode = #tpu.pipeline_mode<synchronous>, transform_indices = @transform_9, window_bounds = array<i64: 1024, 256>}, {pipeline_mode = #tpu.pipeline_mode<synchronous>, transform_indices = @transform_10, window_bounds = array<i64: 1, 256>}, {pipeline_mode = #tpu.pipeline_mode<synchronous>, transform_indices = @transform_11, window_bounds = array<i64: 128, 128>}, {pipeline_mode = #tpu.pipeline_mode<synchronous>, transform_indices = @transform_12, window_bounds = array<i64: 1, 128>}, {transform_indices = @transform_13, window_bounds = array<i64: 16, 128>}]} {
    %c0 = arith.constant 0 : index
    %c0_0 = arith.constant 0 : index
    %0 = vector.load %arg1[%c0, %c0_0] : memref<16x64xbf16, #tpu.memory_space<vmem>>, vector<16x64xbf16>
    %c0_1 = arith.constant 0 : index
    %c0_2 = arith.constant 0 : index
    %1 = vector.load %arg2[%c0_1, %c0_2] : memref<64x768xbf16, #tpu.memory_space<vmem>>, vector<64x768xbf16>
    %cst = arith.constant dense<0.000000e+00> : vector<16x768xf32>
    %2 = tpu.matmul %0, %1, %cst {dimension_numbers = #tpu.dot_dimension_numbers<[1], [0], [0], [1], [0, 0, 1, 1], [], []>} : vector<16x64xbf16>, vector<64x768xbf16>, vector<16x768xf32> -> vector<16x768xf32>
    %c0_3 = arith.constant 0 : index
    %c0_4 = arith.constant 0 : index
    %3 = vector.load %arg3[%c0_3, %c0_4] : memref<1x768xf32, #tpu.memory_space<vmem>>, vector<1x768xf32>
    %4 = vector.broadcast %3 : vector<1x768xf32> to vector<16x768xf32>
    %5 = arith.addf %2, %4 : vector<16x768xf32>
    %6 = vector.extract_strided_slice %5 {offsets = [0, 0], sizes = [16, 256], strides = [1, 1]} : vector<16x768xf32> to vector<16x256xf32>
    %7 = vector.extract_strided_slice %5 {offsets = [0, 256], sizes = [16, 256], strides = [1, 1]} : vector<16x768xf32> to vector<16x256xf32>
    %8 = arith.maximumf %6, %7 : vector<16x256xf32>
    %9 = vector.extract_strided_slice %5 {offsets = [0, 512], sizes = [16, 256], strides = [1, 1]} : vector<16x768xf32> to vector<16x256xf32>
    %10 = arith.maximumf %8, %9 : vector<16x256xf32>
    %11 = arith.truncf %10 : vector<16x256xf32> to vector<16x256xbf16>
    %c0_5 = arith.constant 0 : index
    %c0_6 = arith.constant 0 : index
    %12 = vector.load %arg4[%c0_5, %c0_6] : memref<256x512xbf16, #tpu.memory_space<vmem>>, vector<256x512xbf16>
    %cst_7 = arith.constant dense<0.000000e+00> : vector<16x512xf32>
    %13 = tpu.matmul %11, %12, %cst_7 {dimension_numbers = #tpu.dot_dimension_numbers<[1], [0], [0], [1], [0, 0, 1, 1], [], []>} : vector<16x256xbf16>, vector<256x512xbf16>, vector<16x512xf32> -> vector<16x512xf32>
    %c0_8 = arith.constant 0 : index
    %c0_9 = arith.constant 0 : index
    %14 = vector.load %arg5[%c0_8, %c0_9] : memref<1x512xf32, #tpu.memory_space<vmem>>, vector<1x512xf32>
    %15 = vector.broadcast %14 : vector<1x512xf32> to vector<16x512xf32>
    %16 = arith.addf %13, %15 : vector<16x512xf32>
    %17 = arith.truncf %16 : vector<16x512xf32> to vector<16x512xbf16>
    %c0_10 = arith.constant 0 : index
    %c0_11 = arith.constant 0 : index
    %18 = vector.load %arg6[%c0_10, %c0_11] : memref<512x1024xbf16, #tpu.memory_space<vmem>>, vector<512x1024xbf16>
    %cst_12 = arith.constant dense<0.000000e+00> : vector<16x1024xf32>
    %19 = tpu.matmul %17, %18, %cst_12 {dimension_numbers = #tpu.dot_dimension_numbers<[1], [0], [0], [1], [0, 0, 1, 1], [], []>} : vector<16x512xbf16>, vector<512x1024xbf16>, vector<16x1024xf32> -> vector<16x1024xf32>
    %c0_13 = arith.constant 0 : index
    %c0_14 = arith.constant 0 : index
    %20 = vector.load %arg7[%c0_13, %c0_14] : memref<1x1024xf32, #tpu.memory_space<vmem>>, vector<1x1024xf32>
    %21 = vector.broadcast %20 : vector<1x1024xf32> to vector<16x1024xf32>
    %22 = arith.addf %19, %21 : vector<16x1024xf32>
    %23 = vector.extract_strided_slice %22 {offsets = [0, 0], sizes = [16, 512], strides = [1, 1]} : vector<16x1024xf32> to vector<16x512xf32>
    %24 = vector.extract_strided_slice %22 {offsets = [0, 512], sizes = [16, 512], strides = [1, 1]} : vector<16x1024xf32> to vector<16x512xf32>
    %25 = arith.maximumf %23, %24 : vector<16x512xf32>
    %26 = arith.truncf %25 : vector<16x512xf32> to vector<16x512xbf16>
    %c0_15 = arith.constant 0 : index
    %c0_16 = arith.constant 0 : index
    %27 = vector.load %arg8[%c0_15, %c0_16] : memref<512x1024xbf16, #tpu.memory_space<vmem>>, vector<512x1024xbf16>
    %cst_17 = arith.constant dense<0.000000e+00> : vector<16x1024xf32>
    %28 = tpu.matmul %26, %27, %cst_17 {dimension_numbers = #tpu.dot_dimension_numbers<[1], [0], [0], [1], [0, 0, 1, 1], [], []>} : vector<16x512xbf16>, vector<512x1024xbf16>, vector<16x1024xf32> -> vector<16x1024xf32>
    %c0_18 = arith.constant 0 : index
    %c0_19 = arith.constant 0 : index
    %29 = vector.load %arg9[%c0_18, %c0_19] : memref<1x1024xf32, #tpu.memory_space<vmem>>, vector<1x1024xf32>
    %30 = vector.broadcast %29 : vector<1x1024xf32> to vector<16x1024xf32>
    %31 = arith.addf %28, %30 : vector<16x1024xf32>
    %32 = arith.truncf %31 : vector<16x1024xf32> to vector<16x1024xbf16>
    %c0_20 = arith.constant 0 : index
    %c0_21 = arith.constant 0 : index
    %33 = vector.load %arg10[%c0_20, %c0_21] : memref<1024x256xbf16, #tpu.memory_space<vmem>>, vector<1024x256xbf16>
    %cst_22 = arith.constant dense<0.000000e+00> : vector<16x256xf32>
    %34 = tpu.matmul %32, %33, %cst_22 {dimension_numbers = #tpu.dot_dimension_numbers<[1], [0], [0], [1], [0, 0, 1, 1], [], []>} : vector<16x1024xbf16>, vector<1024x256xbf16>, vector<16x256xf32> -> vector<16x256xf32>
    %c0_23 = arith.constant 0 : index
    %c0_24 = arith.constant 0 : index
    %35 = vector.load %arg11[%c0_23, %c0_24] : memref<1x256xf32, #tpu.memory_space<vmem>>, vector<1x256xf32>
    %36 = vector.broadcast %35 : vector<1x256xf32> to vector<16x256xf32>
    %37 = arith.addf %34, %36 : vector<16x256xf32>
    %38 = vector.extract_strided_slice %37 {offsets = [0, 0], sizes = [16, 128], strides = [1, 1]} : vector<16x256xf32> to vector<16x128xf32>
    %39 = vector.extract_strided_slice %37 {offsets = [0, 128], sizes = [16, 128], strides = [1, 1]} : vector<16x256xf32> to vector<16x128xf32>
    %40 = arith.maximumf %38, %39 : vector<16x128xf32>
    %41 = arith.truncf %40 : vector<16x128xf32> to vector<16x128xbf16>
    %c0_25 = arith.constant 0 : index
    %c0_26 = arith.constant 0 : index
    %42 = vector.load %arg12[%c0_25, %c0_26] : memref<128x128xbf16, #tpu.memory_space<vmem>>, vector<128x128xbf16>
    %cst_27 = arith.constant dense<0.000000e+00> : vector<16x128xf32>
    %43 = tpu.matmul %41, %42, %cst_27 {dimension_numbers = #tpu.dot_dimension_numbers<[1], [0], [0], [1], [0, 0, 1, 1], [], []>} : vector<16x128xbf16>, vector<128x128xbf16>, vector<16x128xf32> -> vector<16x128xf32>
    %c0_28 = arith.constant 0 : index
    %c0_29 = arith.constant 0 : index
    %44 = vector.load %arg13[%c0_28, %c0_29] : memref<1x128xf32, #tpu.memory_space<vmem>>, vector<1x128xf32>
    %45 = vector.broadcast %44 : vector<1x128xf32> to vector<16x128xf32>
    %46 = arith.addf %43, %45 : vector<16x128xf32>
    %cst_30 = arith.constant dense<0xFF800000> : vector<16xf32>
    %47 = vector.multi_reduction <maximumf>, %46, %cst_30 [1] : vector<16x128xf32> to vector<16xf32>
    %48 = vector.shape_cast %47 : vector<16xf32> to vector<16x1xf32>
    %49 = vector.broadcast %48 : vector<16x1xf32> to vector<16x128xf32>
    %50 = arith.subf %46, %49 : vector<16x128xf32>
    %51 = math.exp %50 : vector<16x128xf32>
    %cst_31 = arith.constant dense<0.000000e+00> : vector<16xf32>
    %52 = vector.multi_reduction <add>, %51, %cst_31 [1] : vector<16x128xf32> to vector<16xf32>
    %53 = vector.shape_cast %52 : vector<16xf32> to vector<16x1xf32>
    %54 = tpu.reciprocal %53 {approx = true} : vector<16x1xf32> -> vector<16x1xf32>
    %55 = vector.broadcast %54 : vector<16x1xf32> to vector<16x128xf32>
    %56 = arith.mulf %51, %55 : vector<16x128xf32>
    %c0_32 = arith.constant 0 : index
    %c0_33 = arith.constant 0 : index
    %57 = vector.load %arg14[%c0_32, %c0_33] : memref<16x128xf32, #tpu.memory_space<vmem>>, vector<16x128xf32>
    tpu.vector_store %arg14[%c0_32, %c0_33], %56 {strides = array<i32>} : memref<16x128xf32, #tpu.memory_space<vmem>>, vector<16x128xf32>,
    return
  }
  func.func @transform_0(%arg0: i32) -> (i32, i32) {
    %c0_i32 = arith.constant 0 : i32
    %c0_i32_0 = arith.constant 0 : i32
    return %arg0, %c0_i32 : i32, i32
  }
  func.func @transform_1(%arg0: i32) -> (i32, i32) {
    %c0_i32 = arith.constant 0 : i32
    %c0_i32_0 = arith.constant 0 : i32
    %c0_i32_1 = arith.constant 0 : i32
    return %c0_i32, %c0_i32_0 : i32, i32
  }
  func.func @transform_2(%arg0: i32) -> (i32, i32) {
    %c0_i32 = arith.constant 0 : i32
    %c0_i32_0 = arith.constant 0 : i32
    %c0_i32_1 = arith.constant 0 : i32
    return %c0_i32, %c0_i32_0 : i32, i32
  }
  func.func @transform_3(%arg0: i32) -> (i32, i32) {
    %c0_i32 = arith.constant 0 : i32
    %c0_i32_0 = arith.constant 0 : i32
    %c0_i32_1 = arith.constant 0 : i32
    return %c0_i32, %c0_i32_0 : i32, i32
  }
  func.func @transform_4(%arg0: i32) -> (i32, i32) {
    %c0_i32 = arith.constant 0 : i32
    %c0_i32_0 = arith.constant 0 : i32
    %c0_i32_1 = arith.constant 0 : i32
    return %c0_i32, %c0_i32_0 : i32, i32
  }
  func.func @transform_5(%arg0: i32) -> (i32, i32) {
    %c0_i32 = arith.constant 0 : i32
    %c0_i32_0 = arith.constant 0 : i32
    %c0_i32_1 = arith.constant 0 : i32
    return %c0_i32, %c0_i32_0 : i32, i32
  }
  func.func @transform_6(%arg0: i32) -> (i32, i32) {
    %c0_i32 = arith.constant 0 : i32
    %c0_i32_0 = arith.constant 0 : i32
    %c0_i32_1 = arith.constant 0 : i32
    return %c0_i32, %c0_i32_0 : i32, i32
  }
  func.func @transform_7(%arg0: i32) -> (i32, i32) {
    %c0_i32 = arith.constant 0 : i32
    %c0_i32_0 = arith.constant 0 : i32
    %c0_i32_1 = arith.constant 0 : i32
    return %c0_i32, %c0_i32_0 : i32, i32
  }
  func.func @transform_8(%arg0: i32) -> (i32, i32) {
    %c0_i32 = arith.constant 0 : i32
    %c0_i32_0 = arith.constant 0 : i32
    %c0_i32_1 = arith.constant 0 : i32
    return %c0_i32, %c0_i32_0 : i32, i32
  }
  func.func @transform_9(%arg0: i32) -> (i32, i32) {
    %c0_i32 = arith.constant 0 : i32
    %c0_i32_0 = arith.constant 0 : i32
    %c0_i32_1 = arith.constant 0 : i32
    return %c0_i32, %c0_i32_0 : i32, i32
  }
  func.func @transform_10(%arg0: i32) -> (i32, i32) {
    %c0_i32 = arith.constant 0 : i32
    %c0_i32_0 = arith.constant 0 : i32
    %c0_i32_1 = arith.constant 0 : i32
    return %c0_i32, %c0_i32_0 : i32, i32
  }
  func.func @transform_11(%arg0: i32) -> (i32, i32) {
    %c0_i32 = arith.constant 0 : i32
    %c0_i32_0 = arith.constant 0 : i32
    %c0_i32_1 = arith.constant 0 : i32
    return %c0_i32, %c0_i32_0 : i32, i32
  }
  func.func @transform_12(%arg0: i32) -> (i32, i32) {
    %c0_i32 = arith.constant 0 : i32
    %c0_i32_0 = arith.constant 0 : i32
    %c0_i32_1 = arith.constant 0 : i32
    return %c0_i32, %c0_i32_0 : i32, i32
  }
  func.func @transform_13(%arg0: i32) -> (i32, i32) {
    %c0_i32 = arith.constant 0 : i32
    %c0_i32_0 = arith.constant 0 : i32
    return %arg0, %c0_i32 : i32, i32
  }
}

</mosaic_0001>

<bundles_post_ra>
// kernel: radar_cnn2_forward.1
= control target key start
LH: loop header
LB: loop body
LE: loop exit
PB: predicated region body
PF: predicated region fallthrough
CT: control target
= control target key end

     0   :  { %18 = vsyncpa [#allocation3], 0  ;;  %s7702_s0 = inlined_call_operand.vmem [shape: bf16[16,64], index: 0, kind: input, shape index: {}]   ;;  %s7703_s1 = inlined_call_operand.hbm [shape: bf16[64,768], index: 1, kind: input, shape index: {}]   ;;  %s7704_s2 = inlined_call_operand.hbm [shape: f32[1,768], index: 2, kind: input, shape index: {}]   ;;  %s7705_s3 = inlined_call_operand.hbm [shape: bf16[256,512], index: 3, kind: input, shape index: {}]   ;;  %s7706_s4 = inlined_call_operand.vmem [shape: f32[1,512], index: 4, kind: input, shape index: {}]   ;;  %s7707_s5 = inlined_call_operand.hbm [shape: bf16[512,1024], index: 5, kind: input, shape index: {}]   ;;  %s7708_s6 = inlined_call_operand.vmem [shape: f32[1,1024], index: 6, kind: input, shape index: {}]   ;;  %s7709_s7 = inlined_call_operand.hbm [shape: bf16[512,1024], index: 7, kind: input, shape index: {}]   ;;  %s7710_s8 = inlined_call_operand.vmem [shape: f32[1,1024], index: 8, kind: input, shape index: {}]   ;;  %s7711_s9 = inlined_call_operand.hbm [shape: bf16[1024,256], index: 9, kind: input, shape index: {}]   ;;  %s7712_s10 = inlined_call_operand.vmem [shape: f32[1,256], index: 10, kind: input, shape index: {}]   ;;  %s7713_s11 = inlined_call_operand.hbm [shape: bf16[128,128], index: 11, kind: input, shape index: {}]   ;;  %s7714_s12 = inlined_call_operand.vmem [shape: f32[1,128], index: 12, kind: input, shape index: {}]   ;;  %s7715_s13 = inlined_call_operand.vmem [shape: f32[16,128], index: 13, kind: output, shape index: {}]  }
   0x1   :  { %19 = vsyncpa [#allocation5], 0 }
   0x2   :  { %20 = vsyncpa [#allocation8], 0 }
   0x3   :  { %21 = vsyncpa [#allocation11], 0  ;;  %s7292_s25 = smov [#allocation4]   ;;  %s7293_s27 = smov [#allocation7]  }
   0x4   :  { %s42_s26 = sshll.u32 %s7292_s25, 4  ;;  %s65_s28 = sshll.u32 %s7293_s27, 4  ;;  %s43_s26 = int_to_ptr.vmem [resolvable:$true] %s42_s26  ;;  %s7382_s28 = int_to_ptr.vmem [resolvable:$true] %s65_s28 }
   0x5   :  { %s7130_s14 = scalar_lea.hbm %s7704_s2, 96 }
   0x6   :  { %p7131_p0 = scmp.ne.s32.totalorder %s7704_s2, %s7130_s14  ;;  %p7134_p1 = scmp.lt.u32.totalorder %s7130_s14, %s7704_s2 }
   0x8   :  { %p7136_p2 = pnand %p7134_p1, %p7131_p0 }
   0xa   :  { %7139 = shalt.err (!%p7136_p2)
}
   0xb   :  { %s7140_s19 = scalar_lea.vmem %s43_s26, 96  ;;  %p7145_p4 = scmp.lt.s32.totalorder %s43_s26, %s43_s26 }
   0xc   :  { %p7141_p3 = scmp.ne.s32.totalorder %s43_s26, %s7140_s19  ;;  %p7146_p5 = scmp.lt.s32.totalorder %s7140_s19, %s7140_s19 }
   0xe   :  { %p7147_p6 = por %p7146_p5, %p7145_p4 }
  0x10   :  { %p7148_p7 = pnand %p7147_p6, %p7141_p3 }
  0x12   :  { %7151 = shalt.err (!%p7148_p7)
}
  0x13   :  { %45 = dma.hbm_to_vmem [thread:$0]  %s7704_s2, 96, %s43_s26, [#allocation5]  }
  0x14   :  { %s7152_s24 = scalar_lea.hbm %s7707_s5, 32768 }
  0x15   :  { %p7153_p8 = scmp.ne.s32.totalorder %s7707_s5, %s7152_s24  ;;  %p7156_p9 = scmp.lt.u32.totalorder %s7152_s24, %s7707_s5 }
  0x17   :  { %p7158_p10 = pnand %p7156_p9, %p7153_p8 }
  0x19   :  { %7161 = shalt.err (!%p7158_p10)
}
  0x1a   :  { %s7162_s14 = scalar_lea.vmem %s7382_s28, 32768  ;;  %p7167_p12 = scmp.lt.s32.totalorder %s7382_s28, %s7382_s28 }
  0x1b   :  { %p7163_p11 = scmp.ne.s32.totalorder %s7382_s28, %s7162_s14  ;;  %p7168_p13 = scmp.lt.s32.totalorder %s7162_s14, %s7162_s14 }
  0x1d   :  { %p7169_p0 = por %p7168_p13, %p7167_p12 }
  0x1f   :  { %p7170_p1 = pnand %p7169_p0, %p7163_p11 }
  0x21   :  { %7173 = shalt.err (!%p7170_p1)
}
  0x22   :  { %s7294_s2 = smov 512   ;;  %s7295_s26 = smov 32  }
  0x23   :  { %71 = dma.hbm_to_vmem [thread:$0]  %s7707_s5, 32768, %s7382_s28, [#allocation8], %s7294_s2, %s7294_s2, %s7295_s26  }
  0x24   :  { %s7296_s17 = smov [#allocation10]   ;;  %s7174_s21 = scalar_lea.hbm %s7711_s9, 16384 }
  0x25   :  { %s93_s18 = sshll.u32 %s7296_s17, 4  ;;  %p7175_p2 = scmp.ne.s32.totalorder %s7711_s9, %s7174_s21  ;;  %s94_s18 = int_to_ptr.vmem [resolvable:$true] %s93_s18 }
  0x26   :  { %p7178_p3 = scmp.lt.u32.totalorder %s7174_s21, %s7711_s9 }
  0x28   :  { %p7180_p4 = pnand %p7178_p3, %p7175_p2 }
  0x2a   :  { %7183 = shalt.err (!%p7180_p4)
}
  0x2b   :  { %s7184_s27 = scalar_lea.vmem %s94_s18, 16384  ;;  %p7189_p6 = scmp.lt.s32.totalorder %s94_s18, %s94_s18 }
  0x2c   :  { %p7185_p5 = scmp.ne.s32.totalorder %s94_s18, %s7184_s27  ;;  %p7190_p7 = scmp.lt.s32.totalorder %s7184_s27, %s7184_s27 }
  0x2e   :  { %p7191_p8 = por %p7190_p7, %p7189_p6 }
  0x30   :  { %p7192_p9 = pnand %p7191_p8, %p7185_p5 }
  0x32   :  { %7195 = shalt.err (!%p7192_p9)
}
  0x33   :  { %s7297_s5 = smov 128   ;;  %s7298_s28 = smov 8  }
  0x34   :  { %99 = dma.hbm_to_vmem [thread:$0]  %s7711_s9, 16384, %s94_s18, [#allocation11], %s7297_s5, %s7297_s5, %s7298_s28  }
  0x35   :  { %s7299_s14 = smov [#allocation2]   ;;  %s7196_s19 = scalar_lea.hbm %s7703_s1, 3072 }
  0x36   :  { %s29_s15 = sshll.u32 %s7299_s14, 4  ;;  %p7197_p10 = scmp.ne.s32.totalorder %s7703_s1, %s7196_s19  ;;  %s30_s15 = int_to_ptr.vmem [resolvable:$true] %s29_s15 }
  0x37   :  { %p7200_p11 = scmp.lt.u32.totalorder %s7196_s19, %s7703_s1 }
  0x39   :  { %p7202_p12 = pnand %p7200_p11, %p7197_p10 }
  0x3b   :  { %7205 = shalt.err (!%p7202_p12)
}
  0x3c   :  { %s7206_s24 = scalar_lea.vmem %s30_s15, 3072  ;;  %p7211_p0 = scmp.lt.s32.totalorder %s30_s15, %s30_s15 }
  0x3d   :  { %p7207_p13 = scmp.ne.s32.totalorder %s30_s15, %s7206_s24  ;;  %p7212_p1 = scmp.lt.s32.totalorder %s7206_s24, %s7206_s24 }
  0x3f   :  { %p7213_p2 = por %p7212_p1, %p7211_p0 }
  0x41   :  { %p7214_p3 = pnand %p7213_p2, %p7207_p13 }
  0x43   :  { %7217 = shalt.err (!%p7214_p3)
}
  0x44   :  { %s7300_s9 = smov 384   ;;  %s7301_s18 = smov 24  }
  0x45   :  { %35 = dma.hbm_to_vmem [thread:$0]  %s7703_s1, 3072, %s30_s15, [#allocation3], %s7300_s9, %s7300_s9, %s7301_s18  }
  0x46   :  { %s7302_s5 = smov [#allocation6]   ;;  %s7218_s14 = scalar_lea.hbm %s7705_s3, 8192 }
  0x47   :  { %s51_s28 = sshll.u32 %s7302_s5, 4  ;;  %p7219_p4 = scmp.ne.s32.totalorder %s7705_s3, %s7218_s14  ;;  %s52_s28 = int_to_ptr.vmem [resolvable:$true] %s51_s28 }
  0x48   :  { %p7222_p5 = scmp.lt.u32.totalorder %s7218_s14, %s7705_s3 }
  0x4a   :  { %p7224_p6 = pnand %p7222_p5, %p7219_p4 }
  0x4c   :  { %7227 = shalt.err (!%p7224_p6)
}
  0x4d   :  { %s7228_s21 = scalar_lea.vmem %s52_s28, 8192  ;;  %p7233_p8 = scmp.lt.s32.totalorder %s52_s28, %s52_s28 }
  0x4e   :  { %p7229_p7 = scmp.ne.s32.totalorder %s52_s28, %s7228_s21  ;;  %p7234_p9 = scmp.lt.s32.totalorder %s7228_s21, %s7228_s21 }
  0x50   :  { %p7235_p10 = por %p7234_p9, %p7233_p8 }
  0x52   :  { %p7236_p11 = pnand %p7235_p10, %p7229_p7 }
  0x54   :  { %7239 = shalt.err (!%p7236_p11)
}
  0x55   :  { %s7303_s1 = smov 256   ;;  %s7304_s15 = smov 16  }
  0x56   :  { %57 = dma.hbm_to_vmem [thread:$0]  %s7705_s3, 8192, %s52_s28, [#allocation5], %s7303_s1, %s7303_s1, %s7304_s15  }
  0x57   :  { %s7305_s24 = smov [#allocation9]   ;;  %s7306_s18 = smov [#allocation12]  }
  0x58   :  { %s79_s9 = sshll.u32 %s7305_s24, 4  ;;  %s107_s25 = sshll.u32 %s7306_s18, 4  ;;  %s80_s9 = int_to_ptr.vmem [resolvable:$true] %s79_s9  ;;  %s108_s25 = int_to_ptr.vmem [resolvable:$true] %s107_s25 }
  0x59   :  { %s7240_s29 = scalar_lea.hbm %s7709_s7, 32768 }
  0x5a   :  { %p7241_p12 = scmp.ne.s32.totalorder %s7709_s7, %s7240_s29  ;;  %p7244_p13 = scmp.lt.u32.totalorder %s7240_s29, %s7709_s7 }
  0x5c   :  { %p7246_p0 = pnand %p7244_p13, %p7241_p12 }
  0x5e   :  { %7249 = shalt.err (!%p7246_p0)
}
  0x5f   :  { %s7250_s3 = scalar_lea.vmem %s80_s9, 32768  ;;  %p7255_p2 = scmp.lt.s32.totalorder %s80_s9, %s80_s9 }
  0x60   :  { %p7251_p1 = scmp.ne.s32.totalorder %s80_s9, %s7250_s3  ;;  %p7256_p3 = scmp.lt.s32.totalorder %s7250_s3, %s7250_s3 }
  0x62   :  { %p7257_p4 = por %p7256_p3, %p7255_p2 }
  0x64   :  { %p7258_p5 = pnand %p7257_p4, %p7251_p1 }
  0x66   :  { %7261 = shalt.err (!%p7258_p5)
}
  0x67   :  { %85 = dma.hbm_to_vmem [thread:$0]  %s7709_s7, 32768, %s80_s9, [#allocation8], %s7294_s2, %s7294_s2, %s7295_s26  }
  0x68   :  { %s7262_s1 = scalar_lea.hbm %s7713_s11, 1024 }
  0x69   :  { %p7263_p6 = scmp.ne.s32.totalorder %s7713_s11, %s7262_s1  ;;  %p7266_p7 = scmp.lt.u32.totalorder %s7262_s1, %s7713_s11 }
  0x6b   :  { %p7268_p8 = pnand %p7266_p7, %p7263_p6 }
  0x6d   :  { %7271 = shalt.err (!%p7268_p8)
}
  0x6e   :  { %s7272_s18 = scalar_lea.vmem %s108_s25, 1024  ;;  %p7277_p10 = scmp.lt.s32.totalorder %s108_s25, %s108_s25 }
  0x6f   :  { %p7273_p9 = scmp.ne.s32.totalorder %s108_s25, %s7272_s18  ;;  %p7278_p11 = scmp.lt.s32.totalorder %s7272_s18, %s7272_s18 }
  0x71   :  { %p7279_p12 = por %p7278_p11, %p7277_p10 }
  0x73   :  { %p7280_p13 = pnand %p7279_p12, %p7273_p9 }
  0x75   :  { %7283 = shalt.err (!%p7280_p13)
}
  0x76   :  { %s7307_s7 = smov 64   ;;  %s7308_s2 = smov 4  }
  0x77   :  { %113 = dma.hbm_to_vmem [thread:$0]  %s7713_s11, 1024, %s108_s25, [#allocation11], %s7307_s7, %s7307_s7, %s7308_s2  }
  0x78   :  { %7284 = dma.done.wait [#allocation3], 3072  }
  0x79   :  { %7285 = vsyncadd [#allocation3], 4294964224 }
  0x7a   :  { %7286 = dma.done.wait [#allocation5], 8288  }
  0x7b   :  { %7287 = vsyncadd [#allocation5], 4294959008 }
  0x7c   :  { %7288 = dma.done.wait [#allocation8], 65536  }
  0x7d   :  { %7289 = vsyncadd [#allocation8], 4294901760 }
  0x7e   :  { %7290 = dma.done.wait [#allocation11], 17408  }
  0x7f   :  { %7291 = vsyncadd [#allocation11], 4294949888  ;;  %v7309_v0 = vmov 0   ;;  %v6789_v1 = vld [vmem:[#allocation2 + $0x4] ss:$24 sps:$4 sm:$0xff]   ;;  %vm321_vm0 = vcmask 523264  }
  0x80   :  { %357 = vmatprep.mubr.bf16.mxu0 %v7309_v0  ;;  %v6791_v2 = vld [vmem:[#allocation2] ss:$24 sps:$4 sm:$0xff]   ;;  %325 = vmatprep.subr.bf16.mxu0 %v6789_v1  ;;  %v6792_v3 = vld [vmem:[#allocation2 + $0x34] ss:$24 sps:$4 sm:$0xff]   ;;  %v6794_v4 = vld [vmem:[#allocation2 + $0x30] ss:$24 sps:$4 sm:$0xff]  }
  0x81   :  { %326 = vmatpush1.bf16.msra.mxu0 %v6791_v2  ;;  %v6795_v5 = vld [vmem:[#allocation2 + $0x64] ss:$24 sps:$4 sm:$0xff]   ;;  %v6797_v6 = vld [vmem:[#allocation2 + $0x60] ss:$24 sps:$4 sm:$0xff]   ;;  %v6798_v7 = vld [vmem:[#allocation2 + $0x94] ss:$24 sps:$4 sm:$0xff]  }
  0x82   :  { %327 = vmatprep.subr.bf16.mxu0 %v6792_v3  ;;  %v6800_v8 = vld [vmem:[#allocation2 + $0x90] ss:$24 sps:$4 sm:$0xff]   ;;  %v6804_v9 = vld [vmem:[#allocation2 + $0xc] ss:$24 sps:$4 sm:$0xff]   ;;  %v6801_v10 = vld [vmem:[%s7702_s0] sm:$0xff]   ;;  %vm7311_vm1 = vmmov 0  }
  0x83   :  { %v6802_v11 = vld [vmem:[#allocation2 + $0x8] ss:$24 sps:$4 sm:$0xff]   ;;  %v6807_v12 = vld [vmem:[#allocation2 + $0x3c] ss:$24 sps:$4 sm:$0xff]   ;;  %v6805_v13 = vld [vmem:[#allocation2 + $0x38] ss:$24 sps:$4 sm:$0xff]  }
  0x84   :  { %v6810_v14 = vld [vmem:[#allocation2 + $0x6c] ss:$24 sps:$4 sm:$0xff]   ;;  %v6808_v15 = vld [vmem:[#allocation2 + $0x68] ss:$24 sps:$4 sm:$0xff]   ;;  %v6813_v16 = vld [vmem:[#allocation2 + $0x9c] ss:$24 sps:$4 sm:$0xff]  }
  0x85   :  { %328 = vmatpush1.bf16.msra.mxu0 %v6794_v4  ;;  %v6811_v17 = vld [vmem:[#allocation2 + $0x98] ss:$24 sps:$4 sm:$0xff]   ;;  %v6816_v18 = vld [vmem:[#allocation2 + $0x14] ss:$24 sps:$4 sm:$0xff]   ;;  %v6819_v20 = vld [vmem:[#allocation2 + $0x44] ss:$24 sps:$4 sm:$0xff]  }
  0x86   :  { %329 = vmatprep.subr.bf16.mxu0 %v6795_v5  ;;  %v6814_v19 = vld [vmem:[#allocation2 + $0x10] ss:$24 sps:$4 sm:$0xff]   ;;  %v6817_v21 = vld [vmem:[#allocation2 + $0x40] ss:$24 sps:$4 sm:$0xff]   ;;  %v6822_v22 = vld [vmem:[#allocation2 + $0x74] ss:$24 sps:$4 sm:$0xff]  }
  0x87   :  { %v6820_v23 = vld [vmem:[#allocation2 + $0x70] ss:$24 sps:$4 sm:$0xff]   ;;  %v6825_v24 = vld [vmem:[#allocation2 + $0xa4] ss:$24 sps:$4 sm:$0xff]   ;;  %v6823_v25 = vld [vmem:[#allocation2 + $0xa0] ss:$24 sps:$4 sm:$0xff]  }
  0x88   :  { %v6828_v26 = vld [vmem:[#allocation6 + $0x4] ss:$16 sps:$4 sm:$0xff]   ;;  %v6826_v27 = vld [vmem:[#allocation6] ss:$16 sps:$4 sm:$0xff]   ;;  %v6876_v58 = vld [vmem:[#allocation6 + $0xc] ss:$16 sps:$4 sm:$0xff]  }
  0x89   :  { %330 = vmatpush1.bf16.msra.mxu0 %v6797_v6  ;;  %v6831_v28 = vld [vmem:[#allocation6 + $0x24] ss:$16 sps:$4 sm:$0xff]   ;;  %v6829_v29 = vld [vmem:[#allocation6 + $0x20] ss:$16 sps:$4 sm:$0xff]  }
  0x8a   :  { %331 = vmatprep.subr.bf16.mxu0 %v6798_v7  ;;  %v6834_v30 = vld [vmem:[#allocation6 + $0x44] ss:$16 sps:$4 sm:$0xff]   ;;  %v6832_v31 = vld [vmem:[#allocation6 + $0x40] ss:$16 sps:$4 sm:$0xff]  }
  0x8b   :  { %v6837_v32 = vld [vmem:[#allocation6 + $0x64] ss:$16 sps:$4 sm:$0xff]   ;;  %v6835_v33 = vld [vmem:[#allocation6 + $0x60] ss:$16 sps:$4 sm:$0xff]  }
  0x8c   :  { %v6840_v34 = vld [vmem:[#allocation6 + $0x84] ss:$16 sps:$4 sm:$0xff]   ;;  %v6838_v35 = vld [vmem:[#allocation6 + $0x80] ss:$16 sps:$4 sm:$0xff]  }
  0x8d   :  { %332 = vmatpush1.bf16.msra.mxu0 %v6800_v8  ;;  %v6843_v36 = vld [vmem:[#allocation6 + $0xa4] ss:$16 sps:$4 sm:$0xff]   ;;  %v6841_v37 = vld [vmem:[#allocation6 + $0xa0] ss:$16 sps:$4 sm:$0xff]  }
  0x8e   :  { %368 = vmatprep.subr.bf16.mxu0 %v6804_v9  ;;  %v6846_v38 = vld [vmem:[#allocation6 + $0xc4] ss:$16 sps:$4 sm:$0xff]   ;;  %v6844_v39 = vld [vmem:[#allocation6 + $0xc0] ss:$16 sps:$4 sm:$0xff]  }
  0x8f   :  { %v6847_v40 = vld [vmem:[#allocation6 + $0xe0] ss:$16 sps:$4 sm:$0xff]   ;;  %v6849_v41 = vld [vmem:[#allocation6 + $0xe4] ss:$16 sps:$4 sm:$0xff]  }
  0x90   :  { %5944 = vmatmul.mubr.msk.bf16.vlgmr.msra.gmra.mrb[0].mxu0 %vm321_vm0, %v6801_v10  ;;  %v6852_v42 = vld [vmem:[#allocation6 + $0x104] ss:$16 sps:$4 sm:$0xff]   ;;  %v6850_v43 = vld [vmem:[#allocation6 + $0x100] ss:$16 sps:$4 sm:$0xff]  }
  0x91   :  { %369 = vmatpush1.bf16.msra.mxu0 %v6802_v11  ;;  %400 = vmatprep.mubr.bf16.mxu0 %v7309_v0  ;;  %v6855_v44 = vld [vmem:[#allocation6 + $0x124] ss:$16 sps:$4 sm:$0xff]   ;;  %v6853_v45 = vld [vmem:[#allocation6 + $0x120] ss:$16 sps:$4 sm:$0xff]  }
  0x92   :  { %370 = vmatprep.subr.bf16.mxu0 %v6807_v12  ;;  %v6858_v46 = vld [vmem:[#allocation6 + $0x144] ss:$16 sps:$4 sm:$0xff]   ;;  %v6856_v47 = vld [vmem:[#allocation6 + $0x140] ss:$16 sps:$4 sm:$0xff]  }
  0x93   :  { %v6861_v48 = vld [vmem:[#allocation6 + $0x164] ss:$16 sps:$4 sm:$0xff]   ;;  %v6859_v49 = vld [vmem:[#allocation6 + $0x160] ss:$16 sps:$4 sm:$0xff]  }
  0x94   :  { %v6864_v50 = vld [vmem:[#allocation6 + $0x184] ss:$16 sps:$4 sm:$0xff]   ;;  %v6862_v51 = vld [vmem:[#allocation6 + $0x180] ss:$16 sps:$4 sm:$0xff]  }
  0x95   :  { %371 = vmatpush1.bf16.msra.mxu0 %v6805_v13  ;;  %v6867_v52 = vld [vmem:[#allocation6 + $0x1a4] ss:$16 sps:$4 sm:$0xff]   ;;  %v6865_v53 = vld [vmem:[#allocation6 + $0x1a0] ss:$16 sps:$4 sm:$0xff]  }
  0x96   :  { %372 = vmatprep.subr.bf16.mxu0 %v6810_v14  ;;  %v6870_v54 = vld [vmem:[#allocation6 + $0x1c4] ss:$16 sps:$4 sm:$0xff]   ;;  %v6868_v55 = vld [vmem:[#allocation6 + $0x1c0] ss:$16 sps:$4 sm:$0xff]  }
  0x97   :  { %v6873_v56 = vld [vmem:[#allocation6 + $0x1e4] ss:$16 sps:$4 sm:$0xff]   ;;  %v6871_v57 = vld [vmem:[#allocation6 + $0x1e0] ss:$16 sps:$4 sm:$0xff]  }
  0x98   :  { %v960_v59 = vld [vmem:[#allocation7] sm:$0xff] }
  0x99   :  { %373 = vmatpush1.bf16.msra.mxu0 %v6808_v15  ;;  %v964_v60 = vld [vmem:[#allocation7 + $0x20] sm:$0xff] }
  0x9a   :  { %374 = vmatprep.subr.bf16.mxu0 %v6813_v16  ;;  %v6012_v61 = vcombine.high %v960_v59, %v964_v60  ;;  %v6011_v62 = vcombine.low %v960_v59, %v964_v60  ;;  %v968_v63 = vld [vmem:[#allocation7 + $0x40] sm:$0xff] }
  0x9b   :  { %v976_v3 = vld [vmem:[#allocation7 + $0x80] sm:$0xff] }
  0x9c   :  { %2538 = vmatprep.subr.bf16.mxu1 %v6012_v61  ;;  %v980_v4 = vld [vmem:[#allocation7 + $0xa0] sm:$0xff] }
  0x9d   :  { %375 = vmatpush1.bf16.msra.mxu0 %v6811_v17  ;;  %2539 = vmatpush1.bf16.msra.mxu1 %v6011_v62  ;;  %v6028_v5 = vcombine.high %v976_v3, %v980_v4  ;;  %v6027_v6 = vcombine.low %v976_v3, %v980_v4  ;;  %v984_v7 = vld [vmem:[#allocation7 + $0xc0] sm:$0xff] }
  0x9e   :  { %411 = vmatprep.subr.bf16.mxu0 %v6816_v18  ;;  %v988_v8 = vld [vmem:[#allocation7 + $0xe0] sm:$0xff] }
  0x9f   :  { %v6036_v9 = vcombine.high %v984_v7, %v988_v8  ;;  %v992_v11 = vld [vmem:[#allocation7 + $0x100] sm:$0xff] }
  0xa0   :  { %5945 = vmatmul.mubr.msk.bf16.vlgmr.msra.gmra.mrb[4].mxu0 %vm321_vm0, %v6801_v10  ;;  %v996_v12 = vld [vmem:[#allocation7 + $0x120] sm:$0xff] }
  0xa1   :  { %412 = vmatpush1.bf16.msra.mxu0 %v6814_v19  ;;  %443 = vmatprep.mubr.bf16.mxu0 %v7309_v0  ;;  %v972_v0 = vld [vmem:[#allocation7 + $0x60] sm:$0xff]  ;;  %v6044_v13 = vcombine.high %v992_v11, %v996_v12  ;;  %v6043_v14 = vcombine.low %v992_v11, %v996_v12 }
  0xa2   :  { %413 = vmatprep.subr.bf16.mxu0 %v6819_v20  ;;  %v6020_v1 = vcombine.high %v968_v63, %v972_v0  ;;  %v6019_v2 = vcombine.low %v968_v63, %v972_v0  ;;  %v1000_v15 = vld [vmem:[#allocation7 + $0x140] sm:$0xff] }
  0xa3   :  { %v1004_v16 = vld [vmem:[#allocation7 + $0x160] sm:$0xff] }
  0xa4   :  { %2540 = vmatprep.subr.bf16.mxu1 %v6020_v1  ;;  %v6052_v17 = vcombine.high %v1000_v15, %v1004_v16  ;;  %v6051_v18 = vcombine.low %v1000_v15, %v1004_v16  ;;  %v1008_v20 = vld [vmem:[#allocation7 + $0x180] sm:$0xff] }
  0xa5   :  { %414 = vmatpush1.bf16.msra.mxu0 %v6817_v21  ;;  %2541 = vmatpush1.bf16.msra.mxu1 %v6019_v2  ;;  %v1012_v21 = vld [vmem:[#allocation7 + $0x1a0] sm:$0xff] }
  0xa6   :  { %415 = vmatprep.subr.bf16.mxu0 %v6822_v22  ;;  %2542 = vmatprep.subr.bf16.mxu1 %v6028_v5  ;;  %v166_v22 = vlaneseq  ;;  %v1048_v4 = vld [vmem:[#allocation7 + $0x2c0] sm:$0xff] }
  0xa7   :  { %v1052_v5 = vld [vmem:[#allocation7 + $0x2e0] sm:$0xff] }
  0xa8   :  { %v1060_v11 = vld [vmem:[#allocation7 + $0x320] sm:$0xff] }
  0xa9   :  { %416 = vmatpush1.bf16.msra.mxu0 %v6820_v23  ;;  %2543 = vmatpush1.bf16.msra.mxu1 %v6027_v6  ;;  %v1064_v16 = vld [vmem:[#allocation7 + $0x340] sm:$0xff] }
  0xaa   :  { %417 = vmatprep.subr.bf16.mxu0 %v6825_v24  ;;  %2544 = vmatprep.subr.bf16.mxu1 %v6036_v9  ;;  %v6060_v24 = vcombine.high %v1008_v20, %v1012_v21  ;;  %v6099_v9 = vcombine.low %v1048_v4, %v1052_v5 }
  0xad   :  { %418 = vmatpush1.bf16.msra.mxu0 %v6823_v25 }
  0xae   :  { %870 = vmatprep.subr.bf16.mxu0 %v6828_v26 }
  0xb0   :  { %5946 = vmatmul.mubr.msk.bf16.vlgmr.msra.gmra.mrb[8].mxu0 %vm321_vm0, %v6801_v10  ;;  %v6035_v10 = vcombine.low %v984_v7, %v988_v8  ;;  %v6100_v7 = vcombine.high %v1048_v4, %v1052_v5  ;;  %v6918_v4 = vld [vmem:[#allocation6 + $0x1cc] ss:$16 sps:$4 sm:$0xff]   ;;  %v6916_v5 = vld [vmem:[#allocation6 + $0x1c8] ss:$16 sps:$4 sm:$0xff]  }
  0xb1   :  { %871 = vmatpush1.bf16.msra.mxu0 %v6826_v27  ;;  %v6059_v27 = vcombine.low %v1008_v20, %v1012_v21 }
  0xb2   :  { %872 = vmatprep.subr.bf16.mxu0 %v6831_v28  ;;  %2545 = vmatpush1.bf16.msra.mxu1 %v6035_v10  ;;  %v1016_v28 = vld [vmem:[#allocation7 + $0x1c0] sm:$0xff] }
  0xb3   :  { %2546 = vmatprep.subr.bf16.mxu1 %v6044_v13  ;;  %v1056_v10 = vld [vmem:[#allocation7 + $0x300] sm:$0xff] }
  0xb4   :  { %v6108_v13 = vcombine.high %v1056_v10, %v1060_v11  ;;  %v6107_v15 = vcombine.low %v1056_v10, %v1060_v11  ;;  %v969_v11 = vld [vmem:[#allocation7 + $0x48] sm:$0xff] }
  0xb5   :  { %873 = vmatpush1.bf16.msra.mxu0 %v6829_v29  ;;  %v1020_v29 = vld [vmem:[#allocation7 + $0x1e0] sm:$0xff] }
  0xb6   :  { %874 = vmatprep.subr.bf16.mxu0 %v6834_v30  ;;  %2547 = vmatpush1.bf16.msra.mxu1 %v6043_v14  ;;  %v7485_v30 = vshrl.u32 %v166_v22, 7 }
  0xb7   :  { %2548 = vmatprep.subr.bf16.mxu1 %v6052_v17  ;;  %v1068_v17 = vld [vmem:[#allocation7 + $0x360] sm:$0xff] }
  0xb8   :  { %v7504_v12 = vsub.s32 4, %v7485_v30  ;;  %v7507_v14 = vsub.s32 5, %v7485_v30  ;;  %v6115_v21 = vcombine.low %v1064_v16, %v1068_v17 }
  0xb9   :  { %875 = vmatpush1.bf16.msra.mxu0 %v6832_v31  ;;  %v6068_v31 = vcombine.high %v1016_v28, %v1020_v29 }
  0xba   :  { %876 = vmatprep.subr.bf16.mxu0 %v6837_v32  ;;  %2549 = vmatpush1.bf16.msra.mxu1 %v6051_v18  ;;  %v6067_v32 = vcombine.low %v1016_v28, %v1020_v29 }
  0xbb   :  { %2550 = vmatprep.subr.bf16.mxu1 %v6060_v24 }
  0xbd   :  { %877 = vmatpush1.bf16.msra.mxu0 %v6835_v33  ;;  %v1024_v33 = vld [vmem:[#allocation7 + $0x200] sm:$0xff] }
  0xbe   :  { %878 = vmatprep.subr.bf16.mxu0 %v6840_v34  ;;  %2551 = vmatpush1.bf16.msra.mxu1 %v6059_v27  ;;  %v1028_v34 = vld [vmem:[#allocation7 + $0x220] sm:$0xff] }
  0xbf   :  { %2552 = vmatprep.subr.bf16.mxu1 %v6068_v31 }
  0xc1   :  { %879 = vmatpush1.bf16.msra.mxu0 %v6838_v35  ;;  %v7488_v35 = vsub.s32 0, %v7485_v30 }
  0xc2   :  { %880 = vmatprep.subr.bf16.mxu0 %v6843_v36  ;;  %v7491_v36 = vsub.s32 2, %v7485_v30  ;;  %2553 = vmatpush1.bf16.msra.mxu1 %v6067_v32 }
  0xc5   :  { %881 = vmatpush1.bf16.msra.mxu0 %v6841_v37  ;;  %v6076_v37 = vcombine.high %v1024_v33, %v1028_v34 }
  0xc6   :  { %882 = vmatprep.subr.bf16.mxu0 %v6846_v38  ;;  %v164_v38 = vld [vmem:[#allocation4] sm:$0x3f] }
  0xc7   :  { %2554 = vmatprep.subr.bf16.mxu1 %v6076_v37  ;;  %v185_v18 = vrot.slane %v164_v38, %v7504_v12  ;;  %v189_v20 = vrot.slane %v164_v38, %v7507_v14 }
  0xc9   :  { %883 = vmatpush1.bf16.msra.mxu0 %v6844_v39  ;;  %v7494_v39 = vsub.s32 1, %v7485_v30 }
  0xca   :  { %884 = vmatprep.subr.bf16.mxu0 %v6849_v41  ;;  %v6075_v41 = vcombine.low %v1024_v33, %v1028_v34 }
  0xcc   :  { %2555 = vmatpush1.bf16.msra.mxu1 %v6075_v41 }
  0xcd   :  { %885 = vmatpush1.bf16.msra.mxu0 %v6847_v40  ;;  %v7497_v40 = vsub.s32 3, %v7485_v30 }
  0xce   :  { %886 = vmatprep.subr.bf16.mxu0 %v6852_v42  ;;  %v1032_v42 = vld [vmem:[#allocation7 + $0x240] sm:$0xff] }
  0xd1   :  { %887 = vmatpush1.bf16.msra.mxu0 %v6850_v43  ;;  %v1036_v43 = vld [vmem:[#allocation7 + $0x260] sm:$0xff] }
  0xd2   :  { %888 = vmatprep.subr.bf16.mxu0 %v6855_v44  ;;  %v169_v44 = vrot.slane %v164_v38, %v7488_v35 }
  0xd5   :  { %889 = vmatpush1.bf16.msra.mxu0 %v6853_v45  ;;  %v177_v45 = vrot.slane %v164_v38, %v7491_v36 }
  0xd6   :  { %890 = vmatprep.subr.bf16.mxu0 %v6858_v46  ;;  %v6084_v46 = vcombine.high %v1032_v42, %v1036_v43 }
  0xd8   :  { %2556 = vmatprep.subr.bf16.mxu1 %v6084_v46  ;;  %v6885_v46 = vld [vmem:[#allocation6 + $0x6c] ss:$16 sps:$4 sm:$0xff]  }
  0xd9   :  { %891 = vmatpush1.bf16.msra.mxu0 %v6856_v47  ;;  %v173_v47 = vrot.slane %v164_v38, %v7494_v39 }
  0xda   :  { %892 = vmatprep.subr.bf16.mxu0 %v6861_v48  ;;  %v181_v48 = vrot.slane %v164_v38, %v7497_v40  ;;  %v6874_v38 = vld [vmem:[#allocation6 + $0x8] ss:$16 sps:$4 sm:$0xff]  }
  0xdd   :  { %893 = vmatpush1.bf16.msra.mxu0 %v6859_v49  ;;  %v6083_v49 = vcombine.low %v1032_v42, %v1036_v43  ;;  %v6879_v42 = vld [vmem:[#allocation6 + $0x2c] ss:$16 sps:$4 sm:$0xff]   ;;  %v6877_v43 = vld [vmem:[#allocation6 + $0x28] ss:$16 sps:$4 sm:$0xff]  }
  0xde   :  { %894 = vmatprep.subr.bf16.mxu0 %v6864_v50 }
  0xdf   :  { %2557 = vmatpush1.bf16.msra.mxu1 %v6083_v49  ;;  %v6886_v49 = vld [vmem:[#allocation6 + $0x88] ss:$16 sps:$4 sm:$0xff]  }
  0xe1   :  { %895 = vmatpush1.bf16.msra.mxu0 %v6862_v51  ;;  %v1040_v51 = vld [vmem:[#allocation7 + $0x280] sm:$0xff] }
  0xe2   :  { %896 = vmatprep.subr.bf16.mxu0 %v6867_v52  ;;  %v1044_v52 = vld [vmem:[#allocation7 + $0x2a0] sm:$0xff] }
  0xe3   :  { %v6091_v0 = vcombine.low %v1040_v51, %v1044_v52 }
  0xe5   :  { %897 = vmatpush1.bf16.msra.mxu0 %v6865_v53 }
  0xe6   :  { %898 = vmatprep.subr.bf16.mxu0 %v6870_v54 }
  0xe9   :  { %899 = vmatpush1.bf16.msra.mxu0 %v6868_v55 }
  0xea   :  { %900 = vmatprep.subr.bf16.mxu0 %v6873_v56  ;;  %v6092_v56 = vcombine.high %v1040_v51, %v1044_v52  ;;  %v6889_v51 = vld [vmem:[#allocation6 + $0xa8] ss:$16 sps:$4 sm:$0xff]   ;;  %v6894_v52 = vld [vmem:[#allocation6 + $0xcc] ss:$16 sps:$4 sm:$0xff]  }
  0xec   :  { %2558 = vmatprep.subr.bf16.mxu1 %v6092_v56  ;;  %v6900_v56 = vld [vmem:[#allocation6 + $0x10c] ss:$16 sps:$4 sm:$0xff]  }
  0xed   :  { %901 = vmatpush1.bf16.msra.mxu0 %v6871_v57  ;;  %2559 = vmatpush1.bf16.msra.mxu1 %v6091_v0  ;;  %v6912_v0 = vld [vmem:[#allocation6 + $0x18c] ss:$16 sps:$4 sm:$0xff]  }
  0xee   :  { %913 = vmatprep.subr.bf16.mxu0 %v6876_v58  ;;  %2560 = vmatprep.subr.bf16.mxu1 %v6100_v7  ;;  %v961_v7 = vld [vmem:[#allocation7 + $0x8] sm:$0xff] }
  0xf1   :  { %2561 = vmatpush1.bf16.msra.mxu1 %v6099_v9  ;;  %v6919_v9 = vld [vmem:[#allocation6 + $0x1e8] ss:$16 sps:$4 sm:$0xff]  }
  0xf2   :  { %2562 = vmatprep.subr.bf16.mxu1 %v6108_v13  ;;  %v973_v13 = vld [vmem:[#allocation7 + $0x68] sm:$0xff] }
  0xf5   :  { %2563 = vmatpush1.bf16.msra.mxu1 %v6107_v15 }
 0x163   :  { %v359_v19 = vpop.f32.mrb[0].mxu0 }
 0x164   :  { %v361_v23 = vpop.f32.mrb[1].mxu0  ;;  %v360_v53 = vadd.f32 %v359_v19, %v169_v44  ;;  %v6116_v19 = vcombine.high %v1064_v16, %v1068_v17  ;;  %v6022_v16 = vcombine.high %v969_v11, %v973_v13  ;;  %v977_v17 = vld [vmem:[#allocation7 + $0x88] sm:$0xff] }
 0x165   :  { %v363_v25 = vpop.f32.mrb[2].mxu0  ;;  %v362_v57 = vadd.f32 %v361_v23, %v173_v47 }
 0x166   :  { %v365_v26 = vpop.f32.mrb[3].mxu0  ;;  %v364_v60 = vadd.f32 %v363_v25, %v169_v44  ;;  %2564 = vmatprep.subr.bf16.mxu1 %v6116_v19  ;;  %v6882_v44 = vld [vmem:[#allocation6 + $0x4c] ss:$16 sps:$4 sm:$0xff]   ;;  %v6021_v19 = vcombine.low %v969_v11, %v973_v13 }
 0x167   :  { %v366_v1 = vadd.f32 %v365_v26, %v173_v47  ;;  %2565 = vmatpush1.bf16.msra.mxu1 %v6115_v21  ;;  %v6883_v47 = vld [vmem:[#allocation6 + $0x68] ss:$16 sps:$4 sm:$0xff]  }
 0x168   :  { %v985_v21 = vld [vmem:[#allocation7 + $0xc8] sm:$0xff] }
 0x173   :  { %v402_v50 = vpop.f32.mrb[4].mxu0 }
 0x174   :  { %v403_v54 = vadd.f32 %v402_v50, %v177_v45  ;;  %v404_v55 = vpop.f32.mrb[5].mxu0  ;;  %v6891_v50 = vld [vmem:[#allocation6 + $0xac] ss:$16 sps:$4 sm:$0xff]  }
 0x175   :  { %v405_v58 = vadd.f32 %v404_v55, %v181_v48  ;;  %v406_v59 = vpop.f32.mrb[6].mxu0  ;;  %v6895_v55 = vld [vmem:[#allocation6 + $0xe8] ss:$16 sps:$4 sm:$0xff]  }
 0x176   :  { %v454_v61 = vmax.f32 %v360_v53, %v403_v54  ;;  %v407_v62 = vadd.f32 %v406_v59, %v177_v45  ;;  %v408_v63 = vpop.f32.mrb[7].mxu0  ;;  %v6880_v45 = vld [vmem:[#allocation6 + $0x48] ss:$16 sps:$4 sm:$0xff]   ;;  %v6897_v54 = vld [vmem:[#allocation6 + $0xec] ss:$16 sps:$4 sm:$0xff]  }
 0x177   :  { %v455_v2 = vmax.f32 %v362_v57, %v405_v58  ;;  %v409_v3 = vadd.f32 %v408_v63, %v181_v48  ;;  %v6888_v48 = vld [vmem:[#allocation6 + $0x8c] ss:$16 sps:$4 sm:$0xff]   ;;  %v6892_v53 = vld [vmem:[#allocation6 + $0xc8] ss:$16 sps:$4 sm:$0xff]  }
 0x178   :  { %v456_v6 = vmax.f32 %v364_v60, %v407_v62  ;;  %v6898_v57 = vld [vmem:[#allocation6 + $0x108] ss:$16 sps:$4 sm:$0xff]   ;;  %v6903_v58 = vld [vmem:[#allocation6 + $0x12c] ss:$16 sps:$4 sm:$0xff]  }
 0x179   :  { %v457_v8 = vmax.f32 %v366_v1, %v409_v3  ;;  %v6901_v59 = vld [vmem:[#allocation6 + $0x128] ss:$16 sps:$4 sm:$0xff]   ;;  %v6906_v60 = vld [vmem:[#allocation6 + $0x14c] ss:$16 sps:$4 sm:$0xff]  }
 0x17a   :  { %v6909_v62 = vld [vmem:[#allocation6 + $0x16c] ss:$16 sps:$4 sm:$0xff]   ;;  %v6907_v63 = vld [vmem:[#allocation6 + $0x168] ss:$16 sps:$4 sm:$0xff]  }
 0x17b   :  { %v6910_v1 = vld [vmem:[#allocation6 + $0x188] ss:$16 sps:$4 sm:$0xff]  }
 0x17c   :  { %v6913_v3 = vld [vmem:[#allocation6 + $0x1a8] ss:$16 sps:$4 sm:$0xff]  }
 0x183   :  { %v445_v22 = vpop.f32.mrb[8].mxu0 }
 0x184   :  { %v446_v23 = vadd.f32 %v445_v22, %v185_v18  ;;  %v447_v24 = vpop.f32.mrb[9].mxu0  ;;  %v989_v22 = vld [vmem:[#allocation7 + $0xe8] sm:$0xff] }
 0x185   :  { %v448_v25 = vadd.f32 %v447_v24, %v189_v20  ;;  %v449_v26 = vpop.f32.mrb[10].mxu0  ;;  %v6038_v24 = vcombine.high %v985_v21, %v989_v22 }
 0x186   :  { %v458_v27 = vmax.f32 %v454_v61, %v446_v23  ;;  %v450_v28 = vadd.f32 %v449_v26, %v185_v18  ;;  %v451_v29 = vpop.f32.mrb[11].mxu0  ;;  %v6904_v61 = vld [vmem:[#allocation6 + $0x148] ss:$16 sps:$4 sm:$0xff]  }
 0x187   :  { %v459_v31 = vmax.f32 %v455_v2, %v448_v25  ;;  %v452_v32 = vadd.f32 %v451_v29, %v189_v20  ;;  %v6915_v2 = vld [vmem:[#allocation6 + $0x1ac] ss:$16 sps:$4 sm:$0xff]  }
 0x188   :  { %v460_v33 = vmax.f32 %v456_v6, %v450_v28  ;;  %v6921_v6 = vld [vmem:[#allocation6 + $0x1ec] ss:$16 sps:$4 sm:$0xff]  }
 0x189   :  { %v461_v34 = vmax.f32 %v457_v8, %v452_v32  ;;  %v965_v8 = vld [vmem:[#allocation7 + $0x28] sm:$0xff] }
 0x18a   :  { %v7511_v37 = vpack.c.bf16 %v460_v33, %v458_v27  ;;  %v6014_v10 = vcombine.high %v961_v7, %v965_v8  ;;  %v6013_v15 = vcombine.low %v961_v7, %v965_v8  ;;  %v981_v18 = vld [vmem:[#allocation7 + $0xa8] sm:$0xff]  ;;  %v6037_v27 = vcombine.low %v985_v21, %v989_v22 }
 0x18b   :  { %v463_v41 = vpack.c.bf16 %v461_v34, %v459_v31  ;;  %v6030_v20 = vcombine.high %v977_v17, %v981_v18  ;;  %v6029_v23 = vcombine.low %v977_v17, %v981_v18  ;;  %v993_v25 = vld [vmem:[#allocation7 + $0x108] sm:$0xff] }
 0x18c   :  { %v997_v26 = vld [vmem:[#allocation7 + $0x128] sm:$0xff] }
 0x18d   :  { %902 = vmatprep.mubr.bf16.mxu0 %v463_v41  ;;  %v6046_v28 = vcombine.high %v993_v25, %v997_v26  ;;  %v1001_v29 = vld [vmem:[#allocation7 + $0x148] sm:$0xff]  ;;  %v6045_v32 = vcombine.low %v993_v25, %v997_v26 }
 0x18e   :  { %903 = vmatmul.mubr.bf16.vlgmr.msra.gmra.mrb[12].mxu0 %v7511_v37  ;;  %v1005_v31 = vld [vmem:[#allocation7 + $0x168] sm:$0xff] }
 0x18f   :  { %914 = vmatpush1.bf16.msra.mxu0 %v6874_v38  ;;  %945 = vmatprep.mubr.bf16.mxu0 %v463_v41  ;;  %v6054_v33 = vcombine.high %v1001_v29, %v1005_v31  ;;  %v1009_v34 = vld [vmem:[#allocation7 + $0x188] sm:$0xff]  ;;  %v6053_v41 = vcombine.low %v1001_v29, %v1005_v31  ;;  %v1072_v38 = vld [vmem:[#allocation7 + $0x380] sm:$0xff] }
 0x190   :  { %915 = vmatprep.subr.bf16.mxu0 %v6879_v42  ;;  %v1076_v42 = vld [vmem:[#allocation7 + $0x3a0] sm:$0xff] }
 0x193   :  { %916 = vmatpush1.bf16.msra.mxu0 %v6877_v43 }
 0x194   :  { %917 = vmatprep.subr.bf16.mxu0 %v6882_v44  ;;  %v6124_v44 = vcombine.high %v1072_v38, %v1076_v42 }
 0x196   :  { %2566 = vmatprep.subr.bf16.mxu1 %v6124_v44 }
 0x197   :  { %918 = vmatpush1.bf16.msra.mxu0 %v6880_v45  ;;  %v1017_v45 = vld [vmem:[#allocation7 + $0x1c8] sm:$0xff] }
 0x198   :  { %919 = vmatprep.subr.bf16.mxu0 %v6885_v46  ;;  %v1021_v46 = vld [vmem:[#allocation7 + $0x1e8] sm:$0xff] }
 0x19b   :  { %920 = vmatpush1.bf16.msra.mxu0 %v6883_v47  ;;  %v6123_v47 = vcombine.low %v1072_v38, %v1076_v42 }
 0x19c   :  { %921 = vmatprep.subr.bf16.mxu0 %v6888_v48 }
 0x19d   :  { %2567 = vmatpush1.bf16.msra.mxu1 %v6123_v47  ;;  %v1096_v47 = vld [vmem:[#allocation7 + $0x440] sm:$0xff] }
 0x19f   :  { %922 = vmatpush1.bf16.msra.mxu0 %v6886_v49  ;;  %v1080_v49 = vld [vmem:[#allocation7 + $0x3c0] sm:$0xff] }
 0x1a0   :  { %923 = vmatprep.subr.bf16.mxu0 %v6891_v50  ;;  %v1084_v50 = vld [vmem:[#allocation7 + $0x3e0] sm:$0xff] }
 0x1a3   :  { %924 = vmatpush1.bf16.msra.mxu0 %v6889_v51  ;;  %v6070_v51 = vcombine.high %v1017_v45, %v1021_v46 }
 0x1a4   :  { %925 = vmatprep.subr.bf16.mxu0 %v6894_v52  ;;  %v6132_v52 = vcombine.high %v1080_v49, %v1084_v50 }
 0x1a6   :  { %2568 = vmatprep.subr.bf16.mxu1 %v6132_v52  ;;  %v1101_v52 = vld [vmem:[#allocation7 + $0x468] sm:$0xff] }
 0x1a7   :  { %926 = vmatpush1.bf16.msra.mxu0 %v6892_v53  ;;  %v1025_v53 = vld [vmem:[#allocation7 + $0x208] sm:$0xff] }
 0x1a8   :  { %927 = vmatprep.subr.bf16.mxu0 %v6897_v54  ;;  %v1029_v54 = vld [vmem:[#allocation7 + $0x228] sm:$0xff] }
 0x1ab   :  { %928 = vmatpush1.bf16.msra.mxu0 %v6895_v55  ;;  %v6131_v55 = vcombine.low %v1080_v49, %v1084_v50  ;;  %v1100_v50 = vld [vmem:[#allocation7 + $0x460] sm:$0xff] }
 0x1ac   :  { %929 = vmatprep.subr.bf16.mxu0 %v6900_v56  ;;  %v6069_v56 = vcombine.low %v1017_v45, %v1021_v46 }
 0x1ad   :  { %2569 = vmatpush1.bf16.msra.mxu1 %v6131_v55  ;;  %v6148_v55 = vcombine.high %v1096_v47, %v1100_v50 }
 0x1af   :  { %930 = vmatpush1.bf16.msra.mxu0 %v6898_v57  ;;  %v7515_v57 = vld [vmem:[#allocation7 + $0x400] sm:$0xff] }
 0x1b0   :  { %931 = vmatprep.subr.bf16.mxu0 %v6903_v58  ;;  %v7517_v58 = vld [vmem:[#allocation7 + $0x420] sm:$0xff] }
 0x1b3   :  { %932 = vmatpush1.bf16.msra.mxu0 %v6901_v59  ;;  %v7519_v59 = vld [vmem:[#allocation7 + $0x408] sm:$0xff] }
 0x1b4   :  { %933 = vmatprep.subr.bf16.mxu0 %v6906_v60  ;;  %v6078_v60 = vcombine.high %v1025_v53, %v1029_v54 }
 0x1b7   :  { %934 = vmatpush1.bf16.msra.mxu0 %v6904_v61  ;;  %v6140_v61 = vcombine.high %v7515_v57, %v7517_v58 }
 0x1b8   :  { %935 = vmatprep.subr.bf16.mxu0 %v6909_v62  ;;  %v7523_v62 = vld [vmem:[#allocation7 + $0x428] sm:$0xff] }
 0x1b9   :  { %2581 = vmatprep.subr.bf16.mxu1 %v6140_v61  ;;  %v1108_v61 = vld [vmem:[#allocation7 + $0x4a0] sm:$0xff] }
 0x1bb   :  { %936 = vmatpush1.bf16.msra.mxu0 %v6907_v63  ;;  %v1033_v63 = vld [vmem:[#allocation7 + $0x248] sm:$0xff] }
 0x1bc   :  { %937 = vmatprep.subr.bf16.mxu0 %v6912_v0  ;;  %v1037_v0 = vld [vmem:[#allocation7 + $0x268] sm:$0xff] }
 0x1bd   :  { %v6085_v7 = vcombine.low %v1033_v63, %v1037_v0 }
 0x1bf   :  { %938 = vmatpush1.bf16.msra.mxu0 %v6910_v1  ;;  %v6139_v1 = vcombine.low %v7515_v57, %v7517_v58 }
 0x1c0   :  { %939 = vmatprep.subr.bf16.mxu0 %v6915_v2  ;;  %v6141_v2 = vcombine.low %v7519_v59, %v7523_v62 }
 0x1c3   :  { %940 = vmatpush1.bf16.msra.mxu0 %v6913_v3  ;;  %v6077_v3 = vcombine.low %v1025_v53, %v1029_v54 }
 0x1c4   :  { %941 = vmatprep.subr.bf16.mxu0 %v6918_v4  ;;  %v6086_v4 = vcombine.high %v1033_v63, %v1037_v0  ;;  %v1105_v63 = vld [vmem:[#allocation7 + $0x488] sm:$0xff] }
 0x1c5   :  { %v1109_v0 = vld [vmem:[#allocation7 + $0x4a8] sm:$0xff] }
 0x1c7   :  { %942 = vmatpush1.bf16.msra.mxu0 %v6916_v5  ;;  %v1041_v5 = vld [vmem:[#allocation7 + $0x288] sm:$0xff] }
 0x1c8   :  { %943 = vmatprep.subr.bf16.mxu0 %v6921_v6  ;;  %v1045_v6 = vld [vmem:[#allocation7 + $0x2a8] sm:$0xff] }
 0x1c9   :  { %v6094_v8 = vcombine.high %v1041_v5, %v1045_v6  ;;  %v6093_v11 = vcombine.low %v1041_v5, %v1045_v6  ;;  %v6158_v6 = vcombine.high %v1105_v63, %v1109_v0 }
 0x1cb   :  { %944 = vmatpush1.bf16.msra.mxu0 %v6919_v9  ;;  %v1049_v9 = vld [vmem:[#allocation7 + $0x2c8] sm:$0xff] }
 0x1cc   :  { %2624 = vmatprep.subr.bf16.mxu0 %v6014_v10  ;;  %v1053_v10 = vld [vmem:[#allocation7 + $0x2e8] sm:$0xff] }
 0x1cd   :  { %v6102_v13 = vcombine.high %v1049_v9, %v1053_v10  ;;  %v6101_v17 = vcombine.low %v1049_v9, %v1053_v10  ;;  %v1113_v9 = vld [vmem:[#allocation7 + $0x4c8] sm:$0xff] }
 0x1ce   :  { %946 = vmatmul.mubr.bf16.vlgmr.msra.gmra.mrb[16].mxu0 %v7511_v37  ;;  %v1013_v37 = vld [vmem:[#allocation7 + $0x1a8] sm:$0xff] }
 0x1cf   :  { %2625 = vmatpush1.bf16.msra.mxu0 %v6013_v15  ;;  %v6062_v43 = vcombine.high %v1009_v34, %v1013_v37  ;;  %v6061_v48 = vcombine.low %v1009_v34, %v1013_v37  ;;  %v1057_v15 = vld [vmem:[#allocation7 + $0x308] sm:$0xff]  ;;  %v7534_v34 = vld [vmem:[%s7706_s4] sm:$0xf] }
 0x1d0   :  { %2626 = vmatprep.subr.bf16.mxu0 %v6022_v16  ;;  %v1061_v16 = vld [vmem:[#allocation7 + $0x328] sm:$0xff]  ;;  %v533_v37 = vrot.slane %v7534_v34, %v7488_v35  ;;  %v537_v38 = vrot.slane %v7534_v34, %v7494_v39 }
 0x1d1   :  { %v6110_v18 = vcombine.high %v1057_v15, %v1061_v16  ;;  %v6109_v21 = vcombine.low %v1057_v15, %v1061_v16  ;;  %v1117_v10 = vld [vmem:[#allocation7 + $0x4e8] sm:$0xff] }
 0x1d2   :  { %v6166_v58 = vcombine.high %v1113_v9, %v1117_v10  ;;  %v6165_v16 = vcombine.low %v1113_v9, %v1117_v10  ;;  %v1168_v9 = vld [vmem:[#allocation7 + $0x680] sm:$0xff] }
 0x1d3   :  { %2627 = vmatpush1.bf16.msra.mxu0 %v6021_v19  ;;  %v1065_v19 = vld [vmem:[#allocation7 + $0x348] sm:$0xff]  ;;  %v1172_v10 = vld [vmem:[#allocation7 + $0x6a0] sm:$0xff] }
 0x1d4   :  { %2628 = vmatprep.subr.bf16.mxu0 %v6030_v20  ;;  %v1069_v20 = vld [vmem:[#allocation7 + $0x368] sm:$0xff] }
 0x1d5   :  { %v6118_v22 = vcombine.high %v1065_v19, %v1069_v20  ;;  %v6117_v25 = vcombine.low %v1065_v19, %v1069_v20  ;;  %v1128_v19 = vld [vmem:[#allocation7 + $0x540] sm:$0xff] }
 0x1d6   :  { %v1132_v20 = vld [vmem:[#allocation7 + $0x560] sm:$0xff] }
 0x1d7   :  { %2629 = vmatpush1.bf16.msra.mxu0 %v6029_v23  ;;  %v1073_v23 = vld [vmem:[#allocation7 + $0x388] sm:$0xff] }
 0x1d8   :  { %2630 = vmatprep.subr.bf16.mxu0 %v6038_v24  ;;  %v1077_v24 = vld [vmem:[#allocation7 + $0x3a8] sm:$0xff] }
 0x1d9   :  { %v6126_v26 = vcombine.high %v1073_v23, %v1077_v24  ;;  %v6125_v29 = vcombine.low %v1073_v23, %v1077_v24 }
 0x1db   :  { %2631 = vmatpush1.bf16.msra.mxu0 %v6037_v27  ;;  %v1081_v27 = vld [vmem:[#allocation7 + $0x3c8] sm:$0xff] }
 0x1dc   :  { %2632 = vmatprep.subr.bf16.mxu0 %v6046_v28  ;;  %v1085_v28 = vld [vmem:[#allocation7 + $0x3e8] sm:$0xff] }
 0x1dd   :  { %v6134_v31 = vcombine.high %v1081_v27, %v1085_v28 }
 0x1df   :  { %2633 = vmatpush1.bf16.msra.mxu0 %v6045_v32  ;;  %v6133_v32 = vcombine.low %v1081_v27, %v1085_v28  ;;  %v1136_v27 = vld [vmem:[#allocation7 + $0x580] sm:$0xff] }
 0x1e0   :  { %2634 = vmatprep.subr.bf16.mxu0 %v6054_v33  ;;  %v6142_v33 = vcombine.high %v7519_v59, %v7523_v62  ;;  %v1120_v59 = vld [vmem:[#allocation7 + $0x500] sm:$0xff] }
 0x1e1   :  { %v1124_v62 = vld [vmem:[#allocation7 + $0x520] sm:$0xff] }
 0x1e2   :  { %v6171_v23 = vcombine.low %v1120_v59, %v1124_v62  ;;  %v1140_v28 = vld [vmem:[#allocation7 + $0x5a0] sm:$0xff] }
 0x1e3   :  { %2635 = vmatpush1.bf16.msra.mxu0 %v6053_v41 }
 0x1e4   :  { %2636 = vmatprep.subr.bf16.mxu0 %v6062_v43 }
 0x1e7   :  { %2637 = vmatpush1.bf16.msra.mxu0 %v6061_v48 }
 0x1e8   :  { %2638 = vmatprep.subr.bf16.mxu0 %v6070_v51  ;;  %v1097_v51 = vld [vmem:[#allocation7 + $0x448] sm:$0xff] }
 0x1eb   :  { %2639 = vmatpush1.bf16.msra.mxu0 %v6069_v56  ;;  %v6150_v56 = vcombine.high %v1097_v51, %v1101_v52 }
 0x1ec   :  { %2640 = vmatprep.subr.bf16.mxu0 %v6078_v60  ;;  %v1104_v60 = vld [vmem:[#allocation7 + $0x480] sm:$0xff] }
 0x1ed   :  { %v6156_v5 = vcombine.high %v1104_v60, %v1108_v61 }
 0x1ef   :  { %2641 = vmatpush1.bf16.msra.mxu0 %v6077_v3  ;;  %v6147_v3 = vcombine.low %v1096_v47, %v1100_v50  ;;  %v1156_v50 = vld [vmem:[#allocation7 + $0x620] sm:$0xff] }
 0x1f0   :  { %2642 = vmatprep.subr.bf16.mxu0 %v6086_v4  ;;  %v6149_v4 = vcombine.low %v1097_v51, %v1101_v52  ;;  %v1153_v51 = vld [vmem:[#allocation7 + $0x608] sm:$0xff] }
 0x1f1   :  { %v1157_v52 = vld [vmem:[#allocation7 + $0x628] sm:$0xff] }
 0x1f3   :  { %2643 = vmatpush1.bf16.msra.mxu0 %v6085_v7  ;;  %v1112_v7 = vld [vmem:[#allocation7 + $0x4c0] sm:$0xff] }
 0x1f4   :  { %2644 = vmatprep.subr.bf16.mxu0 %v6094_v8  ;;  %v1116_v8 = vld [vmem:[#allocation7 + $0x4e0] sm:$0xff] }
 0x1f5   :  { %v6164_v57 = vcombine.high %v1112_v7, %v1116_v8  ;;  %v6163_v15 = vcombine.low %v1112_v7, %v1116_v8 }
 0x1f7   :  { %2645 = vmatpush1.bf16.msra.mxu0 %v6093_v11  ;;  %v6155_v11 = vcombine.low %v1104_v60, %v1108_v61  ;;  %v6206_v61 = vcombine.high %v1153_v51, %v1157_v52 }
 0x1f8   :  { %2646 = vmatprep.subr.bf16.mxu0 %v6102_v13  ;;  %v6157_v13 = vcombine.low %v1105_v63, %v1109_v0  ;;  %v1160_v63 = vld [vmem:[#allocation7 + $0x640] sm:$0xff] }
 0x1f9   :  { %v1164_v0 = vld [vmem:[#allocation7 + $0x660] sm:$0xff] }
 0x1fa   :  { %v6212_v7 = vcombine.high %v1160_v63, %v1164_v0 }
 0x1fb   :  { %2647 = vmatpush1.bf16.msra.mxu0 %v6101_v17  ;;  %v6172_v17 = vcombine.high %v1120_v59, %v1124_v62  ;;  %v6220_v59 = vcombine.high %v1168_v9, %v1172_v10 }
 0x1fc   :  { %2648 = vmatprep.subr.bf16.mxu0 %v6110_v18 }
 0x1ff   :  { %2649 = vmatpush1.bf16.msra.mxu0 %v6109_v21  ;;  %v1129_v21 = vld [vmem:[#allocation7 + $0x548] sm:$0xff] }
 0x200   :  { %2650 = vmatprep.subr.bf16.mxu0 %v6118_v22  ;;  %v1133_v22 = vld [vmem:[#allocation7 + $0x568] sm:$0xff] }
 0x203   :  { %2651 = vmatpush1.bf16.msra.mxu0 %v6117_v25  ;;  %v6180_v25 = vcombine.high %v1128_v19, %v1132_v20 }
 0x204   :  { %2652 = vmatprep.subr.bf16.mxu0 %v6126_v26  ;;  %v6182_v26 = vcombine.high %v1129_v21, %v1133_v22 }
 0x207   :  { %2653 = vmatpush1.bf16.msra.mxu0 %v6125_v29  ;;  %v1137_v29 = vld [vmem:[#allocation7 + $0x588] sm:$0xff] }
 0x208   :  { %2654 = vmatprep.subr.bf16.mxu0 %v6134_v31  ;;  %v1141_v31 = vld [vmem:[#allocation7 + $0x5a8] sm:$0xff] }
 0x20b   :  { %2655 = vmatpush1.bf16.msra.mxu0 %v6133_v32  ;;  %v6179_v32 = vcombine.low %v1128_v19, %v1132_v20 }
 0x20c   :  { %2667 = vmatprep.subr.bf16.mxu0 %v6142_v33  ;;  %v6181_v33 = vcombine.low %v1129_v21, %v1133_v22  ;;  %v1184_v21 = vld [vmem:[#allocation7 + $0x700] sm:$0xff] }
 0x20d   :  { %v1188_v22 = vld [vmem:[#allocation7 + $0x720] sm:$0xff] }
 0x261   :  { %v904_v41 = vpop.f32.mrb[12].mxu0 }
 0x262   :  { %v906_v42 = vpop.f32.mrb[13].mxu0  ;;  %v905_v44 = vadd.f32 %v904_v41, %v533_v37  ;;  %v6190_v41 = vcombine.high %v1137_v29, %v1141_v31 }
 0x263   :  { %v908_v43 = vpop.f32.mrb[14].mxu0  ;;  %v907_v48 = vadd.f32 %v906_v42, %v537_v38  ;;  %v1148_v42 = vld [vmem:[#allocation7 + $0x5e0] sm:$0xff] }
 0x264   :  { %v909_v45 = vadd.f32 %v908_v43, %v533_v37  ;;  %v910_v46 = vpop.f32.mrb[15].mxu0  ;;  %v6188_v37 = vcombine.high %v1136_v27, %v1140_v28  ;;  %v1145_v43 = vld [vmem:[#allocation7 + $0x5c8] sm:$0xff] }
 0x265   :  { %v911_v49 = vadd.f32 %v910_v46, %v537_v38  ;;  %v1144_v38 = vld [vmem:[#allocation7 + $0x5c0] sm:$0xff]  ;;  %v6189_v46 = vcombine.low %v1137_v29, %v1141_v31 }
 0x266   :  { %v7540_v53 = vpack.c.bf16 %v909_v45, %v905_v44  ;;  %v1149_v44 = vld [vmem:[#allocation7 + $0x5e8] sm:$0xff]  ;;  %v6187_v45 = vcombine.low %v1136_v27, %v1140_v28  ;;  %v6196_v47 = vcombine.high %v1144_v38, %v1148_v42  ;;  %v6236_v27 = vcombine.high %v1184_v21, %v1188_v22  ;;  %v1192_v29 = vld [vmem:[#allocation7 + $0x740] sm:$0xff] }
 0x267   :  { %v7542_v54 = vpack.c.bf16 %v911_v49, %v907_v48  ;;  %v6198_v48 = vcombine.high %v1145_v43, %v1149_v44  ;;  %v1152_v49 = vld [vmem:[#allocation7 + $0x600] sm:$0xff] }
 0x268   :  { %v6204_v60 = vcombine.high %v1152_v49, %v1156_v50  ;;  %v1196_v31 = vld [vmem:[#allocation7 + $0x760] sm:$0xff] }
 0x269   :  { %2570 = vmatprep.mubr.bf16.mxu1 %v7542_v54  ;;  %2656 = vmatprep.mubr.bf16.mxu0 %v7542_v54 }
 0x26a   :  { %2571 = vmatmul.mubr.bf16.vlgmr.msra.gmra.mrb[0].mxu1 %v7540_v53  ;;  %2657 = vmatmul.mubr.bf16.vlgmr.msra.gmra.mrb[20].mxu0 %v7540_v53 }
 0x26b   :  { %2582 = vmatpush1.bf16.msra.mxu1 %v6139_v1  ;;  %2668 = vmatpush1.bf16.msra.mxu0 %v6141_v2  ;;  %v1121_v1 = vld [vmem:[#allocation7 + $0x508] sm:$0xff] }
 0x26c   :  { %2583 = vmatprep.subr.bf16.mxu1 %v6148_v55  ;;  %2669 = vmatprep.subr.bf16.mxu0 %v6150_v56  ;;  %v1125_v2 = vld [vmem:[#allocation7 + $0x528] sm:$0xff]  ;;  %v6195_v55 = vcombine.low %v1144_v38, %v1148_v42  ;;  %v6197_v56 = vcombine.low %v1145_v43, %v1149_v44  ;;  %v6244_v38 = vcombine.high %v1192_v29, %v1196_v31  ;;  %v1200_v43 = vld [vmem:[#allocation7 + $0x780] sm:$0xff] }
 0x26d   :  { %v6174_v18 = vcombine.high %v1121_v1, %v1125_v2  ;;  %v6173_v24 = vcombine.low %v1121_v1, %v1125_v2  ;;  %v1176_v1 = vld [vmem:[#allocation7 + $0x6c0] sm:$0xff] }
 0x26e   :  { %v1180_v2 = vld [vmem:[#allocation7 + $0x6e0] sm:$0xff] }
 0x26f   :  { %2584 = vmatpush1.bf16.msra.mxu1 %v6147_v3  ;;  %2670 = vmatpush1.bf16.msra.mxu0 %v6149_v4  ;;  %v1161_v3 = vld [vmem:[#allocation7 + $0x648] sm:$0xff]  ;;  %v6228_v19 = vcombine.high %v1176_v1, %v1180_v2  ;;  %v1204_v44 = vld [vmem:[#allocation7 + $0x7a0] sm:$0xff] }
 0x270   :  { %2585 = vmatprep.subr.bf16.mxu1 %v6156_v5  ;;  %2671 = vmatprep.subr.bf16.mxu0 %v6158_v6  ;;  %v1165_v4 = vld [vmem:[#allocation7 + $0x668] sm:$0xff]  ;;  %v6203_v5 = vcombine.low %v1152_v49, %v1156_v50  ;;  %v6205_v6 = vcombine.low %v1153_v51, %v1157_v52  ;;  %v6252_v49 = vcombine.high %v1200_v43, %v1204_v44  ;;  %v1208_v51 = vld [vmem:[#allocation7 + $0x7c0] sm:$0xff] }
 0x271   :  { %v6214_v8 = vcombine.high %v1161_v3, %v1165_v4  ;;  %v1212_v52 = vld [vmem:[#allocation7 + $0x7e0] sm:$0xff] }
 0x273   :  { %2586 = vmatpush1.bf16.msra.mxu1 %v6155_v11  ;;  %2672 = vmatpush1.bf16.msra.mxu0 %v6157_v13  ;;  %v1169_v11 = vld [vmem:[#allocation7 + $0x688] sm:$0xff] }
 0x274   :  { %2587 = vmatprep.subr.bf16.mxu1 %v6164_v57  ;;  %2673 = vmatprep.subr.bf16.mxu0 %v6166_v58  ;;  %v1173_v13 = vld [vmem:[#allocation7 + $0x6a8] sm:$0xff]  ;;  %v6211_v57 = vcombine.low %v1160_v63, %v1164_v0  ;;  %v6213_v58 = vcombine.low %v1161_v3, %v1165_v4  ;;  %v541_v63 = vrot.slane %v7534_v34, %v7491_v36  ;;  %v962_v4 = vld [vmem:[#allocation7 + $0x10] sm:$0xff] }
 0x275   :  { %v6222_v62 = vcombine.high %v1169_v11, %v1173_v13  ;;  %v6260_v0 = vcombine.high %v1208_v51, %v1212_v52 }
 0x277   :  { %2588 = vmatpush1.bf16.msra.mxu1 %v6163_v15  ;;  %2674 = vmatpush1.bf16.msra.mxu0 %v6165_v16  ;;  %v1177_v15 = vld [vmem:[#allocation7 + $0x6c8] sm:$0xff] }
 0x278   :  { %2589 = vmatprep.subr.bf16.mxu1 %v6172_v17  ;;  %2675 = vmatprep.subr.bf16.mxu0 %v6174_v18  ;;  %v1181_v16 = vld [vmem:[#allocation7 + $0x6e8] sm:$0xff]  ;;  %v6219_v17 = vcombine.low %v1168_v9, %v1172_v10  ;;  %v6221_v18 = vcombine.low %v1169_v11, %v1173_v13  ;;  %v967_v9 = vld [vmem:[#allocation7 + $0x38] sm:$0xff]  ;;  %v6259_v13 = vcombine.low %v1208_v51, %v1212_v52 }
 0x279   :  { %v6230_v20 = vcombine.high %v1177_v15, %v1181_v16 }
 0x27b   :  { %2590 = vmatpush1.bf16.msra.mxu1 %v6171_v23  ;;  %2676 = vmatpush1.bf16.msra.mxu0 %v6173_v24  ;;  %v1185_v23 = vld [vmem:[#allocation7 + $0x708] sm:$0xff] }
 0x27c   :  { %2591 = vmatprep.subr.bf16.mxu1 %v6180_v25  ;;  %2677 = vmatprep.subr.bf16.mxu0 %v6182_v26  ;;  %v1189_v24 = vld [vmem:[#allocation7 + $0x728] sm:$0xff]  ;;  %v6227_v25 = vcombine.low %v1176_v1, %v1180_v2  ;;  %v6229_v26 = vcombine.low %v1177_v15, %v1181_v16 }
 0x27d   :  { %v6238_v28 = vcombine.high %v1185_v23, %v1189_v24 }
 0x27f   :  { %2592 = vmatpush1.bf16.msra.mxu1 %v6179_v32  ;;  %2678 = vmatpush1.bf16.msra.mxu0 %v6181_v33  ;;  %v1193_v32 = vld [vmem:[#allocation7 + $0x748] sm:$0xff] }
 0x280   :  { %2593 = vmatprep.subr.bf16.mxu1 %v6188_v37  ;;  %2679 = vmatprep.subr.bf16.mxu0 %v6190_v41  ;;  %v1197_v33 = vld [vmem:[#allocation7 + $0x768] sm:$0xff]  ;;  %v6235_v37 = vcombine.low %v1184_v21, %v1188_v22  ;;  %v6237_v41 = vcombine.low %v1185_v23, %v1189_v24 }
 0x281   :  { %v6246_v42 = vcombine.high %v1193_v32, %v1197_v33 }
 0x283   :  { %2594 = vmatpush1.bf16.msra.mxu1 %v6187_v45  ;;  %2680 = vmatpush1.bf16.msra.mxu0 %v6189_v46  ;;  %v1201_v45 = vld [vmem:[#allocation7 + $0x788] sm:$0xff] }
 0x284   :  { %2595 = vmatprep.subr.bf16.mxu1 %v6196_v47  ;;  %2681 = vmatprep.subr.bf16.mxu0 %v6198_v48  ;;  %v1205_v46 = vld [vmem:[#allocation7 + $0x7a8] sm:$0xff]  ;;  %v6243_v47 = vcombine.low %v1192_v29, %v1196_v31  ;;  %v6245_v48 = vcombine.low %v1193_v32, %v1197_v33  ;;  %v983_v29 = vld [vmem:[#allocation7 + $0xb8] sm:$0xff] }
 0x285   :  { %v6254_v50 = vcombine.high %v1201_v45, %v1205_v46 }
 0x287   :  { %2596 = vmatpush1.bf16.msra.mxu1 %v6195_v55  ;;  %2682 = vmatpush1.bf16.msra.mxu0 %v6197_v56  ;;  %v1209_v55 = vld [vmem:[#allocation7 + $0x7c8] sm:$0xff] }
 0x288   :  { %2597 = vmatprep.subr.bf16.mxu1 %v6204_v60  ;;  %2683 = vmatprep.subr.bf16.mxu0 %v6206_v61  ;;  %v1213_v56 = vld [vmem:[#allocation7 + $0x7e8] sm:$0xff]  ;;  %v6251_v60 = vcombine.low %v1200_v43, %v1204_v44  ;;  %v6253_v61 = vcombine.low %v1201_v45, %v1205_v46  ;;  %v991_v43 = vld [vmem:[#allocation7 + $0xf8] sm:$0xff] }
 0x289   :  { %v6262_v3 = vcombine.high %v1209_v55, %v1213_v56 }
 0x28b   :  { %2598 = vmatpush1.bf16.msra.mxu1 %v6203_v5  ;;  %2684 = vmatpush1.bf16.msra.mxu0 %v6205_v6  ;;  %v966_v5 = vld [vmem:[#allocation7 + $0x30] sm:$0xff] }
 0x28c   :  { %2599 = vmatprep.subr.bf16.mxu1 %v6212_v7  ;;  %2685 = vmatprep.subr.bf16.mxu0 %v6214_v8  ;;  %v545_v7 = vrot.slane %v7534_v34, %v7497_v40  ;;  %v963_v8 = vld [vmem:[#allocation7 + $0x18] sm:$0xff]  ;;  %v974_v34 = vld [vmem:[#allocation7 + $0x70] sm:$0xff]  ;;  %v6015_v22 = vcombine.low %v962_v4, %v966_v5 }
 0x28d   :  { %v6018_v2 = vcombine.high %v963_v8, %v967_v9  ;;  %v6017_v23 = vcombine.low %v963_v8, %v967_v9  ;;  %v1014_v8 = vld [vmem:[#allocation7 + $0x1b0] sm:$0xff]  ;;  %v1011_v9 = vld [vmem:[#allocation7 + $0x198] sm:$0xff] }
 0x28f   :  { %2600 = vmatpush1.bf16.msra.mxu1 %v6211_v57  ;;  %2686 = vmatpush1.bf16.msra.mxu0 %v6213_v58  ;;  %v6261_v57 = vcombine.low %v1209_v55, %v1213_v56  ;;  %v6016_v58 = vcombine.high %v962_v4, %v966_v5 }
 0x290   :  { %2601 = vmatprep.subr.bf16.mxu1 %v6220_v59  ;;  %2687 = vmatprep.subr.bf16.mxu0 %v6222_v62 }
 0x293   :  { %2602 = vmatpush1.bf16.msra.mxu1 %v6219_v17  ;;  %2688 = vmatpush1.bf16.msra.mxu0 %v6221_v18  ;;  %v970_v17 = vld [vmem:[#allocation7 + $0x50] sm:$0xff] }
 0x294   :  { %2603 = vmatprep.subr.bf16.mxu1 %v6228_v19  ;;  %2689 = vmatprep.subr.bf16.mxu0 %v6230_v20  ;;  %v971_v19 = vld [vmem:[#allocation7 + $0x58] sm:$0xff]  ;;  %v6024_v24 = vcombine.high %v970_v17, %v974_v34  ;;  %v6023_v31 = vcombine.low %v970_v17, %v974_v34 }
 0x295   :  { %v975_v20 = vld [vmem:[#allocation7 + $0x78] sm:$0xff] }
 0x296   :  { %v6025_v32 = vcombine.low %v971_v19, %v975_v20 }
 0x297   :  { %2604 = vmatpush1.bf16.msra.mxu1 %v6227_v25  ;;  %2690 = vmatpush1.bf16.msra.mxu0 %v6229_v26  ;;  %v6026_v25 = vcombine.high %v971_v19, %v975_v20  ;;  %v978_v26 = vld [vmem:[#allocation7 + $0x90] sm:$0xff] }
 0x298   :  { %2605 = vmatprep.subr.bf16.mxu1 %v6236_v27  ;;  %2691 = vmatprep.subr.bf16.mxu0 %v6238_v28  ;;  %v982_v27 = vld [vmem:[#allocation7 + $0xb0] sm:$0xff]  ;;  %v979_v28 = vld [vmem:[#allocation7 + $0x98] sm:$0xff] }
 0x299   :  { %v6032_v33 = vcombine.high %v978_v26, %v982_v27  ;;  %v6031_v44 = vcombine.low %v978_v26, %v982_v27  ;;  %v6033_v45 = vcombine.low %v979_v28, %v983_v29  ;;  %v1026_v19 = vld [vmem:[#allocation7 + $0x210] sm:$0xff] }
 0x29a   :  { %v1030_v20 = vld [vmem:[#allocation7 + $0x230] sm:$0xff] }
 0x29b   :  { %2606 = vmatpush1.bf16.msra.mxu1 %v6235_v37  ;;  %2692 = vmatpush1.bf16.msra.mxu0 %v6237_v41  ;;  %v6034_v37 = vcombine.high %v979_v28, %v983_v29  ;;  %v986_v41 = vld [vmem:[#allocation7 + $0xd0] sm:$0xff]  ;;  %v6080_v26 = vcombine.high %v1026_v19, %v1030_v20 }
 0x29c   :  { %2607 = vmatprep.subr.bf16.mxu1 %v6244_v38  ;;  %2693 = vmatprep.subr.bf16.mxu0 %v6246_v42  ;;  %v990_v38 = vld [vmem:[#allocation7 + $0xf0] sm:$0xff]  ;;  %v987_v42 = vld [vmem:[#allocation7 + $0xd8] sm:$0xff] }
 0x29d   :  { %v6040_v46 = vcombine.high %v986_v41, %v990_v38  ;;  %v6039_v51 = vcombine.low %v986_v41, %v990_v38  ;;  %v6041_v52 = vcombine.low %v987_v42, %v991_v43  ;;  %v1034_v28 = vld [vmem:[#allocation7 + $0x250] sm:$0xff] }
 0x29e   :  { %v1038_v29 = vld [vmem:[#allocation7 + $0x270] sm:$0xff] }
 0x29f   :  { %2608 = vmatpush1.bf16.msra.mxu1 %v6243_v47  ;;  %2694 = vmatpush1.bf16.msra.mxu0 %v6245_v48  ;;  %v6042_v47 = vcombine.high %v987_v42, %v991_v43  ;;  %v994_v48 = vld [vmem:[#allocation7 + $0x110] sm:$0xff]  ;;  %v6088_v41 = vcombine.high %v1034_v28, %v1038_v29 }
 0x2a0   :  { %2609 = vmatprep.subr.bf16.mxu1 %v6252_v49  ;;  %2695 = vmatprep.subr.bf16.mxu0 %v6254_v50  ;;  %v998_v49 = vld [vmem:[#allocation7 + $0x130] sm:$0xff]  ;;  %v999_v50 = vld [vmem:[#allocation7 + $0x138] sm:$0xff] }
 0x2a1   :  { %v947_v6 = vpop.f32.mrb[16].mxu0  ;;  %v6048_v55 = vcombine.high %v994_v48, %v998_v49  ;;  %v1042_v42 = vld [vmem:[#allocation7 + $0x290] sm:$0xff] }
 0x2a2   :  { %v949_v10 = vpop.f32.mrb[17].mxu0  ;;  %v948_v59 = vadd.f32 %v947_v6, %v541_v63  ;;  %v1046_v43 = vld [vmem:[#allocation7 + $0x2b0] sm:$0xff] }
 0x2a3   :  { %v951_v11 = vpop.f32.mrb[18].mxu0  ;;  %2610 = vmatpush1.bf16.msra.mxu1 %v6251_v60  ;;  %2696 = vmatpush1.bf16.msra.mxu0 %v6253_v61  ;;  %v950_v15 = vadd.f32 %v949_v10, %v545_v7  ;;  %v1002_v60 = vld [vmem:[#allocation7 + $0x150] sm:$0xff]  ;;  %v1015_v10 = vld [vmem:[#allocation7 + $0x1b8] sm:$0xff] }
 0x2a4   :  { %v952_v62 = vadd.f32 %v951_v11, %v541_v63  ;;  %v953_v1 = vpop.f32.mrb[19].mxu0  ;;  %2611 = vmatprep.subr.bf16.mxu1 %v6260_v0  ;;  %2697 = vmatprep.subr.bf16.mxu0 %v6262_v3  ;;  %v1006_v61 = vld [vmem:[#allocation7 + $0x170] sm:$0xff]  ;;  %v1003_v63 = vld [vmem:[#allocation7 + $0x158] sm:$0xff]  ;;  %v6047_v3 = vcombine.low %v994_v48, %v998_v49  ;;  %v6096_v48 = vcombine.high %v1042_v42, %v1046_v43 }
 0x2a5   :  { %v954_v16 = vadd.f32 %v953_v1, %v545_v7  ;;  %v1007_v0 = vld [vmem:[#allocation7 + $0x178] sm:$0xff]  ;;  %v6056_v5 = vcombine.high %v1002_v60, %v1006_v61  ;;  %v1010_v7 = vld [vmem:[#allocation7 + $0x190] sm:$0xff]  ;;  %v6055_v11 = vcombine.low %v1002_v60, %v1006_v61 }
 0x2a6   :  { %v7558_v18 = vpack.c.bf16 %v952_v62, %v948_v59  ;;  %v6058_v6 = vcombine.high %v1003_v63, %v1007_v0  ;;  %v1018_v59 = vld [vmem:[#allocation7 + $0x1d0] sm:$0xff]  ;;  %v1019_v1 = vld [vmem:[#allocation7 + $0x1d8] sm:$0xff] }
 0x2a7   :  { %v7560_v21 = vpack.c.bf16 %v954_v16, %v950_v15  ;;  %2612 = vmatpush1.bf16.msra.mxu1 %v6259_v13  ;;  %2698 = vmatpush1.bf16.msra.mxu0 %v6261_v57  ;;  %v6057_v13 = vcombine.low %v1003_v63, %v1007_v0  ;;  %v6064_v57 = vcombine.high %v1010_v7, %v1014_v8  ;;  %v1022_v62 = vld [vmem:[#allocation7 + $0x1f0] sm:$0xff] }
 0x2a8   :  { %2710 = vmatprep.subr.bf16.mxu1 %v6016_v58  ;;  %2796 = vmatprep.subr.bf16.mxu0 %v6018_v2  ;;  %v6066_v58 = vcombine.high %v1011_v9, %v1015_v10  ;;  %v1023_v2 = vld [vmem:[#allocation7 + $0x1f8] sm:$0xff]  ;;  %v6063_v15 = vcombine.low %v1010_v7, %v1014_v8  ;;  %v6065_v16 = vcombine.low %v1011_v9, %v1015_v10  ;;  %v1058_v63 = vld [vmem:[#allocation7 + $0x310] sm:$0xff] }
 0x2a9   :  { %2613 = vmatprep.mubr.bf16.mxu1 %v7560_v21  ;;  %2699 = vmatprep.mubr.bf16.mxu0 %v7560_v21  ;;  %v6072_v17 = vcombine.high %v1018_v59, %v1022_v62  ;;  %v6074_v34 = vcombine.high %v1019_v1, %v1023_v2  ;;  %v1062_v0 = vld [vmem:[#allocation7 + $0x330] sm:$0xff] }
 0x2aa   :  { %2614 = vmatmul.mubr.bf16.vlgmr.msra.gmra.mrb[0].mxu1 %v7558_v18  ;;  %2700 = vmatmul.mubr.bf16.vlgmr.msra.gmra.mrb[20].mxu0 %v7558_v18  ;;  %v6112_v7 = vcombine.high %v1058_v63, %v1062_v0  ;;  %v1066_v9 = vld [vmem:[#allocation7 + $0x350] sm:$0xff] }
 0x2ab   :  { %2711 = vmatpush1.bf16.msra.mxu1 %v6015_v22  ;;  %2742 = vmatprep.mubr.bf16.mxu1 %v7542_v54  ;;  %v1027_v22 = vld [vmem:[#allocation7 + $0x218] sm:$0xff]  ;;  %v1070_v10 = vld [vmem:[#allocation7 + $0x370] sm:$0xff] }
 0x2ac   :  { %2797 = vmatpush1.bf16.msra.mxu0 %v6017_v23  ;;  %2828 = vmatprep.mubr.bf16.mxu0 %v7542_v54  ;;  %v995_v54 = vld [vmem:[#allocation7 + $0x118] sm:$0xff] }
 0x2ad   :  { %2712 = vmatprep.subr.bf16.mxu1 %v6024_v24  ;;  %2798 = vmatprep.subr.bf16.mxu0 %v6026_v25  ;;  %v6050_v56 = vcombine.high %v995_v54, %v999_v50  ;;  %v6049_v4 = vcombine.low %v995_v54, %v999_v50  ;;  %v1031_v23 = vld [vmem:[#allocation7 + $0x238] sm:$0xff]  ;;  %v6071_v24 = vcombine.low %v1018_v59, %v1022_v62  ;;  %v1050_v54 = vld [vmem:[#allocation7 + $0x2d0] sm:$0xff] }
 0x2ae   :  { %v6073_v25 = vcombine.low %v1019_v1, %v1023_v2  ;;  %v6082_v27 = vcombine.high %v1027_v22, %v1031_v23  ;;  %v1054_v50 = vld [vmem:[#allocation7 + $0x2f0] sm:$0xff]  ;;  %v6120_v59 = vcombine.high %v1066_v9, %v1070_v10 }
 0x2af   :  { %2713 = vmatpush1.bf16.msra.mxu1 %v6023_v31  ;;  %v1035_v31 = vld [vmem:[#allocation7 + $0x258] sm:$0xff]  ;;  %v6104_v60 = vcombine.high %v1050_v54, %v1054_v50  ;;  %v1074_v1 = vld [vmem:[#allocation7 + $0x390] sm:$0xff] }
 0x2b0   :  { %2799 = vmatpush1.bf16.msra.mxu0 %v6025_v32  ;;  %2714 = vmatprep.subr.bf16.mxu1 %v6032_v33  ;;  %v1039_v32 = vld [vmem:[#allocation7 + $0x278] sm:$0xff]  ;;  %v6079_v33 = vcombine.low %v1026_v19, %v1030_v20  ;;  %v1078_v2 = vld [vmem:[#allocation7 + $0x3b0] sm:$0xff] }
 0x2b1   :  { %2800 = vmatprep.subr.bf16.mxu0 %v6034_v37  ;;  %v6081_v37 = vcombine.low %v1027_v22, %v1031_v23  ;;  %v6090_v38 = vcombine.high %v1035_v31, %v1039_v32  ;;  %v6128_v19 = vcombine.high %v1074_v1, %v1078_v2  ;;  %v1082_v22 = vld [vmem:[#allocation7 + $0x3d0] sm:$0xff] }
 0x2b2   :  { %v1086_v23 = vld [vmem:[#allocation7 + $0x3f0] sm:$0xff] }
 0x2b3   :  { %2715 = vmatpush1.bf16.msra.mxu1 %v6031_v44  ;;  %v1043_v44 = vld [vmem:[#allocation7 + $0x298] sm:$0xff] }
 0x2b4   :  { %2801 = vmatpush1.bf16.msra.mxu0 %v6033_v45  ;;  %2716 = vmatprep.subr.bf16.mxu1 %v6040_v46  ;;  %v1047_v45 = vld [vmem:[#allocation7 + $0x2b8] sm:$0xff]  ;;  %v6087_v46 = vcombine.low %v1034_v28, %v1038_v29  ;;  %v6136_v28 = vcombine.high %v1082_v22, %v1086_v23 }
 0x2b5   :  { %2802 = vmatprep.subr.bf16.mxu0 %v6042_v47  ;;  %v6089_v47 = vcombine.low %v1035_v31, %v1039_v32  ;;  %v6098_v49 = vcombine.high %v1043_v44, %v1047_v45  ;;  %v1090_v31 = vld [vmem:[#allocation7 + $0x410] sm:$0xff] }
 0x2b6   :  { %v1094_v32 = vld [vmem:[#allocation7 + $0x430] sm:$0xff] }
 0x2b7   :  { %2717 = vmatpush1.bf16.msra.mxu1 %v6039_v51  ;;  %v1051_v51 = vld [vmem:[#allocation7 + $0x2d8] sm:$0xff] }
 0x2b8   :  { %2803 = vmatpush1.bf16.msra.mxu0 %v6041_v52  ;;  %2718 = vmatprep.subr.bf16.mxu1 %v6048_v55  ;;  %v1055_v52 = vld [vmem:[#allocation7 + $0x2f8] sm:$0xff]  ;;  %v6095_v55 = vcombine.low %v1042_v42, %v1046_v43  ;;  %v6144_v42 = vcombine.high %v1090_v31, %v1094_v32 }
 0x2b9   :  { %2804 = vmatprep.subr.bf16.mxu0 %v6050_v56  ;;  %v6097_v56 = vcombine.low %v1043_v44, %v1047_v45  ;;  %v6106_v61 = vcombine.high %v1051_v51, %v1055_v52  ;;  %v1098_v44 = vld [vmem:[#allocation7 + $0x450] sm:$0xff] }
 0x2ba   :  { %v1102_v45 = vld [vmem:[#allocation7 + $0x470] sm:$0xff] }
 0x2bb   :  { %2719 = vmatpush1.bf16.msra.mxu1 %v6047_v3  ;;  %v1059_v3 = vld [vmem:[#allocation7 + $0x318] sm:$0xff] }
 0x2bc   :  { %2805 = vmatpush1.bf16.msra.mxu0 %v6049_v4  ;;  %2720 = vmatprep.subr.bf16.mxu1 %v6056_v5  ;;  %v1063_v4 = vld [vmem:[#allocation7 + $0x338] sm:$0xff]  ;;  %v6103_v5 = vcombine.low %v1050_v54, %v1054_v50  ;;  %v6152_v54 = vcombine.high %v1098_v44, %v1102_v45  ;;  %v1106_v50 = vld [vmem:[#allocation7 + $0x490] sm:$0xff] }
 0x2bd   :  { %2806 = vmatprep.subr.bf16.mxu0 %v6058_v6  ;;  %v6105_v6 = vcombine.low %v1051_v51, %v1055_v52  ;;  %v6114_v8 = vcombine.high %v1059_v3, %v1063_v4  ;;  %v1110_v51 = vld [vmem:[#allocation7 + $0x4b0] sm:$0xff] }
 0x2bf   :  { %2721 = vmatpush1.bf16.msra.mxu1 %v6055_v11  ;;  %v1067_v11 = vld [vmem:[#allocation7 + $0x358] sm:$0xff] }
 0x2c0   :  { %2807 = vmatpush1.bf16.msra.mxu0 %v6057_v13  ;;  %2722 = vmatprep.subr.bf16.mxu1 %v6064_v57  ;;  %v1071_v13 = vld [vmem:[#allocation7 + $0x378] sm:$0xff]  ;;  %v6111_v57 = vcombine.low %v1058_v63, %v1062_v0  ;;  %v6160_v63 = vcombine.high %v1106_v50, %v1110_v51 }
 0x2c1   :  { %2808 = vmatprep.subr.bf16.mxu0 %v6066_v58  ;;  %v6113_v58 = vcombine.low %v1059_v3, %v1063_v4  ;;  %v6122_v62 = vcombine.high %v1067_v11, %v1071_v13  ;;  %v1114_v3 = vld [vmem:[#allocation7 + $0x4d0] sm:$0xff] }
 0x2c2   :  { %v1118_v4 = vld [vmem:[#allocation7 + $0x4f0] sm:$0xff] }
 0x2c3   :  { %2723 = vmatpush1.bf16.msra.mxu1 %v6063_v15  ;;  %v1075_v15 = vld [vmem:[#allocation7 + $0x398] sm:$0xff] }
 0x2c4   :  { %2809 = vmatpush1.bf16.msra.mxu0 %v6065_v16  ;;  %2724 = vmatprep.subr.bf16.mxu1 %v6072_v17  ;;  %v1079_v16 = vld [vmem:[#allocation7 + $0x3b8] sm:$0xff]  ;;  %v6119_v17 = vcombine.low %v1066_v9, %v1070_v10  ;;  %v1122_v10 = vld [vmem:[#allocation7 + $0x510] sm:$0xff] }
 0x2c5   :  { %2810 = vmatprep.subr.bf16.mxu0 %v6074_v34  ;;  %v6121_v34 = vcombine.low %v1067_v11, %v1071_v13  ;;  %v6130_v20 = vcombine.high %v1075_v15, %v1079_v16  ;;  %v1126_v11 = vld [vmem:[#allocation7 + $0x530] sm:$0xff]  ;;  %v1123_v13 = vld [vmem:[#allocation7 + $0x518] sm:$0xff] }
 0x2c7   :  { %2725 = vmatpush1.bf16.msra.mxu1 %v6071_v24  ;;  %v1083_v24 = vld [vmem:[#allocation7 + $0x3d8] sm:$0xff] }
 0x2c8   :  { %2811 = vmatpush1.bf16.msra.mxu0 %v6073_v25  ;;  %2726 = vmatprep.subr.bf16.mxu1 %v6080_v26  ;;  %v1087_v25 = vld [vmem:[#allocation7 + $0x3f8] sm:$0xff]  ;;  %v6127_v26 = vcombine.low %v1074_v1, %v1078_v2  ;;  %v1130_v1 = vld [vmem:[#allocation7 + $0x550] sm:$0xff] }
 0x2c9   :  { %2812 = vmatprep.subr.bf16.mxu0 %v6082_v27  ;;  %v6129_v27 = vcombine.low %v1075_v15, %v1079_v16  ;;  %v6138_v29 = vcombine.high %v1083_v24, %v1087_v25  ;;  %v1134_v2 = vld [vmem:[#allocation7 + $0x570] sm:$0xff]  ;;  %v1131_v15 = vld [vmem:[#allocation7 + $0x558] sm:$0xff] }
 0x2ca   :  { %v1135_v16 = vld [vmem:[#allocation7 + $0x578] sm:$0xff] }
 0x2cb   :  { %2727 = vmatpush1.bf16.msra.mxu1 %v6079_v33  ;;  %v1091_v33 = vld [vmem:[#allocation7 + $0x418] sm:$0xff] }
 0x2cc   :  { %2813 = vmatpush1.bf16.msra.mxu0 %v6081_v37  ;;  %2728 = vmatprep.subr.bf16.mxu1 %v6088_v41  ;;  %v1095_v37 = vld [vmem:[#allocation7 + $0x438] sm:$0xff]  ;;  %v6135_v41 = vcombine.low %v1082_v22, %v1086_v23  ;;  %v1138_v22 = vld [vmem:[#allocation7 + $0x590] sm:$0xff] }
 0x2cd   :  { %2814 = vmatprep.subr.bf16.mxu0 %v6090_v38  ;;  %v6137_v38 = vcombine.low %v1083_v24, %v1087_v25  ;;  %v6146_v43 = vcombine.high %v1091_v33, %v1095_v37  ;;  %v1142_v23 = vld [vmem:[#allocation7 + $0x5b0] sm:$0xff]  ;;  %v1139_v24 = vld [vmem:[#allocation7 + $0x598] sm:$0xff] }
 0x2ce   :  { %v1143_v25 = vld [vmem:[#allocation7 + $0x5b8] sm:$0xff] }
 0x2cf   :  { %2729 = vmatpush1.bf16.msra.mxu1 %v6087_v46  ;;  %v6143_v46 = vcombine.low %v1090_v31, %v1094_v32  ;;  %v1146_v31 = vld [vmem:[#allocation7 + $0x5d0] sm:$0xff] }
 0x2d0   :  { %2815 = vmatpush1.bf16.msra.mxu0 %v6089_v47  ;;  %2730 = vmatprep.subr.bf16.mxu1 %v6096_v48  ;;  %v1099_v47 = vld [vmem:[#allocation7 + $0x458] sm:$0xff]  ;;  %v1150_v32 = vld [vmem:[#allocation7 + $0x5f0] sm:$0xff] }
 0x2d1   :  { %2816 = vmatprep.subr.bf16.mxu0 %v6098_v49  ;;  %v1103_v48 = vld [vmem:[#allocation7 + $0x478] sm:$0xff]  ;;  %v6145_v49 = vcombine.low %v1091_v33, %v1095_v37 }
 0x2d2   :  { %v6154_v52 = vcombine.high %v1099_v47, %v1103_v48  ;;  %v1147_v33 = vld [vmem:[#allocation7 + $0x5d8] sm:$0xff] }
 0x2d3   :  { %2731 = vmatpush1.bf16.msra.mxu1 %v6095_v55  ;;  %v1107_v55 = vld [vmem:[#allocation7 + $0x498] sm:$0xff] }
 0x2d4   :  { %2817 = vmatpush1.bf16.msra.mxu0 %v6097_v56  ;;  %2732 = vmatprep.subr.bf16.mxu1 %v6104_v60  ;;  %v1111_v56 = vld [vmem:[#allocation7 + $0x4b8] sm:$0xff]  ;;  %v6151_v60 = vcombine.low %v1098_v44, %v1102_v45  ;;  %v1154_v44 = vld [vmem:[#allocation7 + $0x610] sm:$0xff] }
 0x2d5   :  { %2818 = vmatprep.subr.bf16.mxu0 %v6106_v61  ;;  %v6153_v61 = vcombine.low %v1099_v47, %v1103_v48  ;;  %v6162_v0 = vcombine.high %v1107_v55, %v1111_v56  ;;  %v1151_v37 = vld [vmem:[#allocation7 + $0x5f8] sm:$0xff]  ;;  %v1158_v45 = vld [vmem:[#allocation7 + $0x630] sm:$0xff]  ;;  %v6199_v48 = vcombine.low %v1146_v31, %v1150_v32 }
 0x2d6   :  { %v1159_v47 = vld [vmem:[#allocation7 + $0x638] sm:$0xff] }
 0x2d7   :  { %2733 = vmatpush1.bf16.msra.mxu1 %v6103_v5  ;;  %v1115_v5 = vld [vmem:[#allocation7 + $0x4d8] sm:$0xff] }
 0x2d8   :  { %2819 = vmatpush1.bf16.msra.mxu0 %v6105_v6  ;;  %2734 = vmatprep.subr.bf16.mxu1 %v6112_v7  ;;  %v1119_v6 = vld [vmem:[#allocation7 + $0x4f8] sm:$0xff]  ;;  %v6159_v7 = vcombine.low %v1106_v50, %v1110_v51  ;;  %v1162_v51 = vld [vmem:[#allocation7 + $0x650] sm:$0xff] }
 0x2d9   :  { %2820 = vmatprep.subr.bf16.mxu0 %v6114_v8  ;;  %v6168_v8 = vcombine.high %v1114_v3, %v1118_v4  ;;  %v6170_v9 = vcombine.high %v1115_v5, %v1119_v6 }
 0x2db   :  { %2735 = vmatpush1.bf16.msra.mxu1 %v6111_v57  ;;  %v1127_v57 = vld [vmem:[#allocation7 + $0x538] sm:$0xff] }
 0x2dc   :  { %2821 = vmatpush1.bf16.msra.mxu0 %v6113_v58  ;;  %2736 = vmatprep.subr.bf16.mxu1 %v6120_v59  ;;  %v6169_v58 = vcombine.low %v1115_v5, %v1119_v6  ;;  %v6176_v59 = vcombine.high %v1122_v10, %v1126_v11  ;;  %v1171_v5 = vld [vmem:[#allocation7 + $0x698] sm:$0xff] }
 0x2dd   :  { %2822 = vmatprep.subr.bf16.mxu0 %v6122_v62  ;;  %v6178_v62 = vcombine.high %v1123_v13, %v1127_v57  ;;  %v1175_v6 = vld [vmem:[#allocation7 + $0x6b8] sm:$0xff] }
 0x2df   :  { %2737 = vmatpush1.bf16.msra.mxu1 %v6119_v17  ;;  %v6175_v17 = vcombine.low %v1122_v10, %v1126_v11  ;;  %v1178_v10 = vld [vmem:[#allocation7 + $0x6d0] sm:$0xff] }
 0x2e0   :  { %2823 = vmatpush1.bf16.msra.mxu0 %v6121_v34  ;;  %2738 = vmatprep.subr.bf16.mxu1 %v6128_v19  ;;  %v6177_v34 = vcombine.low %v1123_v13, %v1127_v57  ;;  %v6184_v19 = vcombine.high %v1130_v1, %v1134_v2  ;;  %v1182_v11 = vld [vmem:[#allocation7 + $0x6f0] sm:$0xff]  ;;  %v1179_v13 = vld [vmem:[#allocation7 + $0x6d8] sm:$0xff] }
 0x2e1   :  { %2824 = vmatprep.subr.bf16.mxu0 %v6130_v20  ;;  %v6186_v20 = vcombine.high %v1131_v15, %v1135_v16  ;;  %v1183_v57 = vld [vmem:[#allocation7 + $0x6f8] sm:$0xff] }
 0x2e3   :  { %2739 = vmatpush1.bf16.msra.mxu1 %v6127_v26  ;;  %v6183_v26 = vcombine.low %v1130_v1, %v1134_v2  ;;  %v1186_v1 = vld [vmem:[#allocation7 + $0x710] sm:$0xff] }
 0x2e4   :  { %2825 = vmatpush1.bf16.msra.mxu0 %v6129_v27  ;;  %2740 = vmatprep.subr.bf16.mxu1 %v6136_v28  ;;  %v6185_v27 = vcombine.low %v1131_v15, %v1135_v16  ;;  %v6192_v28 = vcombine.high %v1138_v22, %v1142_v23  ;;  %v1190_v2 = vld [vmem:[#allocation7 + $0x730] sm:$0xff]  ;;  %v1187_v15 = vld [vmem:[#allocation7 + $0x718] sm:$0xff] }
 0x2e5   :  { %2826 = vmatprep.subr.bf16.mxu0 %v6138_v29  ;;  %v6194_v29 = vcombine.high %v1139_v24, %v1143_v25  ;;  %v1191_v16 = vld [vmem:[#allocation7 + $0x738] sm:$0xff] }
 0x2e7   :  { %2741 = vmatpush1.bf16.msra.mxu1 %v6135_v41  ;;  %v6191_v41 = vcombine.low %v1138_v22, %v1142_v23  ;;  %v1194_v22 = vld [vmem:[#allocation7 + $0x750] sm:$0xff] }
 0x2e8   :  { %2827 = vmatpush1.bf16.msra.mxu0 %v6137_v38  ;;  %2753 = vmatprep.subr.bf16.mxu1 %v6144_v42  ;;  %v6193_v38 = vcombine.low %v1139_v24, %v1143_v25  ;;  %v6200_v42 = vcombine.high %v1146_v31, %v1150_v32  ;;  %v1198_v23 = vld [vmem:[#allocation7 + $0x770] sm:$0xff]  ;;  %v1195_v24 = vld [vmem:[#allocation7 + $0x758] sm:$0xff] }
 0x2e9   :  { %2839 = vmatprep.subr.bf16.mxu0 %v6146_v43  ;;  %v6202_v43 = vcombine.high %v1147_v33, %v1151_v37  ;;  %v1199_v25 = vld [vmem:[#allocation7 + $0x778] sm:$0xff]  ;;  %v1202_v31 = vld [vmem:[#allocation7 + $0x790] sm:$0xff] }
 0x2ea   :  { %2743 = vmatmul.mubr.bf16.vlgmr.msra.gmra.mrb[4].mxu1 %v7540_v53  ;;  %v1206_v32 = vld [vmem:[#allocation7 + $0x7b0] sm:$0xff] }
 0x2eb   :  { %2829 = vmatmul.mubr.bf16.vlgmr.msra.gmra.mrb[24].mxu0 %v7540_v53  ;;  %2754 = vmatpush1.bf16.msra.mxu1 %v6143_v46  ;;  %v6161_v53 = vcombine.low %v1107_v55, %v1111_v56  ;;  %v1155_v46 = vld [vmem:[#allocation7 + $0x618] sm:$0xff] }
 0x2ec   :  { %2785 = vmatprep.mubr.bf16.mxu1 %v7560_v21  ;;  %2840 = vmatpush1.bf16.msra.mxu0 %v6145_v49  ;;  %v6201_v49 = vcombine.low %v1147_v33, %v1151_v37  ;;  %v6210_v50 = vcombine.high %v1155_v46, %v1159_v47  ;;  %v1163_v55 = vld [vmem:[#allocation7 + $0x658] sm:$0xff] }
 0x2ed   :  { %2871 = vmatprep.mubr.bf16.mxu0 %v7560_v21  ;;  %2755 = vmatprep.subr.bf16.mxu1 %v6152_v54  ;;  %v6167_v21 = vcombine.low %v1114_v3, %v1118_v4  ;;  %v6208_v54 = vcombine.high %v1154_v44, %v1158_v45  ;;  %v1167_v56 = vld [vmem:[#allocation7 + $0x678] sm:$0xff]  ;;  %v1170_v3 = vld [vmem:[#allocation7 + $0x690] sm:$0xff] }
 0x2ee   :  { %2841 = vmatprep.subr.bf16.mxu0 %v6154_v52  ;;  %v1166_v52 = vld [vmem:[#allocation7 + $0x670] sm:$0xff]  ;;  %v1203_v33 = vld [vmem:[#allocation7 + $0x798] sm:$0xff] }
 0x2ef   :  { %2756 = vmatpush1.bf16.msra.mxu1 %v6151_v60  ;;  %v6207_v60 = vcombine.low %v1154_v44, %v1158_v45  ;;  %v1174_v4 = vld [vmem:[#allocation7 + $0x6b0] sm:$0xff]  ;;  %v1207_v37 = vld [vmem:[#allocation7 + $0x7b8] sm:$0xff] }
 0x2f0   :  { %2842 = vmatpush1.bf16.msra.mxu0 %v6153_v61  ;;  %2757 = vmatprep.subr.bf16.mxu1 %v6160_v63  ;;  %v6209_v61 = vcombine.low %v1155_v46, %v1159_v47  ;;  %v6216_v63 = vcombine.high %v1162_v51, %v1166_v52  ;;  %v1210_v44 = vld [vmem:[#allocation7 + $0x7d0] sm:$0xff]  ;;  %v1211_v46 = vld [vmem:[#allocation7 + $0x7d8] sm:$0xff] }
 0x2f1   :  { %2843 = vmatprep.subr.bf16.mxu0 %v6162_v0  ;;  %v6218_v0 = vcombine.high %v1163_v55, %v1167_v56  ;;  %v1214_v45 = vld [vmem:[#allocation7 + $0x7f0] sm:$0xff]  ;;  %v1215_v47 = vld [vmem:[#allocation7 + $0x7f8] sm:$0xff] }
 0x2f3   :  { %2758 = vmatpush1.bf16.msra.mxu1 %v6159_v7  ;;  %v6215_v7 = vcombine.low %v1162_v51, %v1166_v52  ;;  %v2894_v51 = vld [vmem:[#allocation9] sm:$0xff] }
 0x2f4   :  { %2844 = vmatpush1.bf16.msra.mxu0 %v6161_v53  ;;  %2759 = vmatprep.subr.bf16.mxu1 %v6168_v8  ;;  %v6217_v53 = vcombine.low %v1163_v55, %v1167_v56  ;;  %v6224_v8 = vcombine.high %v1170_v3, %v1174_v4  ;;  %v2898_v52 = vld [vmem:[#allocation9 + $0x20] sm:$0xff]  ;;  %v2895_v55 = vld [vmem:[#allocation9 + $0x8] sm:$0xff] }
 0x2f5   :  { %2845 = vmatprep.subr.bf16.mxu0 %v6170_v9  ;;  %v6226_v9 = vcombine.high %v1171_v5, %v1175_v6  ;;  %v2899_v56 = vld [vmem:[#allocation9 + $0x28] sm:$0xff] }
 0x2f7   :  { %2760 = vmatpush1.bf16.msra.mxu1 %v6167_v21  ;;  %v6223_v21 = vcombine.low %v1170_v3, %v1174_v4  ;;  %v2902_v3 = vld [vmem:[#allocation9 + $0x40] sm:$0xff] }
 0x2f8   :  { %2846 = vmatpush1.bf16.msra.mxu0 %v6169_v58  ;;  %2761 = vmatprep.subr.bf16.mxu1 %v6176_v59  ;;  %v6225_v58 = vcombine.low %v1171_v5, %v1175_v6  ;;  %v6232_v59 = vcombine.high %v1178_v10, %v1182_v11  ;;  %v2906_v4 = vld [vmem:[#allocation9 + $0x60] sm:$0xff]  ;;  %v2903_v5 = vld [vmem:[#allocation9 + $0x48] sm:$0xff] }
 0x2f9   :  { %2847 = vmatprep.subr.bf16.mxu0 %v6178_v62  ;;  %v6234_v62 = vcombine.high %v1179_v13, %v1183_v57  ;;  %v2907_v6 = vld [vmem:[#allocation9 + $0x68] sm:$0xff] }
 0x2fb   :  { %2762 = vmatpush1.bf16.msra.mxu1 %v6175_v17  ;;  %v6231_v17 = vcombine.low %v1178_v10, %v1182_v11  ;;  %v2910_v10 = vld [vmem:[#allocation9 + $0x80] sm:$0xff] }
 0x2fc   :  { %2848 = vmatpush1.bf16.msra.mxu0 %v6177_v34  ;;  %2763 = vmatprep.subr.bf16.mxu1 %v6184_v19  ;;  %v6233_v34 = vcombine.low %v1179_v13, %v1183_v57  ;;  %v6240_v19 = vcombine.high %v1186_v1, %v1190_v2  ;;  %v2914_v11 = vld [vmem:[#allocation9 + $0xa0] sm:$0xff]  ;;  %v2911_v13 = vld [vmem:[#allocation9 + $0x88] sm:$0xff] }
 0x2fd   :  { %2849 = vmatprep.subr.bf16.mxu0 %v6186_v20  ;;  %v6242_v20 = vcombine.high %v1187_v15, %v1191_v16  ;;  %v2915_v57 = vld [vmem:[#allocation9 + $0xa8] sm:$0xff] }
 0x2ff   :  { %2764 = vmatpush1.bf16.msra.mxu1 %v6183_v26  ;;  %v6239_v26 = vcombine.low %v1186_v1, %v1190_v2  ;;  %v2918_v1 = vld [vmem:[#allocation9 + $0xc0] sm:$0xff] }
 0x300   :  { %2850 = vmatpush1.bf16.msra.mxu0 %v6185_v27  ;;  %2765 = vmatprep.subr.bf16.mxu1 %v6192_v28  ;;  %v6241_v27 = vcombine.low %v1187_v15, %v1191_v16  ;;  %v6248_v28 = vcombine.high %v1194_v22, %v1198_v23  ;;  %v2922_v2 = vld [vmem:[#allocation9 + $0xe0] sm:$0xff]  ;;  %v2919_v15 = vld [vmem:[#allocation9 + $0xc8] sm:$0xff] }
 0x301   :  { %2851 = vmatprep.subr.bf16.mxu0 %v6194_v29  ;;  %v6250_v29 = vcombine.high %v1195_v24, %v1199_v25  ;;  %v2923_v16 = vld [vmem:[#allocation9 + $0xe8] sm:$0xff] }
 0x303   :  { %2766 = vmatpush1.bf16.msra.mxu1 %v6191_v41  ;;  %v6247_v41 = vcombine.low %v1194_v22, %v1198_v23  ;;  %v2930_v22 = vld [vmem:[#allocation9 + $0x120] sm:$0xff]  ;;  %v2927_v23 = vld [vmem:[#allocation9 + $0x108] sm:$0xff] }
 0x304   :  { %2852 = vmatpush1.bf16.msra.mxu0 %v6193_v38  ;;  %2767 = vmatprep.subr.bf16.mxu1 %v6200_v42  ;;  %v6249_v38 = vcombine.low %v1195_v24, %v1199_v25  ;;  %v6256_v42 = vcombine.high %v1202_v31, %v1206_v32  ;;  %v2931_v24 = vld [vmem:[#allocation9 + $0x128] sm:$0xff]  ;;  %v6291_v25 = vcombine.low %v2918_v1, %v2922_v2 }
 0x305   :  { %2853 = vmatprep.subr.bf16.mxu0 %v6202_v43  ;;  %v6258_v43 = vcombine.high %v1203_v33, %v1207_v37 }
 0x307   :  { %2768 = vmatpush1.bf16.msra.mxu1 %v6199_v48  ;;  %v6255_v48 = vcombine.low %v1202_v31, %v1206_v32  ;;  %v2938_v31 = vld [vmem:[#allocation9 + $0x160] sm:$0xff]  ;;  %v2935_v32 = vld [vmem:[#allocation9 + $0x148] sm:$0xff] }
 0x308   :  { %2854 = vmatpush1.bf16.msra.mxu0 %v6201_v49  ;;  %2769 = vmatprep.subr.bf16.mxu1 %v6208_v54  ;;  %v6257_v49 = vcombine.low %v1203_v33, %v1207_v37  ;;  %v6264_v54 = vcombine.high %v1210_v44, %v1214_v45  ;;  %v2939_v33 = vld [vmem:[#allocation9 + $0x168] sm:$0xff] }
 0x309   :  { %2855 = vmatprep.subr.bf16.mxu0 %v6210_v50  ;;  %v6266_v50 = vcombine.high %v1211_v46, %v1215_v47 }
 0x30b   :  { %2770 = vmatpush1.bf16.msra.mxu1 %v6207_v60  ;;  %v6263_v60 = vcombine.low %v1210_v44, %v1214_v45  ;;  %v2946_v44 = vld [vmem:[#allocation9 + $0x1a0] sm:$0xff]  ;;  %v2943_v45 = vld [vmem:[#allocation9 + $0x188] sm:$0xff] }
 0x30c   :  { %2856 = vmatpush1.bf16.msra.mxu0 %v6209_v61  ;;  %2771 = vmatprep.subr.bf16.mxu1 %v6216_v63  ;;  %v6265_v61 = vcombine.low %v1211_v46, %v1215_v47  ;;  %v6268_v63 = vcombine.high %v2894_v51, %v2898_v52  ;;  %v2947_v46 = vld [vmem:[#allocation9 + $0x1a8] sm:$0xff] }
 0x30d   :  { %2857 = vmatprep.subr.bf16.mxu0 %v6218_v0  ;;  %v6270_v0 = vcombine.high %v2895_v55, %v2899_v56 }
 0x30f   :  { %2772 = vmatpush1.bf16.msra.mxu1 %v6215_v7  ;;  %v6267_v7 = vcombine.low %v2894_v51, %v2898_v52  ;;  %v2954_v51 = vld [vmem:[#allocation9 + $0x1e0] sm:$0xff]  ;;  %v2951_v52 = vld [vmem:[#allocation9 + $0x1c8] sm:$0xff] }
 0x310   :  { %2858 = vmatpush1.bf16.msra.mxu0 %v6217_v53  ;;  %2773 = vmatprep.subr.bf16.mxu1 %v6224_v8  ;;  %v6269_v53 = vcombine.low %v2895_v55, %v2899_v56  ;;  %v6276_v8 = vcombine.high %v2902_v3, %v2906_v4  ;;  %v2955_v55 = vld [vmem:[#allocation9 + $0x1e8] sm:$0xff] }
 0x311   :  { %2859 = vmatprep.subr.bf16.mxu0 %v6226_v9  ;;  %v6278_v9 = vcombine.high %v2903_v5, %v2907_v6 }
 0x313   :  { %2774 = vmatpush1.bf16.msra.mxu1 %v6223_v21  ;;  %v6275_v21 = vcombine.low %v2902_v3, %v2906_v4  ;;  %v2962_v3 = vld [vmem:[#allocation9 + $0x220] sm:$0xff]  ;;  %v2959_v4 = vld [vmem:[#allocation9 + $0x208] sm:$0xff] }
 0x314   :  { %2860 = vmatpush1.bf16.msra.mxu0 %v6225_v58  ;;  %2775 = vmatprep.subr.bf16.mxu1 %v6232_v59  ;;  %v6277_v58 = vcombine.low %v2903_v5, %v2907_v6  ;;  %v6284_v59 = vcombine.high %v2910_v10, %v2914_v11  ;;  %v2963_v5 = vld [vmem:[#allocation9 + $0x228] sm:$0xff] }
 0x315   :  { %2861 = vmatprep.subr.bf16.mxu0 %v6234_v62  ;;  %v6286_v62 = vcombine.high %v2911_v13, %v2915_v57 }
 0x317   :  { %2776 = vmatpush1.bf16.msra.mxu1 %v6231_v17  ;;  %v6283_v17 = vcombine.low %v2910_v10, %v2914_v11  ;;  %v2970_v10 = vld [vmem:[#allocation9 + $0x260] sm:$0xff]  ;;  %v2967_v11 = vld [vmem:[#allocation9 + $0x248] sm:$0xff] }
 0x318   :  { %2862 = vmatpush1.bf16.msra.mxu0 %v6233_v34  ;;  %2777 = vmatprep.subr.bf16.mxu1 %v6240_v19  ;;  %v6285_v34 = vcombine.low %v2911_v13, %v2915_v57  ;;  %v6292_v19 = vcombine.high %v2918_v1, %v2922_v2  ;;  %v2971_v13 = vld [vmem:[#allocation9 + $0x268] sm:$0xff]  ;;  %v2978_v1 = vld [vmem:[#allocation9 + $0x2a0] sm:$0xff] }
 0x319   :  { %2863 = vmatprep.subr.bf16.mxu0 %v6242_v20  ;;  %v2926_v20 = vld [vmem:[#allocation9 + $0x100] sm:$0xff]  ;;  %v2975_v2 = vld [vmem:[#allocation9 + $0x288] sm:$0xff] }
 0x31a   :  { %v6299_v37 = vcombine.low %v2926_v20, %v2930_v22 }
 0x31b   :  { %2778 = vmatpush1.bf16.msra.mxu1 %v6239_v26  ;;  %v6293_v26 = vcombine.low %v2919_v15, %v2923_v16 }
 0x31c   :  { %2864 = vmatpush1.bf16.msra.mxu0 %v6241_v27  ;;  %2779 = vmatprep.subr.bf16.mxu1 %v6248_v28  ;;  %v6300_v27 = vcombine.high %v2926_v20, %v2930_v22  ;;  %v6302_v28 = vcombine.high %v2927_v23, %v2931_v24  ;;  %v2986_v20 = vld [vmem:[#allocation9 + $0x2e0] sm:$0xff]  ;;  %v2983_v22 = vld [vmem:[#allocation9 + $0x2c8] sm:$0xff] }
 0x31d   :  { %2865 = vmatprep.subr.bf16.mxu0 %v6250_v29  ;;  %v2934_v29 = vld [vmem:[#allocation9 + $0x140] sm:$0xff] }
 0x31e   :  { %v6307_v47 = vcombine.low %v2934_v29, %v2938_v31 }
 0x31f   :  { %2780 = vmatpush1.bf16.msra.mxu1 %v6247_v41  ;;  %v6301_v41 = vcombine.low %v2927_v23, %v2931_v24  ;;  %v2987_v23 = vld [vmem:[#allocation9 + $0x2e8] sm:$0xff] }
 0x320   :  { %2866 = vmatpush1.bf16.msra.mxu0 %v6249_v38  ;;  %2781 = vmatprep.subr.bf16.mxu1 %v6256_v42  ;;  %v6308_v38 = vcombine.high %v2934_v29, %v2938_v31  ;;  %v6310_v42 = vcombine.high %v2935_v32, %v2939_v33  ;;  %v2994_v29 = vld [vmem:[#allocation9 + $0x320] sm:$0xff]  ;;  %v2991_v31 = vld [vmem:[#allocation9 + $0x308] sm:$0xff] }
 0x321   :  { %2867 = vmatprep.subr.bf16.mxu0 %v6258_v43  ;;  %v2942_v43 = vld [vmem:[#allocation9 + $0x180] sm:$0xff] }
 0x322   :  { %v6315_v56 = vcombine.low %v2942_v43, %v2946_v44 }
 0x323   :  { %2782 = vmatpush1.bf16.msra.mxu1 %v6255_v48  ;;  %v6309_v48 = vcombine.low %v2935_v32, %v2939_v33  ;;  %v2995_v32 = vld [vmem:[#allocation9 + $0x328] sm:$0xff] }
 0x324   :  { %2868 = vmatpush1.bf16.msra.mxu0 %v6257_v49  ;;  %2783 = vmatprep.subr.bf16.mxu1 %v6264_v54  ;;  %v6316_v49 = vcombine.high %v2942_v43, %v2946_v44  ;;  %v6318_v54 = vcombine.high %v2943_v45, %v2947_v46  ;;  %v3002_v43 = vld [vmem:[#allocation9 + $0x360] sm:$0xff]  ;;  %v2999_v44 = vld [vmem:[#allocation9 + $0x348] sm:$0xff] }
 0x325   :  { %2869 = vmatprep.subr.bf16.mxu0 %v6266_v50  ;;  %v2950_v50 = vld [vmem:[#allocation9 + $0x1c0] sm:$0xff] }
 0x326   :  { %v6323_v6 = vcombine.low %v2950_v50, %v2954_v51 }
 0x327   :  { %2784 = vmatpush1.bf16.msra.mxu1 %v6263_v60  ;;  %v6317_v60 = vcombine.low %v2943_v45, %v2947_v46  ;;  %v3003_v45 = vld [vmem:[#allocation9 + $0x368] sm:$0xff] }
 0x328   :  { %2870 = vmatpush1.bf16.msra.mxu0 %v6265_v61  ;;  %4472 = vmatprep.subr.bf16.mxu1 %v6268_v63  ;;  %v6324_v61 = vcombine.high %v2950_v50, %v2954_v51  ;;  %v6326_v63 = vcombine.high %v2951_v52, %v2955_v55  ;;  %v6373_v50 = vcombine.low %v2999_v44, %v3003_v45 }
 0x329   :  { %4558 = vmatprep.subr.bf16.mxu0 %v6270_v0  ;;  %v2958_v0 = vld [vmem:[#allocation9 + $0x200] sm:$0xff] }
 0x32a   :  { %2786 = vmatmul.mubr.bf16.vlgmr.msra.gmra.mrb[4].mxu1 %v7558_v18  ;;  %v6331_v57 = vcombine.low %v2958_v0, %v2962_v3 }
 0x32b   :  { %2872 = vmatmul.mubr.bf16.vlgmr.msra.gmra.mrb[24].mxu0 %v7558_v18  ;;  %4473 = vmatpush1.bf16.msra.mxu1 %v6267_v7  ;;  %v6294_v18 = vcombine.high %v2919_v15, %v2923_v16  ;;  %v6325_v7 = vcombine.low %v2951_v52, %v2955_v55  ;;  %v2979_v15 = vld [vmem:[#allocation9 + $0x2a8] sm:$0xff] }
 0x32c   :  { %4559 = vmatpush1.bf16.msra.mxu0 %v6269_v53  ;;  %4474 = vmatprep.subr.bf16.mxu1 %v6276_v8  ;;  %v6332_v53 = vcombine.high %v2958_v0, %v2962_v3  ;;  %v6334_v8 = vcombine.high %v2959_v4, %v2963_v5 }
 0x32d   :  { %4560 = vmatprep.subr.bf16.mxu0 %v6278_v9  ;;  %v2966_v9 = vld [vmem:[#allocation9 + $0x240] sm:$0xff] }
 0x32e   :  { %v6339_v16 = vcombine.low %v2966_v9, %v2970_v10 }
 0x32f   :  { %4475 = vmatpush1.bf16.msra.mxu1 %v6275_v21  ;;  %v6333_v21 = vcombine.low %v2959_v4, %v2963_v5  ;;  %v3011_v4 = vld [vmem:[#allocation9 + $0x3a8] sm:$0xff] }
 0x330   :  { %4561 = vmatpush1.bf16.msra.mxu0 %v6277_v58  ;;  %4476 = vmatprep.subr.bf16.mxu1 %v6284_v59  ;;  %v6340_v58 = vcombine.high %v2966_v9, %v2970_v10  ;;  %v6342_v59 = vcombine.high %v2967_v11, %v2971_v13  ;;  %v3014_v10 = vld [vmem:[#allocation9 + $0x3c0] sm:$0xff] }
 0x331   :  { %4562 = vmatprep.subr.bf16.mxu0 %v6286_v62  ;;  %v2974_v62 = vld [vmem:[#allocation9 + $0x280] sm:$0xff] }
 0x332   :  { %v6347_v24 = vcombine.low %v2974_v62, %v2978_v1 }
 0x333   :  { %4477 = vmatpush1.bf16.msra.mxu1 %v6283_v17  ;;  %v6341_v17 = vcombine.low %v2967_v11, %v2971_v13  ;;  %v3018_v11 = vld [vmem:[#allocation9 + $0x3e0] sm:$0xff]  ;;  %v3015_v13 = vld [vmem:[#allocation9 + $0x3c8] sm:$0xff] }
 0x334   :  { %4563 = vmatpush1.bf16.msra.mxu0 %v6285_v34  ;;  %4478 = vmatprep.subr.bf16.mxu1 %v6292_v19  ;;  %v6348_v34 = vcombine.high %v2974_v62, %v2978_v1  ;;  %v6350_v19 = vcombine.high %v2975_v2, %v2979_v15  ;;  %v7576_v1 = vld [vmem:[#allocation9 + $0x400] sm:$0xff] }
 0x335   :  { %4564 = vmatprep.subr.bf16.mxu0 %v6294_v18  ;;  %v2982_v18 = vld [vmem:[#allocation9 + $0x2c0] sm:$0xff] }
 0x336   :  { %v6355_v33 = vcombine.low %v2982_v18, %v2986_v20 }
 0x337   :  { %4479 = vmatpush1.bf16.msra.mxu1 %v6291_v25  ;;  %v6349_v25 = vcombine.low %v2975_v2, %v2979_v15  ;;  %v7578_v2 = vld [vmem:[#allocation9 + $0x420] sm:$0xff]  ;;  %v7580_v15 = vld [vmem:[#allocation9 + $0x408] sm:$0xff] }
 0x338   :  { %4565 = vmatpush1.bf16.msra.mxu0 %v6293_v26  ;;  %4480 = vmatprep.subr.bf16.mxu1 %v6300_v27  ;;  %v6356_v26 = vcombine.high %v2982_v18, %v2986_v20  ;;  %v6358_v27 = vcombine.high %v2983_v22, %v2987_v23  ;;  %v1216_v20 = vld [vmem:[%s7708_s6] sm:$0xff] }
 0x339   :  { %4566 = vmatprep.subr.bf16.mxu0 %v6302_v28  ;;  %v2990_v28 = vld [vmem:[#allocation9 + $0x300] sm:$0xff] }
 0x33a   :  { %v6363_v46 = vcombine.low %v2990_v28, %v2994_v29 }
 0x33b   :  { %4481 = vmatpush1.bf16.msra.mxu1 %v6299_v37  ;;  %v6357_v37 = vcombine.low %v2983_v22, %v2987_v23  ;;  %v1244_v22 = vsub.s32 6, %v7485_v30  ;;  %v1248_v23 = vsub.s32 7, %v7485_v30 }
 0x33c   :  { %4567 = vmatpush1.bf16.msra.mxu0 %v6301_v41  ;;  %4482 = vmatprep.subr.bf16.mxu1 %v6308_v38  ;;  %v6364_v41 = vcombine.high %v2990_v28, %v2994_v29  ;;  %v6366_v38 = vcombine.high %v2991_v31, %v2995_v32  ;;  %v1237_v28 = vrot.slane %v1216_v20, %v7504_v12 }
 0x33d   :  { %4568 = vmatprep.subr.bf16.mxu0 %v6310_v42  ;;  %v2998_v42 = vld [vmem:[#allocation9 + $0x340] sm:$0xff]  ;;  %v1245_v29 = vrot.slane %v1216_v20, %v1244_v22 }
 0x33f   :  { %4483 = vmatpush1.bf16.msra.mxu1 %v6307_v47  ;;  %v6365_v47 = vcombine.low %v2991_v31, %v2995_v32  ;;  %v1241_v31 = vrot.slane %v1216_v20, %v7507_v14  ;;  %v1249_v32 = vrot.slane %v1216_v20, %v1248_v23 }
 0x340   :  { %4569 = vmatpush1.bf16.msra.mxu0 %v6309_v48  ;;  %4484 = vmatprep.subr.bf16.mxu1 %v6316_v49  ;;  %v6372_v48 = vcombine.high %v2998_v42, %v3002_v43  ;;  %v6374_v49 = vcombine.high %v2999_v44, %v3003_v45 }
 0x341   :  { %4570 = vmatprep.subr.bf16.mxu0 %v6318_v54  ;;  %v6371_v54 = vcombine.low %v2998_v42, %v3002_v43 }
 0x343   :  { %4485 = vmatpush1.bf16.msra.mxu1 %v6315_v56 }
 0x344   :  { %4571 = vmatpush1.bf16.msra.mxu0 %v6317_v60  ;;  %4486 = vmatprep.subr.bf16.mxu1 %v6324_v61  ;;  %v3006_v60 = vld [vmem:[#allocation9 + $0x380] sm:$0xff] }
 0x345   :  { %4572 = vmatprep.subr.bf16.mxu0 %v6326_v63  ;;  %v3010_v61 = vld [vmem:[#allocation9 + $0x3a0] sm:$0xff]  ;;  %v3007_v63 = vld [vmem:[#allocation9 + $0x388] sm:$0xff] }
 0x346   :  { %v6382_v9 = vcombine.high %v3007_v63, %v3011_v4 }
 0x347   :  { %4487 = vmatpush1.bf16.msra.mxu1 %v6323_v6 }
 0x348   :  { %4573 = vmatpush1.bf16.msra.mxu0 %v6325_v7  ;;  %4488 = vmatprep.subr.bf16.mxu1 %v6332_v53  ;;  %v6379_v7 = vcombine.low %v3006_v60, %v3010_v61  ;;  %v6380_v53 = vcombine.high %v3006_v60, %v3010_v61 }
 0x349   :  { %4574 = vmatprep.subr.bf16.mxu0 %v6334_v8  ;;  %v6381_v8 = vcombine.low %v3007_v63, %v3011_v4 }
 0x34b   :  { %4489 = vmatpush1.bf16.msra.mxu1 %v6331_v57  ;;  %v6388_v57 = vcombine.high %v3014_v10, %v3018_v11 }
 0x34c   :  { %4575 = vmatpush1.bf16.msra.mxu0 %v6333_v21  ;;  %4490 = vmatprep.subr.bf16.mxu1 %v6340_v58  ;;  %v3019_v21 = vld [vmem:[#allocation9 + $0x3e8] sm:$0xff]  ;;  %v6387_v58 = vcombine.low %v3014_v10, %v3018_v11 }
 0x34d   :  { %4576 = vmatprep.subr.bf16.mxu0 %v6342_v59  ;;  %v6389_v59 = vcombine.low %v3015_v13, %v3019_v21  ;;  %v6390_v62 = vcombine.high %v3015_v13, %v3019_v21 }
 0x34f   :  { %4491 = vmatpush1.bf16.msra.mxu1 %v6339_v16  ;;  %v6395_v16 = vcombine.low %v7576_v1, %v7578_v2 }
 0x350   :  { %4577 = vmatpush1.bf16.msra.mxu0 %v6341_v17  ;;  %4492 = vmatprep.subr.bf16.mxu1 %v6348_v34  ;;  %v6396_v17 = vcombine.high %v7576_v1, %v7578_v2  ;;  %v7586_v34 = vld [vmem:[#allocation9 + $0x428] sm:$0xff] }
 0x351   :  { %4578 = vmatprep.subr.bf16.mxu0 %v6350_v19  ;;  %v6397_v19 = vcombine.low %v7580_v15, %v7586_v34  ;;  %v6398_v18 = vcombine.high %v7580_v15, %v7586_v34  ;;  %v3054_v34 = vld [vmem:[#allocation9 + $0x500] sm:$0xff] }
 0x353   :  { %4493 = vmatpush1.bf16.msra.mxu1 %v6347_v24  ;;  %v1221_v24 = vrot.slane %v1216_v20, %v7488_v35 }
 0x354   :  { %4579 = vmatpush1.bf16.msra.mxu0 %v6349_v25  ;;  %4494 = vmatprep.subr.bf16.mxu1 %v6356_v26  ;;  %v1229_v25 = vrot.slane %v1216_v20, %v7491_v36  ;;  %v1225_v26 = vrot.slane %v1216_v20, %v7494_v39 }
 0x355   :  { %4580 = vmatprep.subr.bf16.mxu0 %v6358_v27  ;;  %v1233_v27 = vrot.slane %v1216_v20, %v7497_v40 }
 0x357   :  { %4495 = vmatpush1.bf16.msra.mxu1 %v6355_v33 }
 0x358   :  { %4581 = vmatpush1.bf16.msra.mxu0 %v6357_v37  ;;  %4496 = vmatprep.subr.bf16.mxu1 %v6364_v41 }
 0x359   :  { %4582 = vmatprep.subr.bf16.mxu0 %v6366_v38 }
 0x35b   :  { %4497 = vmatpush1.bf16.msra.mxu1 %v6363_v46 }
 0x35c   :  { %4583 = vmatpush1.bf16.msra.mxu0 %v6365_v47  ;;  %4498 = vmatprep.subr.bf16.mxu1 %v6372_v48 }
 0x35d   :  { %4584 = vmatprep.subr.bf16.mxu0 %v6374_v49 }
 0x35f   :  { %4499 = vmatpush1.bf16.msra.mxu1 %v6371_v54 }
 0x360   :  { %4585 = vmatpush1.bf16.msra.mxu0 %v6373_v50  ;;  %4500 = vmatprep.subr.bf16.mxu1 %v6380_v53 }
 0x361   :  { %4586 = vmatprep.subr.bf16.mxu0 %v6382_v9 }
 0x363   :  { %4501 = vmatpush1.bf16.msra.mxu1 %v6379_v7 }
 0x364   :  { %4587 = vmatpush1.bf16.msra.mxu0 %v6381_v8  ;;  %4502 = vmatprep.subr.bf16.mxu1 %v6388_v57  ;;  %v3030_v57 = vld [vmem:[#allocation9 + $0x440] sm:$0xff] }
 0x365   :  { %4588 = vmatprep.subr.bf16.mxu0 %v6390_v62  ;;  %v3035_v62 = vld [vmem:[#allocation9 + $0x468] sm:$0xff] }
 0x367   :  { %4503 = vmatpush1.bf16.msra.mxu1 %v6387_v58  ;;  %v3034_v58 = vld [vmem:[#allocation9 + $0x460] sm:$0xff] }
 0x368   :  { %4589 = vmatpush1.bf16.msra.mxu0 %v6389_v59  ;;  %4515 = vmatprep.subr.bf16.mxu1 %v6396_v17  ;;  %v3031_v59 = vld [vmem:[#allocation9 + $0x448] sm:$0xff] }
 0x369   :  { %4601 = vmatprep.subr.bf16.mxu0 %v6398_v18 }
 0x37d   :  { %v2615_v51 = vpop.f32.mrb[0].mxu1  ;;  %v2701_v52 = vpop.f32.mrb[20].mxu0 }
 0x37e   :  { %v2617_v55 = vpop.f32.mrb[1].mxu1  ;;  %v2703_v56 = vpop.f32.mrb[21].mxu0  ;;  %v6689_v33 = vadd.f32 %v2615_v51, %v1221_v24  ;;  %v6693_v41 = vadd.f32 %v2701_v52, %v1229_v25 }
 0x37f   :  { %v2619_v0 = vpop.f32.mrb[2].mxu1  ;;  %v2705_v3 = vpop.f32.mrb[22].mxu0  ;;  %v6690_v38 = vadd.f32 %v2617_v55, %v1225_v26  ;;  %v6694_v42 = vadd.f32 %v2703_v56, %v1233_v27 }
 0x380   :  { %v2621_v5 = vpop.f32.mrb[3].mxu1  ;;  %v7574_v6 = vpop.f32.mrb[23].mxu0  ;;  %v6691_v46 = vadd.f32 %v2619_v0, %v1221_v24  ;;  %v6695_v47 = vadd.f32 %v2705_v3, %v1229_v25  ;;  %v3038_v24 = vld [vmem:[#allocation9 + $0x480] sm:$0xff]  ;;  %v6406_v25 = vcombine.high %v3031_v59, %v3035_v62 }
 0x381   :  { %v6692_v60 = vadd.f32 %v2621_v5, %v1225_v26  ;;  %v6696_v9 = vadd.f32 %v7574_v6, %v1233_v27  ;;  %v6404_v6 = vcombine.high %v3030_v57, %v3034_v58  ;;  %v3042_v26 = vld [vmem:[#allocation9 + $0x4a0] sm:$0xff]  ;;  %v3039_v27 = vld [vmem:[#allocation9 + $0x488] sm:$0xff] }
 0x382   :  { %v6411_v1 = vcombine.low %v3038_v24, %v3042_v26 }
 0x3fd   :  { %v2787_v37 = vpop.f32.mrb[4].mxu1 }
 0x3fe   :  { %v6697_v43 = vadd.f32 %v2787_v37, %v1237_v28  ;;  %v2873_v44 = vpop.f32.mrb[24].mxu0  ;;  %v2789_v45 = vpop.f32.mrb[5].mxu1  ;;  %v3046_v37 = vld [vmem:[#allocation9 + $0x4c0] sm:$0xff] }
 0x3ff   :  { %v6701_v48 = vadd.f32 %v2873_v44, %v1245_v29  ;;  %v6698_v49 = vadd.f32 %v2789_v45, %v1241_v31  ;;  %v2875_v54 = vpop.f32.mrb[25].mxu0  ;;  %v2791_v50 = vpop.f32.mrb[6].mxu1  ;;  %v3059_v44 = vld [vmem:[#allocation9 + $0x528] sm:$0xff] }
 0x400   :  { %v2882_v61 = vmax.f32 %v6689_v33, %v6697_v43  ;;  %v6702_v63 = vadd.f32 %v2875_v54, %v1249_v32  ;;  %v6699_v4 = vadd.f32 %v2791_v50, %v1237_v28  ;;  %v2877_v7 = vpop.f32.mrb[26].mxu0  ;;  %v2793_v53 = vpop.f32.mrb[7].mxu1  ;;  %v3043_v28 = vld [vmem:[#allocation9 + $0x4a8] sm:$0xff]  ;;  %v3066_v54 = vld [vmem:[#allocation9 + $0x560] sm:$0xff] }
 0x401   :  { %v2884_v51 = vmax.f32 %v6693_v41, %v6701_v48  ;;  %v2883_v8 = vmax.f32 %v6690_v38, %v6698_v49  ;;  %v6703_v52 = vadd.f32 %v2877_v7, %v1245_v29  ;;  %v6700_v55 = vadd.f32 %v2793_v53, %v1241_v31  ;;  %v2879_v56 = vpop.f32.mrb[27].mxu0  ;;  %v3050_v41 = vld [vmem:[#allocation9 + $0x4e0] sm:$0xff]  ;;  %v3047_v38 = vld [vmem:[#allocation9 + $0x4c8] sm:$0xff] }
 0x402   :  { %v2885_v10 = vmax.f32 %v6694_v42, %v6702_v63  ;;  %v2886_v0 = vmax.f32 %v6691_v46, %v6699_v4  ;;  %v6704_v3 = vadd.f32 %v2879_v56, %v1249_v32  ;;  %v6403_v29 = vcombine.low %v3030_v57, %v3034_v58  ;;  %v3051_v42 = vld [vmem:[#allocation9 + $0x4e8] sm:$0xff]  ;;  %v3062_v49 = vld [vmem:[#allocation9 + $0x540] sm:$0xff] }
 0x403   :  { %v2888_v11 = vmax.f32 %v6695_v47, %v6703_v52  ;;  %v2887_v13 = vmax.f32 %v6692_v60, %v6700_v55  ;;  %v6405_v31 = vcombine.low %v3031_v59, %v3035_v62  ;;  %v6412_v32 = vcombine.high %v3038_v24, %v3042_v26  ;;  %v3055_v43 = vld [vmem:[#allocation9 + $0x508] sm:$0xff]  ;;  %v3070_v53 = vld [vmem:[#allocation9 + $0x580] sm:$0xff] }
 0x404   :  { %v7608_v21 = vpack.c.bf16 %v2886_v0, %v2882_v61  ;;  %v2889_v5 = vmax.f32 %v6696_v9, %v6704_v3  ;;  %v6414_v33 = vcombine.high %v3039_v27, %v3043_v28  ;;  %v6413_v2 = vcombine.low %v3039_v27, %v3043_v28  ;;  %v3063_v50 = vld [vmem:[#allocation9 + $0x548] sm:$0xff]  ;;  %v3078_v0 = vld [vmem:[#allocation9 + $0x5c0] sm:$0xff] }
 0x405   :  { %v7610_v17 = vpack.c.bf16 %v2888_v11, %v2884_v51  ;;  %v7612_v18 = vpack.c.bf16 %v2887_v13, %v2883_v8  ;;  %v6420_v15 = vcombine.high %v3046_v37, %v3050_v41  ;;  %v6419_v45 = vcombine.low %v3046_v37, %v3050_v41  ;;  %v3067_v60 = vld [vmem:[#allocation9 + $0x568] sm:$0xff]  ;;  %v3074_v51 = vld [vmem:[#allocation9 + $0x5a0] sm:$0xff] }
 0x406   :  { %v7614_v20 = vpack.c.bf16 %v2889_v5, %v2885_v10  ;;  %v6421_v46 = vcombine.low %v3047_v38, %v3051_v42  ;;  %v6430_v48 = vcombine.high %v3055_v43, %v3059_v44  ;;  %v6429_v63 = vcombine.low %v3055_v43, %v3059_v44  ;;  %v3071_v8 = vld [vmem:[#allocation9 + $0x588] sm:$0xff]  ;;  %v3082_v3 = vld [vmem:[#allocation9 + $0x5e0] sm:$0xff] }
 0x407   :  { %4504 = vmatprep.mubr.bf16.mxu1 %v7612_v18  ;;  %4590 = vmatprep.mubr.bf16.mxu0 %v7612_v18  ;;  %v6436_v4 = vcombine.high %v3062_v49, %v3066_v54  ;;  %v6438_v7 = vcombine.high %v3063_v50, %v3067_v60  ;;  %v3075_v52 = vld [vmem:[#allocation9 + $0x5a8] sm:$0xff]  ;;  %v6435_v55 = vcombine.low %v3062_v49, %v3066_v54  ;;  %v3086_v62 = vld [vmem:[#allocation9 + $0x600] sm:$0xff] }
 0x408   :  { %4505 = vmatmul.mubr.bf16.vlgmr.msra.gmra.mrb[8].mxu1 %v7608_v21  ;;  %4591 = vmatmul.mubr.bf16.vlgmr.msra.gmra.mrb[28].mxu0 %v7608_v21  ;;  %v6437_v56 = vcombine.low %v3063_v50, %v3067_v60  ;;  %v6444_v9 = vcombine.high %v3070_v53, %v3074_v51  ;;  %v6446_v10 = vcombine.high %v3071_v8, %v3075_v52  ;;  %v3079_v11 = vld [vmem:[#allocation9 + $0x5c8] sm:$0xff]  ;;  %v3090_v24 = vld [vmem:[#allocation9 + $0x620] sm:$0xff] }
 0x409   :  { %4516 = vmatpush1.bf16.msra.mxu1 %v6395_v16  ;;  %4602 = vmatpush1.bf16.msra.mxu0 %v6397_v19  ;;  %v6422_v16 = vcombine.high %v3047_v38, %v3051_v42  ;;  %v3058_v19 = vld [vmem:[#allocation9 + $0x520] sm:$0xff]  ;;  %v3083_v13 = vld [vmem:[#allocation9 + $0x5e8] sm:$0xff]  ;;  %v6443_v57 = vcombine.low %v3070_v53, %v3074_v51  ;;  %v6445_v5 = vcombine.low %v3071_v8, %v3075_v52 }
 0x40a   :  { %4547 = vmatprep.mubr.bf16.mxu1 %v7614_v20  ;;  %4633 = vmatprep.mubr.bf16.mxu0 %v7614_v20  ;;  %v6428_v47 = vcombine.high %v3054_v34, %v3058_v19  ;;  %v6427_v61 = vcombine.low %v3054_v34, %v3058_v19  ;;  %v6452_v58 = vcombine.high %v3078_v0, %v3082_v3  ;;  %v3099_v37 = vld [vmem:[#allocation9 + $0x668] sm:$0xff] }
 0x40b   :  { %4517 = vmatprep.subr.bf16.mxu1 %v6404_v6  ;;  %4603 = vmatprep.subr.bf16.mxu0 %v6406_v25  ;;  %v6454_v59 = vcombine.high %v3079_v11, %v3083_v13  ;;  %v3087_v6 = vld [vmem:[#allocation9 + $0x608] sm:$0xff]  ;;  %v6451_v26 = vcombine.low %v3078_v0, %v3082_v3  ;;  %v6453_v27 = vcombine.low %v3079_v11, %v3083_v13 }
 0x40c   :  { %v3091_v25 = vld [vmem:[#allocation9 + $0x628] sm:$0xff]  ;;  %v6460_v28 = vcombine.high %v3086_v62, %v3090_v24  ;;  %v6459_v41 = vcombine.low %v3086_v62, %v3090_v24 }
 0x40d   :  { %4518 = vmatpush1.bf16.msra.mxu1 %v6403_v29  ;;  %4604 = vmatpush1.bf16.msra.mxu0 %v6405_v31  ;;  %v6462_v29 = vcombine.high %v3087_v6, %v3091_v25  ;;  %v3094_v31 = vld [vmem:[#allocation9 + $0x640] sm:$0xff]  ;;  %v6461_v38 = vcombine.low %v3087_v6, %v3091_v25  ;;  %v3107_v34 = vld [vmem:[#allocation9 + $0x6a8] sm:$0xff] }
 0x40e   :  { %4519 = vmatprep.subr.bf16.mxu1 %v6412_v32  ;;  %4605 = vmatprep.subr.bf16.mxu0 %v6414_v33  ;;  %v3098_v32 = vld [vmem:[#allocation9 + $0x660] sm:$0xff]  ;;  %v3095_v33 = vld [vmem:[#allocation9 + $0x648] sm:$0xff] }
 0x40f   :  { %v6468_v42 = vcombine.high %v3094_v31, %v3098_v32  ;;  %v6467_v19 = vcombine.low %v3094_v31, %v3098_v32  ;;  %v6469_v43 = vcombine.low %v3095_v33, %v3099_v37  ;;  %v3115_v49 = vld [vmem:[#allocation9 + $0x6e8] sm:$0xff] }
 0x410   :  { %v3123_v53 = vld [vmem:[#allocation9 + $0x728] sm:$0xff] }
 0x411   :  { %4520 = vmatpush1.bf16.msra.mxu1 %v6411_v1  ;;  %4606 = vmatpush1.bf16.msra.mxu0 %v6413_v2  ;;  %v6470_v1 = vcombine.high %v3095_v33, %v3099_v37  ;;  %v3102_v2 = vld [vmem:[#allocation9 + $0x680] sm:$0xff]  ;;  %v3131_v0 = vld [vmem:[#allocation9 + $0x768] sm:$0xff] }
 0x412   :  { %4521 = vmatprep.subr.bf16.mxu1 %v6420_v15  ;;  %4607 = vmatprep.subr.bf16.mxu0 %v6422_v16  ;;  %v3106_v15 = vld [vmem:[#allocation9 + $0x6a0] sm:$0xff]  ;;  %v3103_v16 = vld [vmem:[#allocation9 + $0x688] sm:$0xff] }
 0x413   :  { %v6476_v44 = vcombine.high %v3102_v2, %v3106_v15  ;;  %v6475_v54 = vcombine.low %v3102_v2, %v3106_v15  ;;  %v6477_v50 = vcombine.low %v3103_v16, %v3107_v34  ;;  %v3139_v62 = vld [vmem:[#allocation9 + $0x7a8] sm:$0xff]  ;;  %v2901_v2 = vld [vmem:[#allocation9 + $0x38] sm:$0xff] }
 0x414   :  { %v3147_v31 = vld [vmem:[#allocation9 + $0x7e8] sm:$0xff] }
 0x415   :  { %4522 = vmatpush1.bf16.msra.mxu1 %v6419_v45  ;;  %4608 = vmatpush1.bf16.msra.mxu0 %v6421_v46  ;;  %v6478_v45 = vcombine.high %v3103_v16, %v3107_v34  ;;  %v3110_v46 = vld [vmem:[#allocation9 + $0x6c0] sm:$0xff] }
 0x416   :  { %4523 = vmatprep.subr.bf16.mxu1 %v6428_v47  ;;  %4609 = vmatprep.subr.bf16.mxu0 %v6430_v48  ;;  %v3114_v47 = vld [vmem:[#allocation9 + $0x6e0] sm:$0xff]  ;;  %v3111_v48 = vld [vmem:[#allocation9 + $0x6c8] sm:$0xff] }
 0x417   :  { %v6484_v60 = vcombine.high %v3110_v46, %v3114_v47  ;;  %v6483_v51 = vcombine.low %v3110_v46, %v3114_v47  ;;  %v6485_v8 = vcombine.low %v3111_v48, %v3115_v49  ;;  %v2909_v46 = vld [vmem:[#allocation9 + $0x78] sm:$0xff] }
 0x419   :  { %4524 = vmatpush1.bf16.msra.mxu1 %v6427_v61  ;;  %4610 = vmatpush1.bf16.msra.mxu0 %v6429_v63  ;;  %v6486_v61 = vcombine.high %v3111_v48, %v3115_v49  ;;  %v3118_v63 = vld [vmem:[#allocation9 + $0x700] sm:$0xff] }
 0x41a   :  { %4525 = vmatprep.subr.bf16.mxu1 %v6436_v4  ;;  %4611 = vmatprep.subr.bf16.mxu0 %v6438_v7  ;;  %v3122_v4 = vld [vmem:[#allocation9 + $0x720] sm:$0xff]  ;;  %v3119_v7 = vld [vmem:[#allocation9 + $0x708] sm:$0xff] }
 0x41b   :  { %v6492_v52 = vcombine.high %v3118_v63, %v3122_v4  ;;  %v6491_v3 = vcombine.low %v3118_v63, %v3122_v4  ;;  %v6493_v11 = vcombine.low %v3119_v7, %v3123_v53  ;;  %v2917_v63 = vld [vmem:[#allocation9 + $0xb8] sm:$0xff] }
 0x41d   :  { %4526 = vmatpush1.bf16.msra.mxu1 %v6435_v55  ;;  %4612 = vmatpush1.bf16.msra.mxu0 %v6437_v56  ;;  %v6494_v55 = vcombine.high %v3119_v7, %v3123_v53  ;;  %v3126_v56 = vld [vmem:[#allocation9 + $0x740] sm:$0xff] }
 0x41e   :  { %4527 = vmatprep.subr.bf16.mxu1 %v6444_v9  ;;  %4613 = vmatprep.subr.bf16.mxu0 %v6446_v10  ;;  %v3130_v9 = vld [vmem:[#allocation9 + $0x760] sm:$0xff]  ;;  %v3127_v10 = vld [vmem:[#allocation9 + $0x748] sm:$0xff] }
 0x41f   :  { %v6500_v13 = vcombine.high %v3126_v56, %v3130_v9  ;;  %v6499_v24 = vcombine.low %v3126_v56, %v3130_v9  ;;  %v6501_v6 = vcombine.low %v3127_v10, %v3131_v0  ;;  %v2925_v56 = vld [vmem:[#allocation9 + $0xf8] sm:$0xff] }
 0x421   :  { %4528 = vmatpush1.bf16.msra.mxu1 %v6443_v57  ;;  %4614 = vmatpush1.bf16.msra.mxu0 %v6445_v5  ;;  %v6502_v57 = vcombine.high %v3127_v10, %v3131_v0  ;;  %v3134_v5 = vld [vmem:[#allocation9 + $0x780] sm:$0xff] }
 0x422   :  { %4529 = vmatprep.subr.bf16.mxu1 %v6452_v58  ;;  %4615 = vmatprep.subr.bf16.mxu0 %v6454_v59  ;;  %v3138_v58 = vld [vmem:[#allocation9 + $0x7a0] sm:$0xff]  ;;  %v3135_v59 = vld [vmem:[#allocation9 + $0x788] sm:$0xff] }
 0x423   :  { %v6508_v25 = vcombine.high %v3134_v5, %v3138_v58  ;;  %v6507_v32 = vcombine.low %v3134_v5, %v3138_v58  ;;  %v6509_v33 = vcombine.low %v3135_v59, %v3139_v62 }
 0x425   :  { %4530 = vmatpush1.bf16.msra.mxu1 %v6451_v26  ;;  %4616 = vmatpush1.bf16.msra.mxu0 %v6453_v27  ;;  %v6510_v26 = vcombine.high %v3135_v59, %v3139_v62  ;;  %v3142_v27 = vld [vmem:[#allocation9 + $0x7c0] sm:$0xff] }
 0x426   :  { %4531 = vmatprep.subr.bf16.mxu1 %v6460_v28  ;;  %4617 = vmatprep.subr.bf16.mxu0 %v6462_v29  ;;  %v3146_v28 = vld [vmem:[#allocation9 + $0x7e0] sm:$0xff]  ;;  %v3143_v29 = vld [vmem:[#allocation9 + $0x7c8] sm:$0xff] }
 0x427   :  { %v6516_v37 = vcombine.high %v3142_v27, %v3146_v28  ;;  %v6515_v15 = vcombine.low %v3142_v27, %v3146_v28  ;;  %v6517_v16 = vcombine.low %v3143_v29, %v3147_v31 }
 0x429   :  { %4532 = vmatpush1.bf16.msra.mxu1 %v6459_v41  ;;  %4618 = vmatpush1.bf16.msra.mxu0 %v6461_v38  ;;  %v6518_v41 = vcombine.high %v3143_v29, %v3147_v31  ;;  %v2896_v38 = vld [vmem:[#allocation9 + $0x10] sm:$0xff] }
 0x42a   :  { %4533 = vmatprep.subr.bf16.mxu1 %v6468_v42  ;;  %4619 = vmatprep.subr.bf16.mxu0 %v6470_v1  ;;  %v2900_v42 = vld [vmem:[#allocation9 + $0x30] sm:$0xff]  ;;  %v2897_v1 = vld [vmem:[#allocation9 + $0x18] sm:$0xff] }
 0x42b   :  { %v6272_v34 = vcombine.high %v2896_v38, %v2900_v42  ;;  %v6271_v47 = vcombine.low %v2896_v38, %v2900_v42  ;;  %v6273_v48 = vcombine.low %v2897_v1, %v2901_v2 }
 0x42d   :  { %4534 = vmatpush1.bf16.msra.mxu1 %v6467_v19  ;;  %4620 = vmatpush1.bf16.msra.mxu0 %v6469_v43  ;;  %v6274_v19 = vcombine.high %v2897_v1, %v2901_v2  ;;  %v2904_v43 = vld [vmem:[#allocation9 + $0x50] sm:$0xff] }
 0x42e   :  { %4535 = vmatprep.subr.bf16.mxu1 %v6476_v44  ;;  %4621 = vmatprep.subr.bf16.mxu0 %v6478_v45  ;;  %v2908_v44 = vld [vmem:[#allocation9 + $0x70] sm:$0xff]  ;;  %v2905_v45 = vld [vmem:[#allocation9 + $0x58] sm:$0xff] }
 0x42f   :  { %v6280_v49 = vcombine.high %v2904_v43, %v2908_v44  ;;  %v6279_v4 = vcombine.low %v2904_v43, %v2908_v44  ;;  %v6281_v7 = vcombine.low %v2905_v45, %v2909_v46 }
 0x431   :  { %4536 = vmatpush1.bf16.msra.mxu1 %v6475_v54  ;;  %4622 = vmatpush1.bf16.msra.mxu0 %v6477_v50  ;;  %v6282_v54 = vcombine.high %v2905_v45, %v2909_v46  ;;  %v2912_v50 = vld [vmem:[#allocation9 + $0x90] sm:$0xff] }
 0x432   :  { %4537 = vmatprep.subr.bf16.mxu1 %v6484_v60  ;;  %4623 = vmatprep.subr.bf16.mxu0 %v6486_v61  ;;  %v2916_v60 = vld [vmem:[#allocation9 + $0xb0] sm:$0xff]  ;;  %v2913_v61 = vld [vmem:[#allocation9 + $0x98] sm:$0xff] }
 0x433   :  { %v6288_v53 = vcombine.high %v2912_v50, %v2916_v60  ;;  %v6287_v9 = vcombine.low %v2912_v50, %v2916_v60  ;;  %v6289_v10 = vcombine.low %v2913_v61, %v2917_v63 }
 0x435   :  { %4538 = vmatpush1.bf16.msra.mxu1 %v6483_v51  ;;  %4624 = vmatpush1.bf16.msra.mxu0 %v6485_v8  ;;  %v6290_v51 = vcombine.high %v2913_v61, %v2917_v63  ;;  %v2920_v8 = vld [vmem:[#allocation9 + $0xd0] sm:$0xff] }
 0x436   :  { %4539 = vmatprep.subr.bf16.mxu1 %v6492_v52  ;;  %4625 = vmatprep.subr.bf16.mxu0 %v6494_v55  ;;  %v2924_v52 = vld [vmem:[#allocation9 + $0xf0] sm:$0xff]  ;;  %v2921_v55 = vld [vmem:[#allocation9 + $0xd8] sm:$0xff] }
 0x437   :  { %v6296_v0 = vcombine.high %v2920_v8, %v2924_v52  ;;  %v6295_v5 = vcombine.low %v2920_v8, %v2924_v52  ;;  %v6297_v58 = vcombine.low %v2921_v55, %v2925_v56 }
 0x439   :  { %4540 = vmatpush1.bf16.msra.mxu1 %v6491_v3  ;;  %4626 = vmatpush1.bf16.msra.mxu0 %v6493_v11  ;;  %v6298_v3 = vcombine.high %v2921_v55, %v2925_v56  ;;  %v2928_v11 = vld [vmem:[#allocation9 + $0x110] sm:$0xff] }
 0x43a   :  { %4541 = vmatprep.subr.bf16.mxu1 %v6500_v13  ;;  %4627 = vmatprep.subr.bf16.mxu0 %v6502_v57  ;;  %v2932_v13 = vld [vmem:[#allocation9 + $0x130] sm:$0xff]  ;;  %v2933_v57 = vld [vmem:[#allocation9 + $0x138] sm:$0xff] }
 0x43b   :  { %v6304_v59 = vcombine.high %v2928_v11, %v2932_v13  ;;  %v6303_v27 = vcombine.low %v2928_v11, %v2932_v13 }
 0x43d   :  { %4542 = vmatpush1.bf16.msra.mxu1 %v6499_v24  ;;  %4628 = vmatpush1.bf16.msra.mxu0 %v6501_v6  ;;  %v2936_v24 = vld [vmem:[#allocation9 + $0x150] sm:$0xff] }
 0x43e   :  { %4543 = vmatprep.subr.bf16.mxu1 %v6508_v25  ;;  %4629 = vmatprep.subr.bf16.mxu0 %v6510_v26  ;;  %v2940_v6 = vld [vmem:[#allocation9 + $0x170] sm:$0xff]  ;;  %v2937_v25 = vld [vmem:[#allocation9 + $0x158] sm:$0xff] }
 0x43f   :  { %v2941_v26 = vld [vmem:[#allocation9 + $0x178] sm:$0xff]  ;;  %v6312_v29 = vcombine.high %v2936_v24, %v2940_v6  ;;  %v6311_v38 = vcombine.low %v2936_v24, %v2940_v6 }
 0x440   :  { %v6314_v31 = vcombine.high %v2937_v25, %v2941_v26  ;;  %v6313_v42 = vcombine.low %v2937_v25, %v2941_v26 }
 0x441   :  { %4544 = vmatpush1.bf16.msra.mxu1 %v6507_v32  ;;  %4630 = vmatpush1.bf16.msra.mxu0 %v6509_v33  ;;  %v2944_v32 = vld [vmem:[#allocation9 + $0x190] sm:$0xff] }
 0x442   :  { %4545 = vmatprep.subr.bf16.mxu1 %v6516_v37  ;;  %4631 = vmatprep.subr.bf16.mxu0 %v6518_v41  ;;  %v2948_v33 = vld [vmem:[#allocation9 + $0x1b0] sm:$0xff]  ;;  %v2945_v37 = vld [vmem:[#allocation9 + $0x198] sm:$0xff] }
 0x443   :  { %v2949_v41 = vld [vmem:[#allocation9 + $0x1b8] sm:$0xff]  ;;  %v6320_v1 = vcombine.high %v2944_v32, %v2948_v33  ;;  %v6319_v43 = vcombine.low %v2944_v32, %v2948_v33 }
 0x444   :  { %v6322_v2 = vcombine.high %v2945_v37, %v2949_v41  ;;  %v6321_v44 = vcombine.low %v2945_v37, %v2949_v41 }
 0x445   :  { %4546 = vmatpush1.bf16.msra.mxu1 %v6515_v15  ;;  %4632 = vmatpush1.bf16.msra.mxu0 %v6517_v16  ;;  %v2952_v15 = vld [vmem:[#allocation9 + $0x1d0] sm:$0xff] }
 0x446   :  { %4644 = vmatprep.subr.bf16.mxu1 %v6272_v34  ;;  %4730 = vmatprep.subr.bf16.mxu0 %v6274_v19  ;;  %v2956_v16 = vld [vmem:[#allocation9 + $0x1f0] sm:$0xff]  ;;  %v2953_v34 = vld [vmem:[#allocation9 + $0x1d8] sm:$0xff] }
 0x447   :  { %v2957_v19 = vld [vmem:[#allocation9 + $0x1f8] sm:$0xff]  ;;  %v6328_v45 = vcombine.high %v2952_v15, %v2956_v16  ;;  %v6327_v50 = vcombine.low %v2952_v15, %v2956_v16 }
 0x448   :  { %4548 = vmatmul.mubr.bf16.vlgmr.msra.gmra.mrb[8].mxu1 %v7610_v17  ;;  %4634 = vmatmul.mubr.bf16.vlgmr.msra.gmra.mrb[28].mxu0 %v7610_v17  ;;  %v6330_v46 = vcombine.high %v2953_v34, %v2957_v19  ;;  %v6329_v60 = vcombine.low %v2953_v34, %v2957_v19 }
 0x449   :  { %4645 = vmatpush1.bf16.msra.mxu1 %v6271_v47  ;;  %4676 = vmatprep.mubr.bf16.mxu1 %v7612_v18  ;;  %v2960_v47 = vld [vmem:[#allocation9 + $0x210] sm:$0xff] }
 0x44a   :  { %4731 = vmatpush1.bf16.msra.mxu0 %v6273_v48  ;;  %4762 = vmatprep.mubr.bf16.mxu0 %v7612_v18  ;;  %v2929_v18 = vld [vmem:[#allocation9 + $0x118] sm:$0xff]  ;;  %v2964_v48 = vld [vmem:[#allocation9 + $0x230] sm:$0xff] }
 0x44b   :  { %4646 = vmatprep.subr.bf16.mxu1 %v6280_v49  ;;  %4732 = vmatprep.subr.bf16.mxu0 %v6282_v54  ;;  %v6306_v62 = vcombine.high %v2929_v18, %v2933_v57  ;;  %v6305_v28 = vcombine.low %v2929_v18, %v2933_v57  ;;  %v2961_v49 = vld [vmem:[#allocation9 + $0x218] sm:$0xff]  ;;  %v6336_v61 = vcombine.high %v2960_v47, %v2964_v48 }
 0x44c   :  { %v2965_v54 = vld [vmem:[#allocation9 + $0x238] sm:$0xff]  ;;  %v6335_v8 = vcombine.low %v2960_v47, %v2964_v48 }
 0x44d   :  { %4647 = vmatpush1.bf16.msra.mxu1 %v6279_v4  ;;  %v6338_v63 = vcombine.high %v2961_v49, %v2965_v54  ;;  %v2968_v4 = vld [vmem:[#allocation9 + $0x250] sm:$0xff]  ;;  %v6337_v52 = vcombine.low %v2961_v49, %v2965_v54 }
 0x44e   :  { %4733 = vmatpush1.bf16.msra.mxu0 %v6281_v7  ;;  %4648 = vmatprep.subr.bf16.mxu1 %v6288_v53  ;;  %v2972_v7 = vld [vmem:[#allocation9 + $0x270] sm:$0xff]  ;;  %v2969_v53 = vld [vmem:[#allocation9 + $0x258] sm:$0xff] }
 0x44f   :  { %4734 = vmatprep.subr.bf16.mxu0 %v6290_v51  ;;  %v2973_v51 = vld [vmem:[#allocation9 + $0x278] sm:$0xff]  ;;  %v6344_v55 = vcombine.high %v2968_v4, %v2972_v7  ;;  %v6343_v11 = vcombine.low %v2968_v4, %v2972_v7 }
 0x450   :  { %v6346_v56 = vcombine.high %v2969_v53, %v2973_v51  ;;  %v6345_v13 = vcombine.low %v2969_v53, %v2973_v51 }
 0x451   :  { %4649 = vmatpush1.bf16.msra.mxu1 %v6287_v9  ;;  %v2976_v9 = vld [vmem:[#allocation9 + $0x290] sm:$0xff] }
 0x452   :  { %4735 = vmatpush1.bf16.msra.mxu0 %v6289_v10  ;;  %4650 = vmatprep.subr.bf16.mxu1 %v6296_v0  ;;  %v2980_v10 = vld [vmem:[#allocation9 + $0x2b0] sm:$0xff]  ;;  %v2977_v0 = vld [vmem:[#allocation9 + $0x298] sm:$0xff] }
 0x453   :  { %4736 = vmatprep.subr.bf16.mxu0 %v6298_v3  ;;  %v2981_v3 = vld [vmem:[#allocation9 + $0x2b8] sm:$0xff]  ;;  %v6352_v18 = vcombine.high %v2976_v9, %v2980_v10  ;;  %v6351_v24 = vcombine.low %v2976_v9, %v2980_v10 }
 0x454   :  { %v6354_v57 = vcombine.high %v2977_v0, %v2981_v3  ;;  %v6353_v6 = vcombine.low %v2977_v0, %v2981_v3 }
 0x455   :  { %4651 = vmatpush1.bf16.msra.mxu1 %v6295_v5  ;;  %v2984_v5 = vld [vmem:[#allocation9 + $0x2d0] sm:$0xff] }
 0x456   :  { %4737 = vmatpush1.bf16.msra.mxu0 %v6297_v58  ;;  %4652 = vmatprep.subr.bf16.mxu1 %v6304_v59  ;;  %v2988_v58 = vld [vmem:[#allocation9 + $0x2f0] sm:$0xff]  ;;  %v2985_v59 = vld [vmem:[#allocation9 + $0x2d8] sm:$0xff] }
 0x457   :  { %4738 = vmatprep.subr.bf16.mxu0 %v6306_v62  ;;  %v2989_v62 = vld [vmem:[#allocation9 + $0x2f8] sm:$0xff]  ;;  %v6360_v25 = vcombine.high %v2984_v5, %v2988_v58  ;;  %v6359_v32 = vcombine.low %v2984_v5, %v2988_v58 }
 0x458   :  { %v6362_v26 = vcombine.high %v2985_v59, %v2989_v62  ;;  %v6361_v33 = vcombine.low %v2985_v59, %v2989_v62  ;;  %v3037_v5 = vld [vmem:[#allocation9 + $0x478] sm:$0xff]  ;;  %v3040_v62 = vld [vmem:[#allocation9 + $0x490] sm:$0xff] }
 0x459   :  { %4653 = vmatpush1.bf16.msra.mxu1 %v6303_v27  ;;  %v2992_v27 = vld [vmem:[#allocation9 + $0x310] sm:$0xff] }
 0x45a   :  { %4739 = vmatpush1.bf16.msra.mxu0 %v6305_v28  ;;  %4654 = vmatprep.subr.bf16.mxu1 %v6312_v29  ;;  %v2996_v28 = vld [vmem:[#allocation9 + $0x330] sm:$0xff]  ;;  %v2993_v29 = vld [vmem:[#allocation9 + $0x318] sm:$0xff] }
 0x45b   :  { %4740 = vmatprep.subr.bf16.mxu0 %v6314_v31  ;;  %v2997_v31 = vld [vmem:[#allocation9 + $0x338] sm:$0xff]  ;;  %v6368_v37 = vcombine.high %v2992_v27, %v2996_v28  ;;  %v6367_v15 = vcombine.low %v2992_v27, %v2996_v28 }
 0x45c   :  { %v6370_v41 = vcombine.high %v2993_v29, %v2997_v31  ;;  %v6369_v16 = vcombine.low %v2993_v29, %v2997_v31 }
 0x45d   :  { %4655 = vmatpush1.bf16.msra.mxu1 %v6311_v38  ;;  %v3000_v38 = vld [vmem:[#allocation9 + $0x350] sm:$0xff] }
 0x45e   :  { %4741 = vmatpush1.bf16.msra.mxu0 %v6313_v42  ;;  %4656 = vmatprep.subr.bf16.mxu1 %v6320_v1  ;;  %v3004_v42 = vld [vmem:[#allocation9 + $0x370] sm:$0xff]  ;;  %v3001_v1 = vld [vmem:[#allocation9 + $0x358] sm:$0xff] }
 0x45f   :  { %4742 = vmatprep.subr.bf16.mxu0 %v6322_v2  ;;  %v3005_v2 = vld [vmem:[#allocation9 + $0x378] sm:$0xff]  ;;  %v6376_v34 = vcombine.high %v3000_v38, %v3004_v42  ;;  %v6375_v47 = vcombine.low %v3000_v38, %v3004_v42 }
 0x460   :  { %v6378_v19 = vcombine.high %v3001_v1, %v3005_v2  ;;  %v6377_v48 = vcombine.low %v3001_v1, %v3005_v2  ;;  %v3056_v2 = vld [vmem:[#allocation9 + $0x510] sm:$0xff] }
 0x461   :  { %4657 = vmatpush1.bf16.msra.mxu1 %v6319_v43  ;;  %v3008_v43 = vld [vmem:[#allocation9 + $0x390] sm:$0xff] }
 0x462   :  { %4743 = vmatpush1.bf16.msra.mxu0 %v6321_v44  ;;  %4658 = vmatprep.subr.bf16.mxu1 %v6328_v45  ;;  %v3012_v44 = vld [vmem:[#allocation9 + $0x3b0] sm:$0xff]  ;;  %v3009_v45 = vld [vmem:[#allocation9 + $0x398] sm:$0xff] }
 0x463   :  { %4744 = vmatprep.subr.bf16.mxu0 %v6330_v46  ;;  %v3013_v46 = vld [vmem:[#allocation9 + $0x3b8] sm:$0xff]  ;;  %v6384_v49 = vcombine.high %v3008_v43, %v3012_v44  ;;  %v6383_v4 = vcombine.low %v3008_v43, %v3012_v44 }
 0x464   :  { %v6386_v54 = vcombine.high %v3009_v45, %v3013_v46  ;;  %v6385_v7 = vcombine.low %v3009_v45, %v3013_v46  ;;  %v3064_v45 = vld [vmem:[#allocation9 + $0x550] sm:$0xff] }
 0x465   :  { %4659 = vmatpush1.bf16.msra.mxu1 %v6327_v50  ;;  %v3016_v50 = vld [vmem:[#allocation9 + $0x3d0] sm:$0xff] }
 0x466   :  { %4745 = vmatpush1.bf16.msra.mxu0 %v6329_v60  ;;  %4660 = vmatprep.subr.bf16.mxu1 %v6336_v61  ;;  %v3020_v60 = vld [vmem:[#allocation9 + $0x3f0] sm:$0xff]  ;;  %v3017_v61 = vld [vmem:[#allocation9 + $0x3d8] sm:$0xff] }
 0x467   :  { %4746 = vmatprep.subr.bf16.mxu0 %v6338_v63  ;;  %v3021_v63 = vld [vmem:[#allocation9 + $0x3f8] sm:$0xff]  ;;  %v6392_v53 = vcombine.high %v3016_v50, %v3020_v60  ;;  %v6391_v9 = vcombine.low %v3016_v50, %v3020_v60  ;;  %v3068_v46 = vld [vmem:[#allocation9 + $0x570] sm:$0xff] }
 0x468   :  { %v6394_v51 = vcombine.high %v3017_v61, %v3021_v63  ;;  %v6393_v10 = vcombine.low %v3017_v61, %v3021_v63  ;;  %v6440_v50 = vcombine.high %v3064_v45, %v3068_v46  ;;  %v3072_v61 = vld [vmem:[#allocation9 + $0x590] sm:$0xff] }
 0x469   :  { %4661 = vmatpush1.bf16.msra.mxu1 %v6335_v8  ;;  %v3024_v8 = vld [vmem:[#allocation9 + $0x410] sm:$0xff] }
 0x46a   :  { %4747 = vmatpush1.bf16.msra.mxu0 %v6337_v52  ;;  %4662 = vmatprep.subr.bf16.mxu1 %v6344_v55  ;;  %v3028_v52 = vld [vmem:[#allocation9 + $0x430] sm:$0xff]  ;;  %v3025_v55 = vld [vmem:[#allocation9 + $0x418] sm:$0xff] }
 0x46b   :  { %4748 = vmatprep.subr.bf16.mxu0 %v6346_v56  ;;  %v3029_v56 = vld [vmem:[#allocation9 + $0x438] sm:$0xff]  ;;  %v6400_v0 = vcombine.high %v3024_v8, %v3028_v52  ;;  %v3076_v63 = vld [vmem:[#allocation9 + $0x5b0] sm:$0xff] }
 0x46c   :  { %v6402_v3 = vcombine.high %v3025_v55, %v3029_v56  ;;  %v6401_v58 = vcombine.low %v3025_v55, %v3029_v56  ;;  %v3080_v55 = vld [vmem:[#allocation9 + $0x5d0] sm:$0xff] }
 0x46d   :  { %4663 = vmatpush1.bf16.msra.mxu1 %v6343_v11  ;;  %v3032_v11 = vld [vmem:[#allocation9 + $0x450] sm:$0xff] }
 0x46e   :  { %4749 = vmatpush1.bf16.msra.mxu0 %v6345_v13  ;;  %4664 = vmatprep.subr.bf16.mxu1 %v6352_v18  ;;  %v3036_v13 = vld [vmem:[#allocation9 + $0x470] sm:$0xff]  ;;  %v6399_v18 = vcombine.low %v3024_v8, %v3028_v52  ;;  %v6448_v8 = vcombine.high %v3072_v61, %v3076_v63 }
 0x46f   :  { %4750 = vmatprep.subr.bf16.mxu0 %v6354_v57  ;;  %v3033_v57 = vld [vmem:[#allocation9 + $0x458] sm:$0xff]  ;;  %v6408_v59 = vcombine.high %v3032_v11, %v3036_v13  ;;  %v6407_v27 = vcombine.low %v3032_v11, %v3036_v13  ;;  %v3084_v56 = vld [vmem:[#allocation9 + $0x5f0] sm:$0xff] }
 0x470   :  { %v6409_v28 = vcombine.low %v3033_v57, %v3037_v5  ;;  %v6456_v11 = vcombine.high %v3080_v55, %v3084_v56 }
 0x471   :  { %4665 = vmatpush1.bf16.msra.mxu1 %v6351_v24  ;;  %v3044_v24 = vld [vmem:[#allocation9 + $0x4b0] sm:$0xff] }
 0x472   :  { %4751 = vmatpush1.bf16.msra.mxu0 %v6353_v6  ;;  %4666 = vmatprep.subr.bf16.mxu1 %v6360_v25  ;;  %v6410_v6 = vcombine.high %v3033_v57, %v3037_v5  ;;  %v3041_v25 = vld [vmem:[#allocation9 + $0x498] sm:$0xff]  ;;  %v6416_v29 = vcombine.high %v3040_v62, %v3044_v24  ;;  %v6415_v38 = vcombine.low %v3040_v62, %v3044_v24  ;;  %v3092_v57 = vld [vmem:[#allocation9 + $0x630] sm:$0xff] }
 0x473   :  { %4752 = vmatprep.subr.bf16.mxu0 %v6362_v26  ;;  %v3045_v26 = vld [vmem:[#allocation9 + $0x4b8] sm:$0xff] }
 0x474   :  { %v6418_v31 = vcombine.high %v3041_v25, %v3045_v26  ;;  %v3089_v5 = vld [vmem:[#allocation9 + $0x618] sm:$0xff] }
 0x475   :  { %4667 = vmatpush1.bf16.msra.mxu1 %v6359_v32  ;;  %v3048_v32 = vld [vmem:[#allocation9 + $0x4d0] sm:$0xff] }
 0x476   :  { %4753 = vmatpush1.bf16.msra.mxu0 %v6361_v33  ;;  %4668 = vmatprep.subr.bf16.mxu1 %v6368_v37  ;;  %v3052_v33 = vld [vmem:[#allocation9 + $0x4f0] sm:$0xff]  ;;  %v3049_v37 = vld [vmem:[#allocation9 + $0x4d8] sm:$0xff] }
 0x477   :  { %4754 = vmatprep.subr.bf16.mxu0 %v6370_v41  ;;  %v3053_v41 = vld [vmem:[#allocation9 + $0x4f8] sm:$0xff]  ;;  %v6424_v42 = vcombine.high %v3048_v32, %v3052_v33 }
 0x478   :  { %v6426_v1 = vcombine.high %v3049_v37, %v3053_v41 }
 0x479   :  { %4669 = vmatpush1.bf16.msra.mxu1 %v6367_v15  ;;  %v3060_v15 = vld [vmem:[#allocation9 + $0x530] sm:$0xff] }
 0x47a   :  { %4755 = vmatpush1.bf16.msra.mxu0 %v6369_v16  ;;  %4670 = vmatprep.subr.bf16.mxu1 %v6376_v34  ;;  %v3057_v16 = vld [vmem:[#allocation9 + $0x518] sm:$0xff]  ;;  %v6432_v43 = vcombine.high %v3056_v2, %v3060_v15 }
 0x47b   :  { %4756 = vmatprep.subr.bf16.mxu0 %v6378_v19  ;;  %v3061_v34 = vld [vmem:[#allocation9 + $0x538] sm:$0xff]  ;;  %v6425_v19 = vcombine.low %v3049_v37, %v3053_v41  ;;  %v3104_v37 = vld [vmem:[#allocation9 + $0x690] sm:$0xff] }
 0x47c   :  { %v6434_v44 = vcombine.high %v3057_v16, %v3061_v34  ;;  %v3108_v41 = vld [vmem:[#allocation9 + $0x6b0] sm:$0xff] }
 0x47d   :  { %4671 = vmatpush1.bf16.msra.mxu1 %v6375_v47  ;;  %v3065_v47 = vld [vmem:[#allocation9 + $0x558] sm:$0xff] }
 0x47e   :  { %4757 = vmatpush1.bf16.msra.mxu0 %v6377_v48  ;;  %4672 = vmatprep.subr.bf16.mxu1 %v6384_v49  ;;  %v3069_v48 = vld [vmem:[#allocation9 + $0x578] sm:$0xff]  ;;  %v6431_v49 = vcombine.low %v3056_v2, %v3060_v15  ;;  %v6480_v2 = vcombine.high %v3104_v37, %v3108_v41 }
 0x47f   :  { %4758 = vmatprep.subr.bf16.mxu0 %v6386_v54  ;;  %v6433_v54 = vcombine.low %v3057_v16, %v3061_v34  ;;  %v6442_v60 = vcombine.high %v3065_v47, %v3069_v48  ;;  %v3112_v16 = vld [vmem:[#allocation9 + $0x6d0] sm:$0xff] }
 0x480   :  { %v3116_v34 = vld [vmem:[#allocation9 + $0x6f0] sm:$0xff] }
 0x481   :  { %4673 = vmatpush1.bf16.msra.mxu1 %v6383_v4  ;;  %v3073_v4 = vld [vmem:[#allocation9 + $0x598] sm:$0xff] }
 0x482   :  { %4759 = vmatpush1.bf16.msra.mxu0 %v6385_v7  ;;  %4674 = vmatprep.subr.bf16.mxu1 %v6392_v53  ;;  %v3077_v7 = vld [vmem:[#allocation9 + $0x5b8] sm:$0xff]  ;;  %v6439_v53 = vcombine.low %v3064_v45, %v3068_v46  ;;  %v6488_v45 = vcombine.high %v3112_v16, %v3116_v34 }
 0x483   :  { %4760 = vmatprep.subr.bf16.mxu0 %v6394_v51  ;;  %v6441_v51 = vcombine.low %v3065_v47, %v3069_v48  ;;  %v6450_v52 = vcombine.high %v3073_v4, %v3077_v7  ;;  %v3120_v47 = vld [vmem:[#allocation9 + $0x710] sm:$0xff] }
 0x484   :  { %v3124_v48 = vld [vmem:[#allocation9 + $0x730] sm:$0xff] }
 0x485   :  { %4675 = vmatpush1.bf16.msra.mxu1 %v6391_v9  ;;  %v3081_v9 = vld [vmem:[#allocation9 + $0x5d8] sm:$0xff] }
 0x486   :  { %4761 = vmatpush1.bf16.msra.mxu0 %v6393_v10  ;;  %4687 = vmatprep.subr.bf16.mxu1 %v6400_v0  ;;  %v3085_v10 = vld [vmem:[#allocation9 + $0x5f8] sm:$0xff]  ;;  %v6447_v0 = vcombine.low %v3072_v61, %v3076_v63  ;;  %v6496_v61 = vcombine.high %v3120_v47, %v3124_v48 }
 0x487   :  { %4773 = vmatprep.subr.bf16.mxu0 %v6402_v3  ;;  %v6449_v3 = vcombine.low %v3073_v4, %v3077_v7  ;;  %v6458_v13 = vcombine.high %v3081_v9, %v3085_v10  ;;  %v6457_v62 = vcombine.low %v3081_v9, %v3085_v10  ;;  %v3128_v4 = vld [vmem:[#allocation9 + $0x750] sm:$0xff] }
 0x488   :  { %4677 = vmatmul.mubr.bf16.vlgmr.msra.gmra.mrb[12].mxu1 %v7608_v21  ;;  %v3132_v7 = vld [vmem:[#allocation9 + $0x770] sm:$0xff] }
 0x489   :  { %4763 = vmatmul.mubr.bf16.vlgmr.msra.gmra.mrb[32].mxu0 %v7608_v21  ;;  %4688 = vmatpush1.bf16.msra.mxu1 %v6399_v18  ;;  %v6417_v21 = vcombine.low %v3041_v25, %v3045_v26  ;;  %v3088_v18 = vld [vmem:[#allocation9 + $0x610] sm:$0xff] }
 0x48a   :  { %4719 = vmatprep.mubr.bf16.mxu1 %v7614_v20  ;;  %4774 = vmatpush1.bf16.msra.mxu0 %v6401_v58  ;;  %v3093_v58 = vld [vmem:[#allocation9 + $0x638] sm:$0xff]  ;;  %v6464_v24 = vcombine.high %v3088_v18, %v3092_v57  ;;  %v3096_v25 = vld [vmem:[#allocation9 + $0x650] sm:$0xff] }
 0x48b   :  { %4805 = vmatprep.mubr.bf16.mxu0 %v7614_v20  ;;  %4689 = vmatprep.subr.bf16.mxu1 %v6408_v59  ;;  %v6423_v20 = vcombine.low %v3048_v32, %v3052_v33  ;;  %v6455_v59 = vcombine.low %v3080_v55, %v3084_v56  ;;  %v3100_v26 = vld [vmem:[#allocation9 + $0x670] sm:$0xff]  ;;  %v6504_v55 = vcombine.high %v3128_v4, %v3132_v7 }
 0x48c   :  { %4775 = vmatprep.subr.bf16.mxu0 %v6410_v6  ;;  %v6466_v6 = vcombine.high %v3089_v5, %v3093_v58  ;;  %v6472_v32 = vcombine.high %v3096_v25, %v3100_v26  ;;  %v3136_v9 = vld [vmem:[#allocation9 + $0x790] sm:$0xff] }
 0x48d   :  { %4690 = vmatpush1.bf16.msra.mxu1 %v6407_v27  ;;  %v3097_v27 = vld [vmem:[#allocation9 + $0x658] sm:$0xff]  ;;  %v3140_v10 = vld [vmem:[#allocation9 + $0x7b0] sm:$0xff] }
 0x48e   :  { %4776 = vmatpush1.bf16.msra.mxu0 %v6409_v28  ;;  %4691 = vmatprep.subr.bf16.mxu1 %v6416_v29  ;;  %v3101_v28 = vld [vmem:[#allocation9 + $0x678] sm:$0xff]  ;;  %v6463_v29 = vcombine.low %v3088_v18, %v3092_v57  ;;  %v6512_v18 = vcombine.high %v3136_v9, %v3140_v10 }
 0x48f   :  { %4777 = vmatprep.subr.bf16.mxu0 %v6418_v31  ;;  %v6465_v31 = vcombine.low %v3089_v5, %v3093_v58  ;;  %v6474_v33 = vcombine.high %v3097_v27, %v3101_v28  ;;  %v3144_v5 = vld [vmem:[#allocation9 + $0x7d0] sm:$0xff] }
 0x490   :  { %v3148_v58 = vld [vmem:[#allocation9 + $0x7f0] sm:$0xff] }
 0x491   :  { %4692 = vmatpush1.bf16.msra.mxu1 %v6415_v38  ;;  %v3105_v38 = vld [vmem:[#allocation9 + $0x698] sm:$0xff] }
 0x492   :  { %4778 = vmatpush1.bf16.msra.mxu0 %v6417_v21  ;;  %4693 = vmatprep.subr.bf16.mxu1 %v6424_v42  ;;  %v3109_v21 = vld [vmem:[#allocation9 + $0x6b8] sm:$0xff]  ;;  %v6471_v42 = vcombine.low %v3096_v25, %v3100_v26  ;;  %v6520_v25 = vcombine.high %v3144_v5, %v3148_v58 }
 0x493   :  { %4779 = vmatprep.subr.bf16.mxu0 %v6426_v1  ;;  %v6473_v1 = vcombine.low %v3097_v27, %v3101_v28  ;;  %v6482_v15 = vcombine.high %v3105_v38, %v3109_v21  ;;  %v6519_v27 = vcombine.low %v3144_v5, %v3148_v58 }
 0x495   :  { %4694 = vmatpush1.bf16.msra.mxu1 %v6423_v20  ;;  %v3113_v20 = vld [vmem:[#allocation9 + $0x6d8] sm:$0xff] }
 0x496   :  { %4780 = vmatpush1.bf16.msra.mxu0 %v6425_v19  ;;  %4695 = vmatprep.subr.bf16.mxu1 %v6432_v43  ;;  %v3117_v19 = vld [vmem:[#allocation9 + $0x6f8] sm:$0xff]  ;;  %v6479_v43 = vcombine.low %v3104_v37, %v3108_v41  ;;  %v6930_v37 = vld [vmem:[#allocation10 + $0x24] ss:$8 sps:$4 sm:$0xff]   ;;  %v6928_v41 = vld [vmem:[#allocation10 + $0x20] ss:$8 sps:$4 sm:$0xff]  }
 0x497   :  { %4781 = vmatprep.subr.bf16.mxu0 %v6434_v44  ;;  %v6481_v44 = vcombine.low %v3105_v38, %v3109_v21  ;;  %v6490_v46 = vcombine.high %v3113_v20, %v3117_v19  ;;  %v6933_v38 = vld [vmem:[#allocation10 + $0x34] ss:$8 sps:$4 sm:$0xff]   ;;  %v6931_v21 = vld [vmem:[#allocation10 + $0x30] ss:$8 sps:$4 sm:$0xff]  }
 0x499   :  { %4696 = vmatpush1.bf16.msra.mxu1 %v6431_v49  ;;  %v3121_v49 = vld [vmem:[#allocation9 + $0x718] sm:$0xff] }
 0x49a   :  { %4782 = vmatpush1.bf16.msra.mxu0 %v6433_v54  ;;  %4697 = vmatprep.subr.bf16.mxu1 %v6440_v50  ;;  %v3125_v54 = vld [vmem:[#allocation9 + $0x738] sm:$0xff]  ;;  %v6487_v50 = vcombine.low %v3112_v16, %v3116_v34  ;;  %v6940_v16 = vld [vmem:[#allocation10 + $0x60] ss:$8 sps:$4 sm:$0xff]  }
 0x49b   :  { %4783 = vmatprep.subr.bf16.mxu0 %v6442_v60  ;;  %v6489_v60 = vcombine.low %v3113_v20, %v3117_v19  ;;  %v6498_v63 = vcombine.high %v3121_v49, %v3125_v54  ;;  %v6945_v34 = vld [vmem:[#allocation10 + $0x74] ss:$8 sps:$4 sm:$0xff]   ;;  %v6943_v20 = vld [vmem:[#allocation10 + $0x70] ss:$8 sps:$4 sm:$0xff]   ;;  %v6948_v19 = vld [vmem:[#allocation10 + $0x84] ss:$8 sps:$4 sm:$0xff]  }
 0x49d   :  { %4698 = vmatpush1.bf16.msra.mxu1 %v6439_v53  ;;  %v3129_v53 = vld [vmem:[#allocation9 + $0x758] sm:$0xff] }
 0x49e   :  { %4784 = vmatpush1.bf16.msra.mxu0 %v6441_v51  ;;  %4699 = vmatprep.subr.bf16.mxu1 %v6448_v8  ;;  %v3133_v51 = vld [vmem:[#allocation9 + $0x778] sm:$0xff]  ;;  %v6495_v8 = vcombine.low %v3120_v47, %v3124_v48  ;;  %v6952_v47 = vld [vmem:[#allocation10 + $0xa0] ss:$8 sps:$4 sm:$0xff]  }
 0x49f   :  { %4785 = vmatprep.subr.bf16.mxu0 %v6450_v52  ;;  %v6497_v52 = vcombine.low %v3121_v49, %v3125_v54  ;;  %v6506_v56 = vcombine.high %v3129_v53, %v3133_v51  ;;  %v6957_v48 = vld [vmem:[#allocation10 + $0xb4] ss:$8 sps:$4 sm:$0xff]   ;;  %v6955_v49 = vld [vmem:[#allocation10 + $0xb0] ss:$8 sps:$4 sm:$0xff]   ;;  %v6960_v54 = vld [vmem:[#allocation10 + $0xc4] ss:$8 sps:$4 sm:$0xff]  }
 0x4a1   :  { %4700 = vmatpush1.bf16.msra.mxu1 %v6447_v0  ;;  %v3137_v0 = vld [vmem:[#allocation9 + $0x798] sm:$0xff] }
 0x4a2   :  { %4786 = vmatpush1.bf16.msra.mxu0 %v6449_v3  ;;  %4701 = vmatprep.subr.bf16.mxu1 %v6456_v11  ;;  %v3141_v3 = vld [vmem:[#allocation9 + $0x7b8] sm:$0xff]  ;;  %v6503_v11 = vcombine.low %v3128_v4, %v3132_v7  ;;  %v6964_v4 = vld [vmem:[#allocation10 + $0xe0] ss:$8 sps:$4 sm:$0xff]  }
 0x4a3   :  { %4787 = vmatprep.subr.bf16.mxu0 %v6458_v13  ;;  %v6505_v13 = vcombine.low %v3129_v53, %v3133_v51  ;;  %v6514_v57 = vcombine.high %v3137_v0, %v3141_v3  ;;  %v6969_v7 = vld [vmem:[#allocation10 + $0xf4] ss:$8 sps:$4 sm:$0xff]   ;;  %v6967_v53 = vld [vmem:[#allocation10 + $0xf0] ss:$8 sps:$4 sm:$0xff]   ;;  %v6972_v51 = vld [vmem:[#allocation10 + $0x104] ss:$8 sps:$4 sm:$0xff]  }
 0x4a5   :  { %4702 = vmatpush1.bf16.msra.mxu1 %v6455_v59  ;;  %v3145_v59 = vld [vmem:[#allocation9 + $0x7d8] sm:$0xff] }
 0x4a6   :  { %4788 = vmatpush1.bf16.msra.mxu0 %v6457_v62  ;;  %4703 = vmatprep.subr.bf16.mxu1 %v6464_v24  ;;  %v3149_v62 = vld [vmem:[#allocation9 + $0x7f8] sm:$0xff]  ;;  %v6511_v24 = vcombine.low %v3136_v9, %v3140_v10 }
 0x4a7   :  { %4789 = vmatprep.subr.bf16.mxu0 %v6466_v6  ;;  %v6513_v6 = vcombine.low %v3137_v0, %v3141_v3  ;;  %v6522_v26 = vcombine.high %v3145_v59, %v3149_v62  ;;  %v6521_v28 = vcombine.low %v3145_v59, %v3149_v62 }
 0x4a9   :  { %4704 = vmatpush1.bf16.msra.mxu1 %v6463_v29  ;;  %v6924_v29 = vld [vmem:[#allocation10 + $0x4] ss:$8 sps:$4 sm:$0xff]  }
 0x4aa   :  { %4790 = vmatpush1.bf16.msra.mxu0 %v6465_v31  ;;  %4705 = vmatprep.subr.bf16.mxu1 %v6472_v32  ;;  %v6922_v31 = vld [vmem:[#allocation10] ss:$8 sps:$4 sm:$0xff]   ;;  %v6927_v32 = vld [vmem:[#allocation10 + $0x14] ss:$8 sps:$4 sm:$0xff]  }
 0x4ab   :  { %4791 = vmatprep.subr.bf16.mxu0 %v6474_v33  ;;  %v6925_v33 = vld [vmem:[#allocation10 + $0x10] ss:$8 sps:$4 sm:$0xff]  }
 0x4ad   :  { %4706 = vmatpush1.bf16.msra.mxu1 %v6471_v42  ;;  %v6936_v42 = vld [vmem:[#allocation10 + $0x44] ss:$8 sps:$4 sm:$0xff]  }
 0x4ae   :  { %4792 = vmatpush1.bf16.msra.mxu0 %v6473_v1  ;;  %4707 = vmatprep.subr.bf16.mxu1 %v6480_v2  ;;  %v6934_v1 = vld [vmem:[#allocation10 + $0x40] ss:$8 sps:$4 sm:$0xff]   ;;  %v6939_v2 = vld [vmem:[#allocation10 + $0x54] ss:$8 sps:$4 sm:$0xff]  }
 0x4af   :  { %4793 = vmatprep.subr.bf16.mxu0 %v6482_v15  ;;  %v6937_v15 = vld [vmem:[#allocation10 + $0x50] ss:$8 sps:$4 sm:$0xff]  }
 0x4b1   :  { %4708 = vmatpush1.bf16.msra.mxu1 %v6479_v43  ;;  %v6946_v43 = vld [vmem:[#allocation10 + $0x80] ss:$8 sps:$4 sm:$0xff]  }
 0x4b2   :  { %4794 = vmatpush1.bf16.msra.mxu0 %v6481_v44  ;;  %4709 = vmatprep.subr.bf16.mxu1 %v6488_v45  ;;  %v6951_v44 = vld [vmem:[#allocation10 + $0x94] ss:$8 sps:$4 sm:$0xff]   ;;  %v6949_v45 = vld [vmem:[#allocation10 + $0x90] ss:$8 sps:$4 sm:$0xff]  }
 0x4b3   :  { %4795 = vmatprep.subr.bf16.mxu0 %v6490_v46  ;;  %v6954_v46 = vld [vmem:[#allocation10 + $0xa4] ss:$8 sps:$4 sm:$0xff]  }
 0x4b5   :  { %4710 = vmatpush1.bf16.msra.mxu1 %v6487_v50  ;;  %v6958_v50 = vld [vmem:[#allocation10 + $0xc0] ss:$8 sps:$4 sm:$0xff]  }
 0x4b6   :  { %4796 = vmatpush1.bf16.msra.mxu0 %v6489_v60  ;;  %4711 = vmatprep.subr.bf16.mxu1 %v6496_v61  ;;  %v6963_v60 = vld [vmem:[#allocation10 + $0xd4] ss:$8 sps:$4 sm:$0xff]   ;;  %v6961_v61 = vld [vmem:[#allocation10 + $0xd0] ss:$8 sps:$4 sm:$0xff]  }
 0x4b7   :  { %4797 = vmatprep.subr.bf16.mxu0 %v6498_v63  ;;  %v6966_v63 = vld [vmem:[#allocation10 + $0xe4] ss:$8 sps:$4 sm:$0xff]  }
 0x4b9   :  { %4712 = vmatpush1.bf16.msra.mxu1 %v6495_v8  ;;  %v7641_v8 = vld [vmem:[%s7710_s8] sm:$0xff] }
 0x4ba   :  { %4798 = vmatpush1.bf16.msra.mxu0 %v6497_v52  ;;  %4713 = vmatprep.subr.bf16.mxu1 %v6504_v55  ;;  %v3155_v52 = vrot.slane %v7641_v8, %v7488_v35  ;;  %v3163_v55 = vrot.slane %v7641_v8, %v7491_v36  ;;  %v3159_v10 = vrot.slane %v7641_v8, %v7494_v39 }
 0x4bb   :  { %4799 = vmatprep.subr.bf16.mxu0 %v6506_v56  ;;  %v3167_v0 = vrot.slane %v7641_v8, %v7497_v40 }
 0x4bd   :  { %4714 = vmatpush1.bf16.msra.mxu1 %v6503_v11 }
 0x4be   :  { %4800 = vmatpush1.bf16.msra.mxu0 %v6505_v13  ;;  %4715 = vmatprep.subr.bf16.mxu1 %v6512_v18 }
 0x4bf   :  { %4801 = vmatprep.subr.bf16.mxu0 %v6514_v57 }
 0x4c1   :  { %4716 = vmatpush1.bf16.msra.mxu1 %v6511_v24 }
 0x4c2   :  { %4802 = vmatpush1.bf16.msra.mxu0 %v6513_v6  ;;  %4717 = vmatprep.subr.bf16.mxu1 %v6520_v25 }
 0x4c3   :  { %4803 = vmatprep.subr.bf16.mxu0 %v6522_v26 }
 0x4c5   :  { %4718 = vmatpush1.bf16.msra.mxu1 %v6519_v27 }
 0x4c6   :  { %4804 = vmatpush1.bf16.msra.mxu0 %v6521_v28  ;;  %5604 = vmatprep.subr.bf16.mxu1 %v6924_v29 }
 0x4c8   :  { %4720 = vmatmul.mubr.bf16.vlgmr.msra.gmra.mrb[12].mxu1 %v7610_v17 }
 0x4c9   :  { %4806 = vmatmul.mubr.bf16.vlgmr.msra.gmra.mrb[32].mxu0 %v7610_v17  ;;  %5605 = vmatpush1.bf16.msra.mxu1 %v6922_v31  ;;  %v6942_v17 = vld [vmem:[#allocation10 + $0x64] ss:$8 sps:$4 sm:$0xff]   ;;  %v6970_v31 = vld [vmem:[#allocation10 + $0x100] ss:$8 sps:$4 sm:$0xff]  }
 0x4ca   :  { %5606 = vmatprep.subr.bf16.mxu1 %v6927_v32  ;;  %v6975_v32 = vld [vmem:[#allocation10 + $0x114] ss:$8 sps:$4 sm:$0xff]  }
 0x4cd   :  { %5607 = vmatpush1.bf16.msra.mxu1 %v6925_v33  ;;  %v6973_v33 = vld [vmem:[#allocation10 + $0x110] ss:$8 sps:$4 sm:$0xff]  }
 0x4ce   :  { %5608 = vmatprep.subr.bf16.mxu1 %v6930_v37  ;;  %v6978_v37 = vld [vmem:[#allocation10 + $0x124] ss:$8 sps:$4 sm:$0xff]  }
 0x4d1   :  { %5609 = vmatpush1.bf16.msra.mxu1 %v6928_v41  ;;  %v6976_v41 = vld [vmem:[#allocation10 + $0x120] ss:$8 sps:$4 sm:$0xff]  }
 0x4d2   :  { %5610 = vmatprep.subr.bf16.mxu1 %v6933_v38  ;;  %v6981_v38 = vld [vmem:[#allocation10 + $0x134] ss:$8 sps:$4 sm:$0xff]  }
 0x4d5   :  { %5611 = vmatpush1.bf16.msra.mxu1 %v6931_v21  ;;  %v6979_v21 = vld [vmem:[#allocation10 + $0x130] ss:$8 sps:$4 sm:$0xff]  }
 0x4d6   :  { %5612 = vmatprep.subr.bf16.mxu1 %v6936_v42  ;;  %v6984_v42 = vld [vmem:[#allocation10 + $0x144] ss:$8 sps:$4 sm:$0xff]  }
 0x4d9   :  { %5613 = vmatpush1.bf16.msra.mxu1 %v6934_v1  ;;  %v6982_v1 = vld [vmem:[#allocation10 + $0x140] ss:$8 sps:$4 sm:$0xff]  }
 0x4da   :  { %5614 = vmatprep.subr.bf16.mxu1 %v6939_v2  ;;  %v6987_v2 = vld [vmem:[#allocation10 + $0x154] ss:$8 sps:$4 sm:$0xff]  }
 0x4dd   :  { %5615 = vmatpush1.bf16.msra.mxu1 %v6937_v15  ;;  %v6985_v15 = vld [vmem:[#allocation10 + $0x150] ss:$8 sps:$4 sm:$0xff]  }
 0x4de   :  { %5616 = vmatprep.subr.bf16.mxu1 %v6942_v17  ;;  %v6990_v17 = vld [vmem:[#allocation10 + $0x164] ss:$8 sps:$4 sm:$0xff]  }
 0x4e1   :  { %5617 = vmatpush1.bf16.msra.mxu1 %v6940_v16  ;;  %v6988_v16 = vld [vmem:[#allocation10 + $0x160] ss:$8 sps:$4 sm:$0xff]  }
 0x4e2   :  { %5618 = vmatprep.subr.bf16.mxu1 %v6945_v34  ;;  %v6993_v34 = vld [vmem:[#allocation10 + $0x174] ss:$8 sps:$4 sm:$0xff]  }
 0x4e5   :  { %5619 = vmatpush1.bf16.msra.mxu1 %v6943_v20  ;;  %v6991_v20 = vld [vmem:[#allocation10 + $0x170] ss:$8 sps:$4 sm:$0xff]  }
 0x4e6   :  { %5620 = vmatprep.subr.bf16.mxu1 %v6948_v19  ;;  %v6996_v19 = vld [vmem:[#allocation10 + $0x184] ss:$8 sps:$4 sm:$0xff]  }
 0x4e9   :  { %5621 = vmatpush1.bf16.msra.mxu1 %v6946_v43  ;;  %v6994_v43 = vld [vmem:[#allocation10 + $0x180] ss:$8 sps:$4 sm:$0xff]  }
 0x4ea   :  { %5622 = vmatprep.subr.bf16.mxu1 %v6951_v44  ;;  %v6999_v44 = vld [vmem:[#allocation10 + $0x194] ss:$8 sps:$4 sm:$0xff]  }
 0x4ed   :  { %5623 = vmatpush1.bf16.msra.mxu1 %v6949_v45  ;;  %v6997_v45 = vld [vmem:[#allocation10 + $0x190] ss:$8 sps:$4 sm:$0xff]  }
 0x4ee   :  { %5624 = vmatprep.subr.bf16.mxu1 %v6954_v46  ;;  %v7002_v46 = vld [vmem:[#allocation10 + $0x1a4] ss:$8 sps:$4 sm:$0xff]  }
 0x4f1   :  { %5625 = vmatpush1.bf16.msra.mxu1 %v6952_v47  ;;  %v7000_v47 = vld [vmem:[#allocation10 + $0x1a0] ss:$8 sps:$4 sm:$0xff]  }
 0x4f2   :  { %5626 = vmatprep.subr.bf16.mxu1 %v6957_v48  ;;  %v7005_v48 = vld [vmem:[#allocation10 + $0x1b4] ss:$8 sps:$4 sm:$0xff]  }
 0x4f5   :  { %5627 = vmatpush1.bf16.msra.mxu1 %v6955_v49  ;;  %v7003_v49 = vld [vmem:[#allocation10 + $0x1b0] ss:$8 sps:$4 sm:$0xff]  }
 0x4f6   :  { %5628 = vmatprep.subr.bf16.mxu1 %v6960_v54  ;;  %v7008_v54 = vld [vmem:[#allocation10 + $0x1c4] ss:$8 sps:$4 sm:$0xff]  }
 0x4f9   :  { %5629 = vmatpush1.bf16.msra.mxu1 %v6958_v50  ;;  %v7006_v50 = vld [vmem:[#allocation10 + $0x1c0] ss:$8 sps:$4 sm:$0xff]  }
 0x4fa   :  { %5630 = vmatprep.subr.bf16.mxu1 %v6963_v60  ;;  %v7011_v60 = vld [vmem:[#allocation10 + $0x1d4] ss:$8 sps:$4 sm:$0xff]  }
 0x4fd   :  { %5631 = vmatpush1.bf16.msra.mxu1 %v6961_v61  ;;  %v7009_v61 = vld [vmem:[#allocation10 + $0x1d0] ss:$8 sps:$4 sm:$0xff]  }
 0x4fe   :  { %5632 = vmatprep.subr.bf16.mxu1 %v6966_v63  ;;  %v7014_v63 = vld [vmem:[#allocation10 + $0x1e4] ss:$8 sps:$4 sm:$0xff]  }
 0x501   :  { %5633 = vmatpush1.bf16.msra.mxu1 %v6964_v4  ;;  %v7012_v4 = vld [vmem:[#allocation10 + $0x1e0] ss:$8 sps:$4 sm:$0xff]  }
 0x502   :  { %5634 = vmatprep.subr.bf16.mxu1 %v6969_v7  ;;  %v7017_v7 = vld [vmem:[#allocation10 + $0x1f4] ss:$8 sps:$4 sm:$0xff]  }
 0x505   :  { %5635 = vmatpush1.bf16.msra.mxu1 %v6967_v53  ;;  %v7015_v53 = vld [vmem:[#allocation10 + $0x1f0] ss:$8 sps:$4 sm:$0xff]  }
 0x506   :  { %5647 = vmatprep.subr.bf16.mxu1 %v6972_v51  ;;  %v7020_v51 = vld [vmem:[#allocation10 + $0x204] ss:$8 sps:$4 sm:$0xff]  }
 0x51b   :  { %v4549_v56 = vpop.f32.mrb[8].mxu1  ;;  %v4635_v9 = vpop.f32.mrb[28].mxu0 }
 0x51c   :  { %v4551_v3 = vpop.f32.mrb[9].mxu1  ;;  %v4637_v11 = vpop.f32.mrb[29].mxu0  ;;  %v6705_v57 = vadd.f32 %v4549_v56, %v3155_v52  ;;  %v7651_v5 = vadd.f32 %v4635_v9, %v3163_v55  ;;  %v7114_v56 = vld [vmem:[#allocation12] sm:$0xff]   ;;  %v7021_v9 = vld [vmem:[#allocation10 + $0x210] ss:$8 sps:$4 sm:$0xff]  }
 0x51d   :  { %v4553_v13 = vpop.f32.mrb[10].mxu1  ;;  %v4639_v18 = vpop.f32.mrb[30].mxu0  ;;  %v6706_v24 = vadd.f32 %v4551_v3, %v3159_v10  ;;  %v6710_v6 = vadd.f32 %v4637_v11, %v3167_v0  ;;  %v7115_v3 = vld [vmem:[#allocation12 + $0x8] sm:$0xff]  }
 0x51e   :  { %v6707_v58 = vadd.f32 %v4553_v13, %v3155_v52  ;;  %v7653_v59 = vadd.f32 %v4639_v18, %v3163_v55  ;;  %v4555_v62 = vpop.f32.mrb[11].mxu1  ;;  %v4641_v36 = vpop.f32.mrb[31].mxu0  ;;  %v7018_v52 = vld [vmem:[#allocation10 + $0x200] ss:$8 sps:$4 sm:$0xff]   ;;  %v7023_v55 = vld [vmem:[#allocation10 + $0x214] ss:$8 sps:$4 sm:$0xff]  }
 0x51f   :  { %v6708_v25 = vadd.f32 %v4555_v62, %v3159_v10  ;;  %v6712_v26 = vadd.f32 %v4641_v36, %v3167_v0  ;;  %v7310_v10 = vmov 0.0   ;;  %v7026_v0 = vld [vmem:[#allocation10 + $0x224] ss:$8 sps:$4 sm:$0xff]   ;;  %v7024_v11 = vld [vmem:[#allocation10 + $0x220] ss:$8 sps:$4 sm:$0xff]   ;;  %v7116_v18 = vld [vmem:[#allocation12 + $0x10] sm:$0xff]  }
 0x520   :  { %v4816_v27 = vpack.c.bf16 %v6707_v58, %v6705_v57  ;;  %v4818_v40 = vpack.c.bf16 %v7653_v59, %v7651_v5  ;;  %6669 = vmatprep.subr.bf16.mxu0 %v7310_v10  ;;  %v7029_v13 = vld [vmem:[#allocation10 + $0x234] ss:$8 sps:$4 sm:$0xff]   ;;  %v7027_v57 = vld [vmem:[#allocation10 + $0x230] ss:$8 sps:$4 sm:$0xff]   ;;  %v7032_v5 = vld [vmem:[#allocation10 + $0x244] ss:$8 sps:$4 sm:$0xff]   ;;  %6685 = vmatprep.mubr.msk.bf16.mxu0 %vm7311_vm1, %v7310_v10 }
 0x521   :  { %v4817_v28 = vpack.c.bf16 %v6708_v25, %v6706_v24  ;;  %v4819_v29 = vpack.c.bf16 %v6712_v26, %v6710_v6  ;;  %6670 = vmatpush3.bf16.msra.mxu0 %v7114_v56  ;;  %v7117_v58 = vld [vmem:[#allocation12 + $0x18] sm:$0xff]   ;;  %v7030_v59 = vld [vmem:[#allocation10 + $0x240] ss:$8 sps:$4 sm:$0xff]   ;;  %v7038_v6 = vld [vmem:[#allocation10 + $0x264] ss:$8 sps:$4 sm:$0xff]  }
 0x522   :  { %6671 = vmatprep.subr.bf16.mxu0 %v7310_v10  ;;  %v7035_v62 = vld [vmem:[#allocation10 + $0x254] ss:$8 sps:$4 sm:$0xff]   ;;  %v7118_v36 = vld [vmem:[#allocation12 + $0x20] sm:$0xff]   ;;  %v7033_v24 = vld [vmem:[#allocation10 + $0x250] ss:$8 sps:$4 sm:$0xff]  }
 0x523   :  { %5636 = vmatprep.mubr.bf16.mxu1 %v4817_v28  ;;  %v7119_v25 = vld [vmem:[#allocation12 + $0x28] sm:$0xff]   ;;  %v7071_v56 = vld [vmem:[#allocation10 + $0x314] ss:$8 sps:$4 sm:$0xff]  }
 0x524   :  { %5637 = vmatmul.mubr.bf16.vlgmr.msra.gmra.mrb[16].mxu1 %v4816_v27  ;;  %v7036_v26 = vld [vmem:[#allocation10 + $0x260] ss:$8 sps:$4 sm:$0xff]   ;;  %v7041_v27 = vld [vmem:[#allocation10 + $0x274] ss:$8 sps:$4 sm:$0xff]   ;;  %v7044_v28 = vld [vmem:[#allocation10 + $0x284] ss:$8 sps:$4 sm:$0xff]  }
 0x525   :  { %5648 = vmatpush1.bf16.msra.mxu1 %v6970_v31  ;;  %5679 = vmatprep.mubr.bf16.mxu1 %v4819_v29  ;;  %v7042_v29 = vld [vmem:[#allocation10 + $0x280] ss:$8 sps:$4 sm:$0xff]   ;;  %v7047_v31 = vld [vmem:[#allocation10 + $0x294] ss:$8 sps:$4 sm:$0xff]  }
 0x526   :  { %5649 = vmatprep.subr.bf16.mxu1 %v6975_v32  ;;  %6672 = vmatpush3.bf16.msra.mxu0 %v7115_v3  ;;  %v7045_v32 = vld [vmem:[#allocation10 + $0x290] ss:$8 sps:$4 sm:$0xff]   ;;  %v7072_v3 = vld [vmem:[#allocation10 + $0x320] ss:$8 sps:$4 sm:$0xff]  }
 0x527   :  { %6673 = vmatprep.subr.bf16.mxu0 %v7310_v10 }
 0x529   :  { %5650 = vmatpush1.bf16.msra.mxu1 %v6973_v33  ;;  %v7050_v33 = vld [vmem:[#allocation10 + $0x2a4] ss:$8 sps:$4 sm:$0xff]  }
 0x52a   :  { %5651 = vmatprep.subr.bf16.mxu1 %v6978_v37  ;;  %6674 = vmatpush3.bf16.msra.mxu0 %v7116_v18  ;;  %v7048_v37 = vld [vmem:[#allocation10 + $0x2a0] ss:$8 sps:$4 sm:$0xff]   ;;  %v7080_v18 = vld [vmem:[#allocation10 + $0x344] ss:$8 sps:$4 sm:$0xff]  }
 0x52b   :  { %6675 = vmatprep.subr.bf16.mxu0 %v7310_v10 }
 0x52d   :  { %5652 = vmatpush1.bf16.msra.mxu1 %v6976_v41  ;;  %v7053_v41 = vld [vmem:[#allocation10 + $0x2b4] ss:$8 sps:$4 sm:$0xff]  }
 0x52e   :  { %5653 = vmatprep.subr.bf16.mxu1 %v6981_v38  ;;  %6676 = vmatpush3.bf16.msra.mxu0 %v7117_v58  ;;  %v7051_v38 = vld [vmem:[#allocation10 + $0x2b0] ss:$8 sps:$4 sm:$0xff]  }
 0x52f   :  { %6677 = vmatprep.subr.bf16.mxu0 %v7310_v10  ;;  %v7081_v58 = vld [vmem:[#allocation10 + $0x350] ss:$8 sps:$4 sm:$0xff]  }
 0x531   :  { %5654 = vmatpush1.bf16.msra.mxu1 %v6979_v21  ;;  %v7056_v21 = vld [vmem:[#allocation10 + $0x2c4] ss:$8 sps:$4 sm:$0xff]  }
 0x532   :  { %5655 = vmatprep.subr.bf16.mxu1 %v6984_v42  ;;  %6678 = vmatpush3.bf16.msra.mxu0 %v7118_v36  ;;  %v7054_v42 = vld [vmem:[#allocation10 + $0x2c0] ss:$8 sps:$4 sm:$0xff]   ;;  %v7089_v36 = vld [vmem:[#allocation10 + $0x374] ss:$8 sps:$4 sm:$0xff]  }
 0x533   :  { %6679 = vmatprep.subr.bf16.mxu0 %v7310_v10 }
 0x535   :  { %5656 = vmatpush1.bf16.msra.mxu1 %v6982_v1  ;;  %v7059_v1 = vld [vmem:[#allocation10 + $0x2d4] ss:$8 sps:$4 sm:$0xff]  }
 0x536   :  { %5657 = vmatprep.subr.bf16.mxu1 %v6987_v2  ;;  %6680 = vmatpush3.bf16.msra.mxu0 %v7119_v25  ;;  %v7057_v2 = vld [vmem:[#allocation10 + $0x2d0] ss:$8 sps:$4 sm:$0xff]   ;;  %v7090_v25 = vld [vmem:[#allocation10 + $0x380] ss:$8 sps:$4 sm:$0xff]  }
 0x537   :  { %6681 = vmatprep.subr.bf16.mxu0 %v7310_v10 }
 0x539   :  { %5658 = vmatpush1.bf16.msra.mxu1 %v6985_v15  ;;  %v7062_v15 = vld [vmem:[#allocation10 + $0x2e4] ss:$8 sps:$4 sm:$0xff]  }
 0x53a   :  { %5659 = vmatprep.subr.bf16.mxu1 %v6990_v17  ;;  %v7060_v17 = vld [vmem:[#allocation10 + $0x2e0] ss:$8 sps:$4 sm:$0xff]  }
 0x53d   :  { %5660 = vmatpush1.bf16.msra.mxu1 %v6988_v16  ;;  %v3171_v16 = vrot.slane %v7641_v8, %v7504_v12  ;;  %v7063_v12 = vld [vmem:[#allocation10 + $0x2f0] ss:$8 sps:$4 sm:$0xff]  }
 0x53e   :  { %5661 = vmatprep.subr.bf16.mxu1 %v6993_v34  ;;  %v7065_v34 = vld [vmem:[#allocation10 + $0x2f4] ss:$8 sps:$4 sm:$0xff]  }
 0x541   :  { %5662 = vmatpush1.bf16.msra.mxu1 %v6991_v20 }
 0x542   :  { %5663 = vmatprep.subr.bf16.mxu1 %v6996_v19  ;;  %v3179_v19 = vrot.slane %v7641_v8, %v1244_v22 }
 0x545   :  { %5664 = vmatpush1.bf16.msra.mxu1 %v6994_v43  ;;  %v3175_v43 = vrot.slane %v7641_v8, %v7507_v14 }
 0x546   :  { %5665 = vmatprep.subr.bf16.mxu1 %v6999_v44 }
 0x549   :  { %5666 = vmatpush1.bf16.msra.mxu1 %v6997_v45 }
 0x54a   :  { %5667 = vmatprep.subr.bf16.mxu1 %v7002_v46  ;;  %v3183_v46 = vrot.slane %v7641_v8, %v1248_v23 }
 0x54d   :  { %5668 = vmatpush1.bf16.msra.mxu1 %v7000_v47 }
 0x54e   :  { %5669 = vmatprep.subr.bf16.mxu1 %v7005_v48 }
 0x551   :  { %5670 = vmatpush1.bf16.msra.mxu1 %v7003_v49 }
 0x552   :  { %5671 = vmatprep.subr.bf16.mxu1 %v7008_v54 }
 0x555   :  { %5672 = vmatpush1.bf16.msra.mxu1 %v7006_v50 }
 0x556   :  { %5673 = vmatprep.subr.bf16.mxu1 %v7011_v60 }
 0x559   :  { %5674 = vmatpush1.bf16.msra.mxu1 %v7009_v61  ;;  %v7068_v61 = vld [vmem:[#allocation10 + $0x304] ss:$8 sps:$4 sm:$0xff]  }
 0x55a   :  { %5675 = vmatprep.subr.bf16.mxu1 %v7014_v63 }
 0x55d   :  { %5676 = vmatpush1.bf16.msra.mxu1 %v7012_v4 }
 0x55e   :  { %5677 = vmatprep.subr.bf16.mxu1 %v7017_v7 }
 0x561   :  { %5678 = vmatpush1.bf16.msra.mxu1 %v7015_v53 }
 0x562   :  { %5690 = vmatprep.subr.bf16.mxu1 %v7020_v51 }
 0x564   :  { %5680 = vmatmul.mubr.bf16.vlgmr.msra.gmra.mrb[16].mxu1 %v4818_v40  ;;  %v7039_v40 = vld [vmem:[#allocation10 + $0x270] ss:$8 sps:$4 sm:$0xff]  }
 0x565   :  { %5691 = vmatpush1.bf16.msra.mxu1 %v7018_v52  ;;  %v7066_v52 = vld [vmem:[#allocation10 + $0x300] ss:$8 sps:$4 sm:$0xff]  }
 0x566   :  { %5692 = vmatprep.subr.bf16.mxu1 %v7023_v55 }
 0x569   :  { %5693 = vmatpush1.bf16.msra.mxu1 %v7021_v9  ;;  %v7069_v9 = vld [vmem:[#allocation10 + $0x310] ss:$8 sps:$4 sm:$0xff]  }
 0x56a   :  { %5694 = vmatprep.subr.bf16.mxu1 %v7026_v0  ;;  %v7074_v0 = vld [vmem:[#allocation10 + $0x324] ss:$8 sps:$4 sm:$0xff]  }
 0x56d   :  { %5695 = vmatpush1.bf16.msra.mxu1 %v7024_v11  ;;  %v7077_v11 = vld [vmem:[#allocation10 + $0x334] ss:$8 sps:$4 sm:$0xff]  }
 0x56e   :  { %5696 = vmatprep.subr.bf16.mxu1 %v7029_v13  ;;  %v7075_v13 = vld [vmem:[#allocation10 + $0x330] ss:$8 sps:$4 sm:$0xff]  }
 0x571   :  { %5697 = vmatpush1.bf16.msra.mxu1 %v7027_v57  ;;  %v7078_v57 = vld [vmem:[#allocation10 + $0x340] ss:$8 sps:$4 sm:$0xff]  }
 0x572   :  { %5698 = vmatprep.subr.bf16.mxu1 %v7032_v5  ;;  %v7083_v5 = vld [vmem:[#allocation10 + $0x354] ss:$8 sps:$4 sm:$0xff]  }
 0x575   :  { %5699 = vmatpush1.bf16.msra.mxu1 %v7030_v59  ;;  %v7086_v59 = vld [vmem:[#allocation10 + $0x364] ss:$8 sps:$4 sm:$0xff]  }
 0x576   :  { %5700 = vmatprep.subr.bf16.mxu1 %v7035_v62  ;;  %v7084_v62 = vld [vmem:[#allocation10 + $0x360] ss:$8 sps:$4 sm:$0xff]  }
 0x579   :  { %5701 = vmatpush1.bf16.msra.mxu1 %v7033_v24  ;;  %v7087_v24 = vld [vmem:[#allocation10 + $0x370] ss:$8 sps:$4 sm:$0xff]  }
 0x57a   :  { %5702 = vmatprep.subr.bf16.mxu1 %v7038_v6  ;;  %v7092_v6 = vld [vmem:[#allocation10 + $0x384] ss:$8 sps:$4 sm:$0xff]  }
 0x57d   :  { %5703 = vmatpush1.bf16.msra.mxu1 %v7036_v26  ;;  %v7095_v26 = vld [vmem:[#allocation10 + $0x394] ss:$8 sps:$4 sm:$0xff]  }
 0x57e   :  { %5704 = vmatprep.subr.bf16.mxu1 %v7041_v27  ;;  %v7093_v27 = vld [vmem:[#allocation10 + $0x390] ss:$8 sps:$4 sm:$0xff]  }
 0x581   :  { %5705 = vmatpush1.bf16.msra.mxu1 %v7039_v40  ;;  %v7098_v40 = vld [vmem:[#allocation10 + $0x3a4] ss:$8 sps:$4 sm:$0xff]  }
 0x582   :  { %5706 = vmatprep.subr.bf16.mxu1 %v7044_v28  ;;  %v7096_v28 = vld [vmem:[#allocation10 + $0x3a0] ss:$8 sps:$4 sm:$0xff]  }
 0x585   :  { %5707 = vmatpush1.bf16.msra.mxu1 %v7042_v29  ;;  %v7101_v29 = vld [vmem:[#allocation10 + $0x3b4] ss:$8 sps:$4 sm:$0xff]  }
 0x586   :  { %5708 = vmatprep.subr.bf16.mxu1 %v7047_v31  ;;  %v7099_v31 = vld [vmem:[#allocation10 + $0x3b0] ss:$8 sps:$4 sm:$0xff]  }
 0x589   :  { %5709 = vmatpush1.bf16.msra.mxu1 %v7045_v32  ;;  %v7104_v32 = vld [vmem:[#allocation10 + $0x3c4] ss:$8 sps:$4 sm:$0xff]  }
 0x58a   :  { %5710 = vmatprep.subr.bf16.mxu1 %v7050_v33  ;;  %v7102_v33 = vld [vmem:[#allocation10 + $0x3c0] ss:$8 sps:$4 sm:$0xff]  }
 0x58d   :  { %5711 = vmatpush1.bf16.msra.mxu1 %v7048_v37  ;;  %v7107_v37 = vld [vmem:[#allocation10 + $0x3d4] ss:$8 sps:$4 sm:$0xff]  }
 0x58e   :  { %5712 = vmatprep.subr.bf16.mxu1 %v7053_v41  ;;  %v7105_v41 = vld [vmem:[#allocation10 + $0x3d0] ss:$8 sps:$4 sm:$0xff]  }
 0x591   :  { %5713 = vmatpush1.bf16.msra.mxu1 %v7051_v38  ;;  %v7110_v38 = vld [vmem:[#allocation10 + $0x3e4] ss:$8 sps:$4 sm:$0xff]  }
 0x592   :  { %5714 = vmatprep.subr.bf16.mxu1 %v7056_v21  ;;  %v7108_v21 = vld [vmem:[#allocation10 + $0x3e0] ss:$8 sps:$4 sm:$0xff]  }
 0x595   :  { %5715 = vmatpush1.bf16.msra.mxu1 %v7054_v42  ;;  %v7113_v42 = vld [vmem:[#allocation10 + $0x3f4] ss:$8 sps:$4 sm:$0xff]  }
 0x596   :  { %5716 = vmatprep.subr.bf16.mxu1 %v7059_v1  ;;  %v7111_v1 = vld [vmem:[#allocation10 + $0x3f0] ss:$8 sps:$4 sm:$0xff]  }
 0x599   :  { %5717 = vmatpush1.bf16.msra.mxu1 %v7057_v2  ;;  %v7120_v2 = vld [vmem:[#allocation12 + $0x30] sm:$0xff]  }
 0x59a   :  { %5718 = vmatprep.subr.bf16.mxu1 %v7062_v15  ;;  %6682 = vmatpush3.bf16.msra.mxu0 %v7120_v2  ;;  %v7121_v15 = vld [vmem:[#allocation12 + $0x38] sm:$0xff]  }
 0x59b   :  { %v4721_v20 = vpop.f32.mrb[12].mxu1  ;;  %6683 = vmatprep.subr.bf16.mxu0 %v7310_v10  ;;  %v6651_v10 = vld [vmem:[%s7714_s12] ss:$0 sm:$0xff] }
 0x59c   :  { %v4807_v44 = vpop.f32.mrb[32].mxu0  ;;  %v4723_v45 = vpop.f32.mrb[13].mxu1  ;;  %v6713_v49 = vadd.f32 %v4721_v20, %v3171_v16 }
 0x59d   :  { %v4809_v47 = vpop.f32.mrb[33].mxu0  ;;  %5719 = vmatpush1.bf16.msra.mxu1 %v7060_v17  ;;  %v4725_v48 = vpop.f32.mrb[14].mxu1  ;;  %v7677_v22 = vadd.f32 %v4807_v44, %v3179_v19  ;;  %v6714_v63 = vadd.f32 %v4723_v45, %v3175_v43  ;;  %v4952_v17 = vld [vmem:[%s7712_s10] sm:$0x3] }
 0x59e   :  { %v6715_v54 = vadd.f32 %v4725_v48, %v3171_v16  ;;  %v4811_v50 = vpop.f32.mrb[34].mxu0  ;;  %v4727_v60 = vpop.f32.mrb[15].mxu1  ;;  %5720 = vmatprep.subr.bf16.mxu1 %v7065_v34  ;;  %v6718_v30 = vadd.f32 %v4809_v47, %v3183_v46  ;;  %6684 = vmatpush3.bf16.msra.mxu0 %v7121_v15  ;;  %v4957_v16 = vrot.slane %v4952_v17, %v7488_v35 }
 0x59f   :  { %v7679_v14 = vadd.f32 %v4811_v50, %v3179_v19  ;;  %v6716_v4 = vadd.f32 %v4727_v60, %v3175_v43  ;;  %v4813_v7 = vpop.f32.mrb[35].mxu0  ;;  %v4961_v34 = vrot.slane %v4952_v17, %v7494_v39 }
 0x5a0   :  { %v4820_v53 = vpack.c.bf16 %v6715_v54, %v6713_v49  ;;  %v6720_v23 = vadd.f32 %v4813_v7, %v3183_v46 }
 0x5a1   :  { %v4822_v8 = vpack.c.bf16 %v7679_v14, %v7677_v22  ;;  %v4821_v51 = vpack.c.bf16 %v6716_v4, %v6714_v63  ;;  %5721 = vmatpush1.bf16.msra.mxu1 %v7063_v12 }
 0x5a2   :  { %v4823_v55 = vpack.c.bf16 %v6720_v23, %v6718_v30  ;;  %5733 = vmatprep.subr.bf16.mxu1 %v7068_v61 }
 0x5a3   :  { %5722 = vmatprep.mubr.bf16.mxu1 %v4821_v51 }
 0x5a4   :  { %5723 = vmatmul.mubr.bf16.vlgmr.msra.gmra.mrb[16].mxu1 %v4820_v53 }
 0x5a5   :  { %5734 = vmatpush1.bf16.msra.mxu1 %v7066_v52  ;;  %5765 = vmatprep.mubr.bf16.mxu1 %v4823_v55 }
 0x5a6   :  { %5735 = vmatprep.subr.bf16.mxu1 %v7071_v56 }
 0x5a9   :  { %5736 = vmatpush1.bf16.msra.mxu1 %v7069_v9 }
 0x5aa   :  { %5737 = vmatprep.subr.bf16.mxu1 %v7074_v0 }
 0x5ad   :  { %5738 = vmatpush1.bf16.msra.mxu1 %v7072_v3 }
 0x5ae   :  { %5739 = vmatprep.subr.bf16.mxu1 %v7077_v11 }
 0x5b1   :  { %5740 = vmatpush1.bf16.msra.mxu1 %v7075_v13 }
 0x5b2   :  { %5741 = vmatprep.subr.bf16.mxu1 %v7080_v18 }
 0x5b5   :  { %5742 = vmatpush1.bf16.msra.mxu1 %v7078_v57 }
 0x5b6   :  { %5743 = vmatprep.subr.bf16.mxu1 %v7083_v5 }
 0x5b9   :  { %5744 = vmatpush1.bf16.msra.mxu1 %v7081_v58 }
 0x5ba   :  { %5745 = vmatprep.subr.bf16.mxu1 %v7086_v59 }
 0x5bd   :  { %5746 = vmatpush1.bf16.msra.mxu1 %v7084_v62 }
 0x5be   :  { %5747 = vmatprep.subr.bf16.mxu1 %v7089_v36 }
 0x5c1   :  { %5748 = vmatpush1.bf16.msra.mxu1 %v7087_v24 }
 0x5c2   :  { %5749 = vmatprep.subr.bf16.mxu1 %v7092_v6 }
 0x5c5   :  { %5750 = vmatpush1.bf16.msra.mxu1 %v7090_v25 }
 0x5c6   :  { %5751 = vmatprep.subr.bf16.mxu1 %v7095_v26 }
 0x5c9   :  { %5752 = vmatpush1.bf16.msra.mxu1 %v7093_v27 }
 0x5ca   :  { %5753 = vmatprep.subr.bf16.mxu1 %v7098_v40 }
 0x5cd   :  { %5754 = vmatpush1.bf16.msra.mxu1 %v7096_v28 }
 0x5ce   :  { %5755 = vmatprep.subr.bf16.mxu1 %v7101_v29 }
 0x5d1   :  { %5756 = vmatpush1.bf16.msra.mxu1 %v7099_v31 }
 0x5d2   :  { %5757 = vmatprep.subr.bf16.mxu1 %v7104_v32 }
 0x5d5   :  { %5758 = vmatpush1.bf16.msra.mxu1 %v7102_v33 }
 0x5d6   :  { %5759 = vmatprep.subr.bf16.mxu1 %v7107_v37 }
 0x5d9   :  { %5760 = vmatpush1.bf16.msra.mxu1 %v7105_v41 }
 0x5da   :  { %5761 = vmatprep.subr.bf16.mxu1 %v7110_v38 }
 0x5dd   :  { %5762 = vmatpush1.bf16.msra.mxu1 %v7108_v21 }
 0x5de   :  { %5763 = vmatprep.subr.bf16.mxu1 %v7113_v42 }
 0x5e1   :  { %5764 = vmatpush1.bf16.msra.mxu1 %v7111_v1 }
 0x5e4   :  { %5766 = vmatmul.mubr.bf16.vlgmr.msra.gmra.mrb[16].mxu1 %v4822_v8 }
 0x6b7   :  { %v5767_v20 = vpop.f32.mrb[16].mxu1 }
 0x6b8   :  { %v6721_v19 = vadd.f32 %v5767_v20, %v4957_v16  ;;  %v5769_v43 = vpop.f32.mrb[17].mxu1 }
 0x6b9   :  { %v6722_v44 = vadd.f32 %v5769_v43, %v4961_v34  ;;  %v5771_v45 = vpop.f32.mrb[18].mxu1 }
 0x6ba   :  { %v6723_v46 = vadd.f32 %v5771_v45, %v4957_v16  ;;  %v5773_v47 = vpop.f32.mrb[19].mxu1 }
 0x6bb   :  { %v5776_v48 = vmax.f32 %v6721_v19, %v6722_v44  ;;  %v6724_v12 = vadd.f32 %v5773_v47, %v4961_v34 }
 0x6bd   :  { %v5777_v49 = vmax.f32 %v6723_v46, %v6724_v12 }
 0x6bf   :  { %v5778_v54 = vpack.c.bf16 %v5777_v49, %v5776_v48 }
 0x6c1   :  { %6686 = vmatmul.mubr.bf16.vlgmr.msra.gmra.mrb[36].mxu0 %v5778_v54 }
 0x794   :  { %v5884_v50 = vpop.f32.mrb[36].mxu0 }
 0x795   :  { %v5885_v35 = vadd.f32 %v6651_v10, %v5884_v50  ;;  %v6687_v60 = vpop.f32.mrb[37].mxu0 }
 0x796   :  { %v5887_v39 = vpop.f32.mrb[38].mxu0 }
 0x797   :  { %5891 = vmax.xlane.f32.xlu0 %v5885_v35  ;;  %v6688_v61 = vpop.f32.mrb[39].mxu0  ;;  %v5888_v22 = vadd.f32 %v6651_v10, %v5887_v39 }
 0x79b   :  { %5893 = vmax.xlane.f32.xlu0 %v5888_v22 }
 0x824   :  { %v5892_v63 = vpop.xlane.xlu0 %5891 }
 0x825   :  { %v5895_v14 = vsub.f32 %v5885_v35, %v5892_v63 }
 0x827   :  { %v5897_v4 = vmul.f32 1.442695, %v5895_v14 }
 0x828   :  { %v5894_v7 = vpop.xlane.xlu0 %5893 }
 0x829   :  { %7122 = vpow2.f32 %v5897_v4  ;;  %v5896_v30 = vsub.f32 %v5888_v22, %v5894_v7 }
 0x82b   :  { %v5899_v53 = vmul.f32 1.442695, %v5896_v30 }
 0x82d   :  { %7124 = vpow2.f32 %v5899_v53 }
 0x833   :  { %v7123_v23 = vpop.eup %7122 }
 0x834   :  { %5901 = vadd.xlane.f32.xlu1 %v7123_v23 }
 0x837   :  { %v7125_v8 = vpop.eup %7124 }
 0x838   :  { %5903 = vadd.xlane.f32.xlu1 %v7125_v8 }
 0x8c1   :  { %v5902_v51 = vpop.xlane.xlu1 %5901 }
 0x8c2   :  { %7126 = vrcp.f32 %v5902_v51 }
 0x8c5   :  { %v5904_v52 = vpop.xlane.xlu1 %5903 }
 0x8c6   :  { %7128 = vrcp.f32 %v5904_v52 }
 0x8cc   :  { %v7127_v55 = vpop.eup %7126 }
 0x8cd   :  { %v5907_v56 = vmul.f32 %v7127_v55, %v7123_v23 }
 0x8cf   :  { %5909 = vst [vmem:[%s7715_s13] sm:$0xff] %v5907_v56 }
 0x8d0   :  { %v7129_v9 = vpop.eup %7128 }
 0x8d1   :  { %v5908_v0 = vmul.f32 %v7129_v9, %v7125_v8 }
 0x8d3   :  { %5910 = vst [vmem:[%s7715_s13 + $0x8] sm:$0xff] %v5908_v0 }
 0x8d4   :  { %5915 = vsyncpa [#allocation3], 1 }
 0x8d5   :  { %5916 = vsyncpa [#allocation5], 1 }
 0x8d6   :  { %5917 = vsyncpa [#allocation8], 1 }
 0x8d7   :  { %5918 = vsyncpa [#allocation11], 1 }

</bundles_post_ra>
